<compile_context>
chip_gen: v7x
topology: tpu7x:2x2x1
jax: 0.10.0
libtpu: 0.0.40
codegen_flags: <defaults>
</compile_context>

<pallas_src>
import jax
import jax.numpy as jnp
from jax.experimental import pallas as pl
from jax.experimental.pallas import tpu as pltpu

# Shapes implied by the module: nn.Linear(1312, 1024) requires 32 * L == 1312  ->  L == 41.
L = 41
CIN = 4
CIN_PAD = 16           # input channels zero-padded to a full bf16 sublane pack
COUT = 32
K = 5
PAD = 2
LPAD = 48              # per-sample padded segment length (>= L + 2*PAD), 48 -> lane-friendly multiples
HALO = 128             # left halo width in the conv scratch so the activation store is 128-lane aligned
F_PAD = COUT * LPAD    # 1536 = 12 * 128 (padded, lane-dense head contraction)
F_FLAT = COUT * L      # 1312 (logical flatten size)
H_OUT = 1024
H1 = 256
EPS = 1e-5
NEG_SLOPE = 0.01       # nn.LeakyReLU default
TB_MAX = 128           # max batch rows per grid step


def _round_up(a, m):
    return (a + m - 1) // m * m


# ----------------------------- kernel 1: conv stack -----------------------------
# Activations are channels-major bf16: (C, TB*LPAD), each sample owns a contiguous LPAD=48-column
# zero-padded segment (data at columns b*LPAD+PAD .. b*LPAD+PAD+L-1).  Each Conv1d layer is a single
# im2col matmul (contraction K*Cin) with f32 accumulation; the mask re-zeroes pad columns after ReLU.

def conv_stack_kernel(x_ref, mask_ref, w1_ref, b1_ref, w2_ref, b2_ref, w3_ref, b3_ref,
                      o_ref, h1_ref, h2_ref, im_ref):
    n = o_ref.shape[1]               # TB * LPAD
    mask = mask_ref[...]             # (1, n) f32: 1.0 on data columns, 0.0 on padding columns

    # Zero only the 2-column halos adjacent to the data window; the interior is fully overwritten
    # by every layer, and columns outside [HALO-PAD, HALO+n+PAD) are never read.
    zs = jnp.zeros((CIN_PAD, PAD), jnp.bfloat16)
    zb = jnp.zeros((COUT, PAD), jnp.bfloat16)
    h1_ref[:, HALO - PAD:HALO] = zs
    h1_ref[:, HALO + n:HALO + n + PAD] = zs
    h2_ref[:, HALO - PAD:HALO] = zb
    h2_ref[:, HALO + n:HALO + n + PAD] = zb

    def conv_layer(h_ref, a, w_ref, b_ref):
        # a: (cin, n) bf16 with zeros at pad columns.  y[o, j] = sum_{c,k} w[o,c,k] * a[c, j+k-PAD].
        cin = h_ref.shape[0]
        h_ref[:, HALO:HALO + n] = a                       # 128-lane-aligned placement, zero halos on both sides
        # im2col stack: row (k*cin + c) holds a[c, j + k - PAD] at output column j.
        for k in range(K):
            im_ref[k * cin:(k + 1) * cin, :] = h_ref[:, HALO - PAD + k:HALO - PAD + k + n]
        y = jnp.dot(w_ref[...], im_ref[0:K * cin, :],
                    preferred_element_type=jnp.float32)   # bf16 MXU matmul, f32 accumulation
        y = jnp.maximum(y + b_ref[...], 0.0)              # bias + ReLU (f32)
        return (y * mask).astype(jnp.bfloat16)            # re-zero pad columns, store bf16

    g = conv_layer(h1_ref, x_ref[...], w1_ref, b1_ref)    # (32, n)
    g = conv_layer(h2_ref, g, w2_ref, b2_ref)             # (32, n)
    g = conv_layer(h2_ref, g, w3_ref, b3_ref)             # (32, n), masked conv3 output
    o_ref[...] = g                                        # lane-dense bf16 writeback


# ----------------------------- kernel 2: FC head -----------------------------
# f (TB, 1536) bf16, feature index = c*LPAD + p (pad positions carry zero weights in wo_pack).
# Linear(1312->1024) -> Linear(1024->256) -> folded eval BatchNorm -> LeakyReLU.

def head_kernel(f_ref, wo_ref, bo_ref, wl1_ref, bl1_ref, bns_ref, bnb_ref, o_ref):
    h = jnp.dot(f_ref[...], wo_ref[...],
                preferred_element_type=jnp.float32) + bo_ref[...]
    z = jnp.dot(h.astype(jnp.bfloat16), wl1_ref[...],
                preferred_element_type=jnp.float32) + bl1_ref[...]
    zn = z * bns_ref[...] + bnb_ref[...]
    o_ref[...] = jnp.where(zn >= 0.0, zn, NEG_SLOPE * zn)


# ----------------------------- parameter packing (one-time) -----------------------------

def pack_params(params):
    (w1, b1, w2, b2, w3, b3, wo, bo, wl1, bl1, bn_g, bn_b, bn_m, bn_v) = params
    # Conv weights flattened to (COUT, K*Cin) matching im2col row order k*Cin + c, cast to bf16.
    w1k = jnp.zeros((COUT, K, CIN_PAD), jnp.float32).at[:, :, :CIN].set(jnp.transpose(w1, (0, 2, 1)))
    w1f = w1k.reshape(COUT, K * CIN_PAD).astype(jnp.bfloat16)                     # (32, 80)
    w2f = jnp.transpose(w2, (0, 2, 1)).reshape(COUT, K * COUT).astype(jnp.bfloat16)   # (32, 160)
    w3f = jnp.transpose(w3, (0, 2, 1)).reshape(COUT, K * COUT).astype(jnp.bfloat16)   # (32, 160)
    # Head weight packed for the padded flatten: feature = c*LPAD + p, data at p in [PAD, PAD+L).
    wo3 = wo.reshape(H_OUT, COUT, L)                                              # wo[o, c*41 + l]
    wo_pad = jnp.zeros((H_OUT, COUT, LPAD), jnp.float32).at[:, :, PAD:PAD + L].set(wo3)
    wo_pack = jnp.transpose(wo_pad, (1, 2, 0)).reshape(F_PAD, H_OUT).astype(jnp.bfloat16)   # (1536, 1024)
    wl1_pack = wl1.T.astype(jnp.bfloat16)                                         # (1024, 256)
    # Eval-mode BatchNorm folded into scale/shift.
    bn_scale = bn_g / jnp.sqrt(bn_v + EPS)
    bn_shift = bn_b - bn_m * bn_scale
    return (w1f, b1.reshape(COUT, 1), w2f, b2.reshape(COUT, 1), w3f, b3.reshape(COUT, 1),
            wo_pack, bo.reshape(1, H_OUT), wl1_pack, bl1.reshape(1, H1),
            bn_scale.reshape(1, H1), bn_shift.reshape(1, H1))


# ----------------------------- wrapper -----------------------------

def mycnn_forward(x, packed):
    (w1f, b1p, w2f, b2p, w3f, b3p, wo_pack, bop, wl1_pack, bl1p, bns, bnb) = packed
    B = x.shape[0]
    b8 = _round_up(B, 8)
    # Batch tile: big enough to feed the MXU / amortize per-step overhead, but >= 2 grid steps when the
    # batch allows it (so v7x's two TensorCores both get work via the "parallel" grid axis).
    if b8 <= 64:
        TB = b8
    else:
        TB = min(TB_MAX, _round_up((b8 + 1) // 2, 8))
    B_pad = _round_up(b8, TB)
    n = TB * LPAD
    nsteps = B_pad // TB

    # Input pack (XLA glue, ~1 KB/sample): channels-major bf16 padded segments + data-column mask.
    xc = jnp.transpose(x.astype(jnp.bfloat16), (2, 0, 1))                      # (4, B, 41)
    x0 = (jnp.zeros((CIN_PAD, B_pad, LPAD), jnp.bfloat16)
          .at[:CIN, :B, PAD:PAD + L].set(xc)).reshape(CIN_PAD, B_pad * LPAD)   # (16, B_pad*48)
    mask = (jnp.zeros((B_pad, LPAD), jnp.float32).at[:B, PAD:PAD + L].set(1.0)
            ).reshape(1, B_pad * LPAD)

    # ---- kernel 1: conv stack, channels-major, lane-dense bf16 output ----
    g3 = pl.pallas_call(
        conv_stack_kernel,
        out_shape=jax.ShapeDtypeStruct((COUT, B_pad * LPAD), jnp.bfloat16),
        grid=(nsteps,),
        in_specs=[
            pl.BlockSpec((CIN_PAD, n), lambda i: (0, i)),           # input batch tile
            pl.BlockSpec((1, n), lambda i: (0, i)),                 # mask batch tile
            pl.BlockSpec((COUT, K * CIN_PAD), lambda i: (0, 0)),    # conv1 weight (resident)
            pl.BlockSpec((COUT, 1), lambda i: (0, 0)),
            pl.BlockSpec((COUT, K * COUT), lambda i: (0, 0)),       # conv2 weight
            pl.BlockSpec((COUT, 1), lambda i: (0, 0)),
            pl.BlockSpec((COUT, K * COUT), lambda i: (0, 0)),       # conv3 weight
            pl.BlockSpec((COUT, 1), lambda i: (0, 0)),
        ],
        out_specs=pl.BlockSpec((COUT, n), lambda i: (0, i)),
        scratch_shapes=[
            pltpu.VMEM((CIN_PAD, n + 2 * HALO), jnp.bfloat16),      # layer-1 halo buffer
            pltpu.VMEM((COUT, n + 2 * HALO), jnp.bfloat16),         # layer-2/3 halo buffer
            pltpu.VMEM((K * COUT, n), jnp.bfloat16),                # im2col stack (layer 1 uses rows 0..79)
        ],
        compiler_params=pltpu.CompilerParams(dimension_semantics=("parallel",)),
    )(x0, mask, w1f, b1p, w2f, b2p, w3f, b3p)

    # Flatten moved out of the kernel: tiny XLA transpose of ~3 KB/sample bf16 (replaces the v2
    # row-granular in-kernel gather).  Feature order c*LPAD + p matches wo_pack.
    f = g3.reshape(COUT, B_pad, LPAD).transpose(1, 0, 2).reshape(B_pad, F_PAD)

    # ---- kernel 2: weight-resident FC head ----
    out_full = pl.pallas_call(
        head_kernel,
        out_shape=jax.ShapeDtypeStruct((B_pad, H1), jnp.float32),
        grid=(nsteps,),
        in_specs=[
            pl.BlockSpec((TB, F_PAD), lambda i: (i, 0)),            # feature batch tile (bf16)
            pl.BlockSpec((F_PAD, H_OUT), lambda i: (0, 0)),         # Linear(1312->1024), packed bf16
            pl.BlockSpec((1, H_OUT), lambda i: (0, 0)),
            pl.BlockSpec((H_OUT, H1), lambda i: (0, 0)),            # Linear(1024->256), bf16
            pl.BlockSpec((1, H1), lambda i: (0, 0)),
            pl.BlockSpec((1, H1), lambda i: (0, 0)),                # BN scale
            pl.BlockSpec((1, H1), lambda i: (0, 0)),                # BN shift
        ],
        out_specs=pl.BlockSpec((TB, H1), lambda i: (i, 0)),
        compiler_params=pltpu.CompilerParams(dimension_semantics=("parallel",)),
    )(f, wo_pack, bop, wl1_pack, bl1p, bns, bnb)
    return out_full[:B]


# ----------------------------- deterministic params + pure-JAX reference -----------------------------

def init_params(key):
    ks = jax.random.split(key, 14)
    w1 = 0.20 * jax.random.normal(ks[0], (COUT, CIN, K), jnp.float32)     # Conv1d(4, 32, 5).weight
    b1 = 0.10 * jax.random.normal(ks[1], (COUT,), jnp.float32)
    w2 = 0.08 * jax.random.normal(ks[2], (COUT, COUT, K), jnp.float32)    # Conv1d(32, 32, 5).weight
    b2 = 0.10 * jax.random.normal(ks[3], (COUT,), jnp.float32)
    w3 = 0.08 * jax.random.normal(ks[4], (COUT, COUT, K), jnp.float32)
    b3 = 0.10 * jax.random.normal(ks[5], (COUT,), jnp.float32)
    wo = 0.02 * jax.random.normal(ks[6], (H_OUT, F_FLAT), jnp.float32)    # Linear(1312, 1024).weight
    bo = 0.10 * jax.random.normal(ks[7], (H_OUT,), jnp.float32)
    wl1 = 0.03 * jax.random.normal(ks[8], (H1, H_OUT), jnp.float32)       # Linear(1024, 256).weight
    bl1 = 0.10 * jax.random.normal(ks[9], (H1,), jnp.float32)
    bn_g = 1.0 + 0.1 * jax.random.normal(ks[10], (H1,), jnp.float32)      # BatchNorm1d(256) params
    bn_b = 0.1 * jax.random.normal(ks[11], (H1,), jnp.float32)
    bn_m = 0.1 * jax.random.normal(ks[12], (H1,), jnp.float32)            # running_mean
    bn_v = 0.5 + 0.2 * jax.random.uniform(ks[13], (H1,), jnp.float32)     # running_var
    return (w1, b1, w2, b2, w3, b3, wo, bo, wl1, bl1, bn_g, bn_b, bn_m, bn_v)


def reference_forward(x, params):
    (w1, b1, w2, b2, w3, b3, wo, bo, wl1, bl1, bn_g, bn_b, bn_m, bn_v) = params
    hp = jax.lax.Precision.HIGHEST

    def conv1d_relu(a, w, b):
        ll = a.shape[2]
        ap = jnp.pad(a, ((0, 0), (0, 0), (PAD, PAD)))
        out = jnp.zeros((a.shape[0], w.shape[0], ll), jnp.float32)
        for k in range(K):
            out = out + jnp.einsum('oc,bcl->bol', w[:, :, k], ap[:, :, k:k + ll], precision=hp)
        return jax.nn.relu(out + b[None, :, None])

    a = jnp.transpose(x, (0, 2, 1))
    a = conv1d_relu(a, w1, b1)
    a = conv1d_relu(a, w2, b2)
    a = conv1d_relu(a, w3, b3)
    f = a.reshape(a.shape[0], -1)
    h = jnp.dot(f, wo.T, precision=hp) + bo
    z = jnp.dot(h, wl1.T, precision=hp) + bl1
    zn = (z - bn_m) / jnp.sqrt(bn_v + EPS) * bn_g + bn_b
    return jnp.where(zn >= 0.0, zn, NEG_SLOPE * zn)


if __name__ == "__main__":
    key = jax.random.PRNGKey(0)
    kx, kp = jax.random.split(key)
    B = 8
    x = jax.random.normal(kx, (B, L, CIN), jnp.float32)   # module input: (batch, seq_len=41, channels=4)
    params = init_params(kp)

    packed = pack_params(params)                          # one-time weight repack + bf16 cast
    fwd = jax.jit(mycnn_forward)
    out = jax.block_until_ready(fwd(x, packed))
    assert out.shape == (B, H1) and out.dtype == jnp.float32

    # bf16 conv/head weights & activations give ~1e-2-level relative error vs the f32 reference.
    ref = reference_forward(x, params)
    if not bool(jnp.allclose(out, ref, atol=5e-2, rtol=5e-2)):
        raise SystemExit("mismatch: max abs diff = %e" % float(jnp.max(jnp.abs(out - ref))))
    print("KERNEL_OK")
</pallas_src>

<mosaic_0001>
module attributes {stable_mosaic.version = 11 : i64} {
  func.func @conv_stack_kernel(%arg0: i32, %arg1: memref<16x384xbf16, #tpu.memory_space<vmem>>, %arg2: memref<1x384xf32, #tpu.memory_space<vmem>>, %arg3: memref<32x80xbf16, #tpu.memory_space<vmem>>, %arg4: memref<32x1xf32, #tpu.memory_space<vmem>>, %arg5: memref<32x160xbf16, #tpu.memory_space<vmem>>, %arg6: memref<32x1xf32, #tpu.memory_space<vmem>>, %arg7: memref<32x160xbf16, #tpu.memory_space<vmem>>, %arg8: memref<32x1xf32, #tpu.memory_space<vmem>>, %arg9: memref<32x384xbf16, #tpu.memory_space<vmem>>, %arg10: memref<16x640xbf16, #tpu.memory_space<vmem>>, %arg11: memref<32x640xbf16, #tpu.memory_space<vmem>>, %arg12: memref<160x384xbf16, #tpu.memory_space<vmem>>) attributes {dimension_semantics = [#tpu.dimension_semantics<parallel>], iteration_bounds = array<i64: 1>, scalar_prefetch = 0 : i64, scratch_operands = 3 : i64, tpu.core_type = #tpu.core_type<tc>, window_params = [{transform_indices = @transform_0, window_bounds = array<i64: 16, 384>}, {transform_indices = @transform_1, window_bounds = array<i64: 1, 384>}, {pipeline_mode = #tpu.pipeline_mode<synchronous>, transform_indices = @transform_2, window_bounds = array<i64: 32, 80>}, {pipeline_mode = #tpu.pipeline_mode<synchronous>, transform_indices = @transform_3, window_bounds = array<i64: 32, 1>}, {pipeline_mode = #tpu.pipeline_mode<synchronous>, transform_indices = @transform_4, window_bounds = array<i64: 32, 160>}, {pipeline_mode = #tpu.pipeline_mode<synchronous>, transform_indices = @transform_5, window_bounds = array<i64: 32, 1>}, {pipeline_mode = #tpu.pipeline_mode<synchronous>, transform_indices = @transform_6, window_bounds = array<i64: 32, 160>}, {pipeline_mode = #tpu.pipeline_mode<synchronous>, transform_indices = @transform_7, window_bounds = array<i64: 32, 1>}, {transform_indices = @transform_8, window_bounds = array<i64: 32, 384>}]} {
    %c0 = arith.constant 0 : index
    %c0_0 = arith.constant 0 : index
    %0 = vector.load %arg2[%c0, %c0_0] : memref<1x384xf32, #tpu.memory_space<vmem>>, vector<1x384xf32>
    %cst = arith.constant 0.000000e+00 : bf16
    %1 = vector.broadcast %cst : bf16 to vector<16x2xbf16>
    %cst_1 = arith.constant 0.000000e+00 : bf16
    %2 = vector.broadcast %cst_1 : bf16 to vector<32x2xbf16>
    %c0_2 = arith.constant 0 : index
    %c126 = arith.constant 126 : index
    %3 = vector.load %arg10[%c0_2, %c126] : memref<16x640xbf16, #tpu.memory_space<vmem>>, vector<16x2xbf16>
    tpu.vector_store %arg10[%c0_2, %c126], %1 {strides = array<i32>} : memref<16x640xbf16, #tpu.memory_space<vmem>>, vector<16x2xbf16>,
    %c0_3 = arith.constant 0 : index
    %c512 = arith.constant 512 : index
    %4 = vector.load %arg10[%c0_3, %c512] : memref<16x640xbf16, #tpu.memory_space<vmem>>, vector<16x2xbf16>
    tpu.vector_store %arg10[%c0_3, %c512], %1 {strides = array<i32>} : memref<16x640xbf16, #tpu.memory_space<vmem>>, vector<16x2xbf16>,
    %c0_4 = arith.constant 0 : index
    %c126_5 = arith.constant 126 : index
    %5 = vector.load %arg11[%c0_4, %c126_5] : memref<32x640xbf16, #tpu.memory_space<vmem>>, vector<32x2xbf16>
    tpu.vector_store %arg11[%c0_4, %c126_5], %2 {strides = array<i32>} : memref<32x640xbf16, #tpu.memory_space<vmem>>, vector<32x2xbf16>,
    %c0_6 = arith.constant 0 : index
    %c512_7 = arith.constant 512 : index
    %6 = vector.load %arg11[%c0_6, %c512_7] : memref<32x640xbf16, #tpu.memory_space<vmem>>, vector<32x2xbf16>
    tpu.vector_store %arg11[%c0_6, %c512_7], %2 {strides = array<i32>} : memref<32x640xbf16, #tpu.memory_space<vmem>>, vector<32x2xbf16>,
    %c0_8 = arith.constant 0 : index
    %c0_9 = arith.constant 0 : index
    %7 = vector.load %arg1[%c0_8, %c0_9] : memref<16x384xbf16, #tpu.memory_space<vmem>>, vector<16x384xbf16>
    %c0_10 = arith.constant 0 : index
    %c128 = arith.constant 128 : index
    %8 = vector.load %arg10[%c0_10, %c128] : memref<16x640xbf16, #tpu.memory_space<vmem>>, vector<16x384xbf16>
    tpu.vector_store %arg10[%c0_10, %c128], %7 {strides = array<i32>} : memref<16x640xbf16, #tpu.memory_space<vmem>>, vector<16x384xbf16>,
    %c0_11 = arith.constant 0 : index
    %c126_12 = arith.constant 126 : index
    %9 = vector.load %arg10[%c0_11, %c126_12] : memref<16x640xbf16, #tpu.memory_space<vmem>>, vector<16x384xbf16>
    %c0_13 = arith.constant 0 : index
    %c0_14 = arith.constant 0 : index
    %10 = vector.load %arg12[%c0_13, %c0_14] : memref<160x384xbf16, #tpu.memory_space<vmem>>, vector<16x384xbf16>
    tpu.vector_store %arg12[%c0_13, %c0_14], %9 {strides = array<i32>} : memref<160x384xbf16, #tpu.memory_space<vmem>>, vector<16x384xbf16>,
    %c0_15 = arith.constant 0 : index
    %c127 = arith.constant 127 : index
    %11 = vector.load %arg10[%c0_15, %c127] : memref<16x640xbf16, #tpu.memory_space<vmem>>, vector<16x384xbf16>
    %c16 = arith.constant 16 : index
    %c0_16 = arith.constant 0 : index
    %12 = vector.load %arg12[%c16, %c0_16] : memref<160x384xbf16, #tpu.memory_space<vmem>>, vector<16x384xbf16>
    tpu.vector_store %arg12[%c16, %c0_16], %11 {strides = array<i32>} : memref<160x384xbf16, #tpu.memory_space<vmem>>, vector<16x384xbf16>,
    %c0_17 = arith.constant 0 : index
    %c128_18 = arith.constant 128 : index
    %13 = vector.load %arg10[%c0_17, %c128_18] : memref<16x640xbf16, #tpu.memory_space<vmem>>, vector<16x384xbf16>
    %c32 = arith.constant 32 : index
    %c0_19 = arith.constant 0 : index
    %14 = vector.load %arg12[%c32, %c0_19] : memref<160x384xbf16, #tpu.memory_space<vmem>>, vector<16x384xbf16>
    tpu.vector_store %arg12[%c32, %c0_19], %13 {strides = array<i32>} : memref<160x384xbf16, #tpu.memory_space<vmem>>, vector<16x384xbf16>,
    %c0_20 = arith.constant 0 : index
    %c129 = arith.constant 129 : index
    %15 = vector.load %arg10[%c0_20, %c129] : memref<16x640xbf16, #tpu.memory_space<vmem>>, vector<16x384xbf16>
    %c48 = arith.constant 48 : index
    %c0_21 = arith.constant 0 : index
    %16 = vector.load %arg12[%c48, %c0_21] : memref<160x384xbf16, #tpu.memory_space<vmem>>, vector<16x384xbf16>
    tpu.vector_store %arg12[%c48, %c0_21], %15 {strides = array<i32>} : memref<160x384xbf16, #tpu.memory_space<vmem>>, vector<16x384xbf16>,
    %c0_22 = arith.constant 0 : index
    %c130 = arith.constant 130 : index
    %17 = vector.load %arg10[%c0_22, %c130] : memref<16x640xbf16, #tpu.memory_space<vmem>>, vector<16x384xbf16>
    %c64 = arith.constant 64 : index
    %c0_23 = arith.constant 0 : index
    %18 = vector.load %arg12[%c64, %c0_23] : memref<160x384xbf16, #tpu.memory_space<vmem>>, vector<16x384xbf16>
    tpu.vector_store %arg12[%c64, %c0_23], %17 {strides = array<i32>} : memref<160x384xbf16, #tpu.memory_space<vmem>>, vector<16x384xbf16>,
    %c0_24 = arith.constant 0 : index
    %c0_25 = arith.constant 0 : index
    %19 = vector.load %arg3[%c0_24, %c0_25] : memref<32x80xbf16, #tpu.memory_space<vmem>>, vector<32x80xbf16>
    %c0_26 = arith.constant 0 : index
    %c0_27 = arith.constant 0 : index
    %20 = vector.load %arg12[%c0_26, %c0_27] : memref<160x384xbf16, #tpu.memory_space<vmem>>, vector<80x384xbf16>
    %cst_28 = arith.constant dense<0.000000e+00> : vector<32x384xf32>
    %21 = tpu.matmul %19, %20, %cst_28 {dimension_numbers = #tpu.dot_dimension_numbers<[1], [0], [0], [1], [0, 0, 1, 1], [], []>} : vector<32x80xbf16>, vector<80x384xbf16>, vector<32x384xf32> -> vector<32x384xf32>
    %c0_29 = arith.constant 0 : index
    %c0_30 = arith.constant 0 : index
    %22 = vector.load %arg4[%c0_29, %c0_30] : memref<32x1xf32, #tpu.memory_space<vmem>>, vector<32x1xf32>
    %23 = vector.broadcast %22 : vector<32x1xf32> to vector<32x384xf32>
    %24 = arith.addf %21, %23 : vector<32x384xf32>
    %cst_31 = arith.constant 0.000000e+00 : f32
    %25 = vector.broadcast %cst_31 : f32 to vector<32x384xf32>
    %26 = arith.maximumf %24, %25 : vector<32x384xf32>
    %27 = vector.broadcast %0 : vector<1x384xf32> to vector<32x384xf32>
    %28 = arith.mulf %26, %27 : vector<32x384xf32>
    %29 = arith.truncf %28 : vector<32x384xf32> to vector<32x384xbf16>
    %c0_32 = arith.constant 0 : index
    %c128_33 = arith.constant 128 : index
    %30 = vector.load %arg11[%c0_32, %c128_33] : memref<32x640xbf16, #tpu.memory_space<vmem>>, vector<32x384xbf16>
    tpu.vector_store %arg11[%c0_32, %c128_33], %29 {strides = array<i32>} : memref<32x640xbf16, #tpu.memory_space<vmem>>, vector<32x384xbf16>,
    %c0_34 = arith.constant 0 : index
    %c126_35 = arith.constant 126 : index
    %31 = vector.load %arg11[%c0_34, %c126_35] : memref<32x640xbf16, #tpu.memory_space<vmem>>, vector<32x384xbf16>
    %c0_36 = arith.constant 0 : index
    %c0_37 = arith.constant 0 : index
    %32 = vector.load %arg12[%c0_36, %c0_37] : memref<160x384xbf16, #tpu.memory_space<vmem>>, vector<32x384xbf16>
    tpu.vector_store %arg12[%c0_36, %c0_37], %31 {strides = array<i32>} : memref<160x384xbf16, #tpu.memory_space<vmem>>, vector<32x384xbf16>,
    %c0_38 = arith.constant 0 : index
    %c127_39 = arith.constant 127 : index
    %33 = vector.load %arg11[%c0_38, %c127_39] : memref<32x640xbf16, #tpu.memory_space<vmem>>, vector<32x384xbf16>
    %c32_40 = arith.constant 32 : index
    %c0_41 = arith.constant 0 : index
    %34 = vector.load %arg12[%c32_40, %c0_41] : memref<160x384xbf16, #tpu.memory_space<vmem>>, vector<32x384xbf16>
    tpu.vector_store %arg12[%c32_40, %c0_41], %33 {strides = array<i32>} : memref<160x384xbf16, #tpu.memory_space<vmem>>, vector<32x384xbf16>,
    %c0_42 = arith.constant 0 : index
    %c128_43 = arith.constant 128 : index
    %35 = vector.load %arg11[%c0_42, %c128_43] : memref<32x640xbf16, #tpu.memory_space<vmem>>, vector<32x384xbf16>
    %c64_44 = arith.constant 64 : index
    %c0_45 = arith.constant 0 : index
    %36 = vector.load %arg12[%c64_44, %c0_45] : memref<160x384xbf16, #tpu.memory_space<vmem>>, vector<32x384xbf16>
    tpu.vector_store %arg12[%c64_44, %c0_45], %35 {strides = array<i32>} : memref<160x384xbf16, #tpu.memory_space<vmem>>, vector<32x384xbf16>,
    %c0_46 = arith.constant 0 : index
    %c129_47 = arith.constant 129 : index
    %37 = vector.load %arg11[%c0_46, %c129_47] : memref<32x640xbf16, #tpu.memory_space<vmem>>, vector<32x384xbf16>
    %c96 = arith.constant 96 : index
    %c0_48 = arith.constant 0 : index
    %38 = vector.load %arg12[%c96, %c0_48] : memref<160x384xbf16, #tpu.memory_space<vmem>>, vector<32x384xbf16>
    tpu.vector_store %arg12[%c96, %c0_48], %37 {strides = array<i32>} : memref<160x384xbf16, #tpu.memory_space<vmem>>, vector<32x384xbf16>,
    %c0_49 = arith.constant 0 : index
    %c130_50 = arith.constant 130 : index
    %39 = vector.load %arg11[%c0_49, %c130_50] : memref<32x640xbf16, #tpu.memory_space<vmem>>, vector<32x384xbf16>
    %c128_51 = arith.constant 128 : index
    %c0_52 = arith.constant 0 : index
    %40 = vector.load %arg12[%c128_51, %c0_52] : memref<160x384xbf16, #tpu.memory_space<vmem>>, vector<32x384xbf16>
    tpu.vector_store %arg12[%c128_51, %c0_52], %39 {strides = array<i32>} : memref<160x384xbf16, #tpu.memory_space<vmem>>, vector<32x384xbf16>,
    %c0_53 = arith.constant 0 : index
    %c0_54 = arith.constant 0 : index
    %41 = vector.load %arg5[%c0_53, %c0_54] : memref<32x160xbf16, #tpu.memory_space<vmem>>, vector<32x160xbf16>
    %c0_55 = arith.constant 0 : index
    %c0_56 = arith.constant 0 : index
    %42 = vector.load %arg12[%c0_55, %c0_56] : memref<160x384xbf16, #tpu.memory_space<vmem>>, vector<160x384xbf16>
    %cst_57 = arith.constant dense<0.000000e+00> : vector<32x384xf32>
    %43 = tpu.matmul %41, %42, %cst_57 {dimension_numbers = #tpu.dot_dimension_numbers<[1], [0], [0], [1], [0, 0, 1, 1], [], []>} : vector<32x160xbf16>, vector<160x384xbf16>, vector<32x384xf32> -> vector<32x384xf32>
    %c0_58 = arith.constant 0 : index
    %c0_59 = arith.constant 0 : index
    %44 = vector.load %arg6[%c0_58, %c0_59] : memref<32x1xf32, #tpu.memory_space<vmem>>, vector<32x1xf32>
    %45 = vector.broadcast %44 : vector<32x1xf32> to vector<32x384xf32>
    %46 = arith.addf %43, %45 : vector<32x384xf32>
    %cst_60 = arith.constant 0.000000e+00 : f32
    %47 = vector.broadcast %cst_60 : f32 to vector<32x384xf32>
    %48 = arith.maximumf %46, %47 : vector<32x384xf32>
    %49 = vector.broadcast %0 : vector<1x384xf32> to vector<32x384xf32>
    %50 = arith.mulf %48, %49 : vector<32x384xf32>
    %51 = arith.truncf %50 : vector<32x384xf32> to vector<32x384xbf16>
    %c0_61 = arith.constant 0 : index
    %c128_62 = arith.constant 128 : index
    %52 = vector.load %arg11[%c0_61, %c128_62] : memref<32x640xbf16, #tpu.memory_space<vmem>>, vector<32x384xbf16>
    tpu.vector_store %arg11[%c0_61, %c128_62], %51 {strides = array<i32>} : memref<32x640xbf16, #tpu.memory_space<vmem>>, vector<32x384xbf16>,
    %c0_63 = arith.constant 0 : index
    %c126_64 = arith.constant 126 : index
    %53 = vector.load %arg11[%c0_63, %c126_64] : memref<32x640xbf16, #tpu.memory_space<vmem>>, vector<32x384xbf16>
    %c0_65 = arith.constant 0 : index
    %c0_66 = arith.constant 0 : index
    %54 = vector.load %arg12[%c0_65, %c0_66] : memref<160x384xbf16, #tpu.memory_space<vmem>>, vector<32x384xbf16>
    tpu.vector_store %arg12[%c0_65, %c0_66], %53 {strides = array<i32>} : memref<160x384xbf16, #tpu.memory_space<vmem>>, vector<32x384xbf16>,
    %c0_67 = arith.constant 0 : index
    %c127_68 = arith.constant 127 : index
    %55 = vector.load %arg11[%c0_67, %c127_68] : memref<32x640xbf16, #tpu.memory_space<vmem>>, vector<32x384xbf16>
    %c32_69 = arith.constant 32 : index
    %c0_70 = arith.constant 0 : index
    %56 = vector.load %arg12[%c32_69, %c0_70] : memref<160x384xbf16, #tpu.memory_space<vmem>>, vector<32x384xbf16>
    tpu.vector_store %arg12[%c32_69, %c0_70], %55 {strides = array<i32>} : memref<160x384xbf16, #tpu.memory_space<vmem>>, vector<32x384xbf16>,
    %c0_71 = arith.constant 0 : index
    %c128_72 = arith.constant 128 : index
    %57 = vector.load %arg11[%c0_71, %c128_72] : memref<32x640xbf16, #tpu.memory_space<vmem>>, vector<32x384xbf16>
    %c64_73 = arith.constant 64 : index
    %c0_74 = arith.constant 0 : index
    %58 = vector.load %arg12[%c64_73, %c0_74] : memref<160x384xbf16, #tpu.memory_space<vmem>>, vector<32x384xbf16>
    tpu.vector_store %arg12[%c64_73, %c0_74], %57 {strides = array<i32>} : memref<160x384xbf16, #tpu.memory_space<vmem>>, vector<32x384xbf16>,
    %c0_75 = arith.constant 0 : index
    %c129_76 = arith.constant 129 : index
    %59 = vector.load %arg11[%c0_75, %c129_76] : memref<32x640xbf16, #tpu.memory_space<vmem>>, vector<32x384xbf16>
    %c96_77 = arith.constant 96 : index
    %c0_78 = arith.constant 0 : index
    %60 = vector.load %arg12[%c96_77, %c0_78] : memref<160x384xbf16, #tpu.memory_space<vmem>>, vector<32x384xbf16>
    tpu.vector_store %arg12[%c96_77, %c0_78], %59 {strides = array<i32>} : memref<160x384xbf16, #tpu.memory_space<vmem>>, vector<32x384xbf16>,
    %c0_79 = arith.constant 0 : index
    %c130_80 = arith.constant 130 : index
    %61 = vector.load %arg11[%c0_79, %c130_80] : memref<32x640xbf16, #tpu.memory_space<vmem>>, vector<32x384xbf16>
    %c128_81 = arith.constant 128 : index
    %c0_82 = arith.constant 0 : index
    %62 = vector.load %arg12[%c128_81, %c0_82] : memref<160x384xbf16, #tpu.memory_space<vmem>>, vector<32x384xbf16>
    tpu.vector_store %arg12[%c128_81, %c0_82], %61 {strides = array<i32>} : memref<160x384xbf16, #tpu.memory_space<vmem>>, vector<32x384xbf16>,
    %c0_83 = arith.constant 0 : index
    %c0_84 = arith.constant 0 : index
    %63 = vector.load %arg7[%c0_83, %c0_84] : memref<32x160xbf16, #tpu.memory_space<vmem>>, vector<32x160xbf16>
    %c0_85 = arith.constant 0 : index
    %c0_86 = arith.constant 0 : index
    %64 = vector.load %arg12[%c0_85, %c0_86] : memref<160x384xbf16, #tpu.memory_space<vmem>>, vector<160x384xbf16>
    %cst_87 = arith.constant dense<0.000000e+00> : vector<32x384xf32>
    %65 = tpu.matmul %63, %64, %cst_87 {dimension_numbers = #tpu.dot_dimension_numbers<[1], [0], [0], [1], [0, 0, 1, 1], [], []>} : vector<32x160xbf16>, vector<160x384xbf16>, vector<32x384xf32> -> vector<32x384xf32>
    %c0_88 = arith.constant 0 : index
    %c0_89 = arith.constant 0 : index
    %66 = vector.load %arg8[%c0_88, %c0_89] : memref<32x1xf32, #tpu.memory_space<vmem>>, vector<32x1xf32>
    %67 = vector.broadcast %66 : vector<32x1xf32> to vector<32x384xf32>
    %68 = arith.addf %65, %67 : vector<32x384xf32>
    %cst_90 = arith.constant 0.000000e+00 : f32
    %69 = vector.broadcast %cst_90 : f32 to vector<32x384xf32>
    %70 = arith.maximumf %68, %69 : vector<32x384xf32>
    %71 = vector.broadcast %0 : vector<1x384xf32> to vector<32x384xf32>
    %72 = arith.mulf %70, %71 : vector<32x384xf32>
    %73 = arith.truncf %72 : vector<32x384xf32> to vector<32x384xbf16>
    %c0_91 = arith.constant 0 : index
    %c0_92 = arith.constant 0 : index
    %74 = vector.load %arg9[%c0_91, %c0_92] : memref<32x384xbf16, #tpu.memory_space<vmem>>, vector<32x384xbf16>
    tpu.vector_store %arg9[%c0_91, %c0_92], %73 {strides = array<i32>} : memref<32x384xbf16, #tpu.memory_space<vmem>>, vector<32x384xbf16>,
    return
  }
  func.func @transform_0(%arg0: i32) -> (i32, i32) {
    %c0_i32 = arith.constant 0 : i32
    %c0_i32_0 = arith.constant 0 : i32
    return %c0_i32, %arg0 : i32, i32
  }
  func.func @transform_1(%arg0: i32) -> (i32, i32) {
    %c0_i32 = arith.constant 0 : i32
    %c0_i32_0 = arith.constant 0 : i32
    return %c0_i32, %arg0 : i32, i32
  }
  func.func @transform_2(%arg0: i32) -> (i32, i32) {
    %c0_i32 = arith.constant 0 : i32
    %c0_i32_0 = arith.constant 0 : i32
    %c0_i32_1 = arith.constant 0 : i32
    return %c0_i32, %c0_i32_0 : i32, i32
  }
  func.func @transform_3(%arg0: i32) -> (i32, i32) {
    %c0_i32 = arith.constant 0 : i32
    %c0_i32_0 = arith.constant 0 : i32
    %c0_i32_1 = arith.constant 0 : i32
    return %c0_i32, %c0_i32_0 : i32, i32
  }
  func.func @transform_4(%arg0: i32) -> (i32, i32) {
    %c0_i32 = arith.constant 0 : i32
    %c0_i32_0 = arith.constant 0 : i32
    %c0_i32_1 = arith.constant 0 : i32
    return %c0_i32, %c0_i32_0 : i32, i32
  }
  func.func @transform_5(%arg0: i32) -> (i32, i32) {
    %c0_i32 = arith.constant 0 : i32
    %c0_i32_0 = arith.constant 0 : i32
    %c0_i32_1 = arith.constant 0 : i32
    return %c0_i32, %c0_i32_0 : i32, i32
  }
  func.func @transform_6(%arg0: i32) -> (i32, i32) {
    %c0_i32 = arith.constant 0 : i32
    %c0_i32_0 = arith.constant 0 : i32
    %c0_i32_1 = arith.constant 0 : i32
    return %c0_i32, %c0_i32_0 : i32, i32
  }
  func.func @transform_7(%arg0: i32) -> (i32, i32) {
    %c0_i32 = arith.constant 0 : i32
    %c0_i32_0 = arith.constant 0 : i32
    %c0_i32_1 = arith.constant 0 : i32
    return %c0_i32, %c0_i32_0 : i32, i32
  }
  func.func @transform_8(%arg0: i32) -> (i32, i32) {
    %c0_i32 = arith.constant 0 : i32
    %c0_i32_0 = arith.constant 0 : i32
    return %c0_i32, %arg0 : i32, i32
  }
}

module attributes {stable_mosaic.version = 11 : i64} {
  func.func @head_kernel(%arg0: i32, %arg1: memref<8x1536xbf16, #tpu.memory_space<vmem>>, %arg2: memref<1536x1024xbf16, #tpu.memory_space<vmem>>, %arg3: memref<1x1024xf32, #tpu.memory_space<vmem>>, %arg4: memref<1024x256xbf16, #tpu.memory_space<vmem>>, %arg5: memref<1x256xf32, #tpu.memory_space<vmem>>, %arg6: memref<1x256xf32, #tpu.memory_space<vmem>>, %arg7: memref<1x256xf32, #tpu.memory_space<vmem>>, %arg8: memref<8x256xf32, #tpu.memory_space<vmem>>) attributes {dimension_semantics = [#tpu.dimension_semantics<parallel>], iteration_bounds = array<i64: 1>, scalar_prefetch = 0 : i64, scratch_operands = 0 : i64, tpu.core_type = #tpu.core_type<tc>, window_params = [{transform_indices = @transform_0, window_bounds = array<i64: 8, 1536>}, {pipeline_mode = #tpu.pipeline_mode<synchronous>, transform_indices = @transform_1, window_bounds = array<i64: 1536, 1024>}, {pipeline_mode = #tpu.pipeline_mode<synchronous>, transform_indices = @transform_2, window_bounds = array<i64: 1, 1024>}, {pipeline_mode = #tpu.pipeline_mode<synchronous>, transform_indices = @transform_3, window_bounds = array<i64: 1024, 256>}, {pipeline_mode = #tpu.pipeline_mode<synchronous>, transform_indices = @transform_4, window_bounds = array<i64: 1, 256>}, {pipeline_mode = #tpu.pipeline_mode<synchronous>, transform_indices = @transform_5, window_bounds = array<i64: 1, 256>}, {pipeline_mode = #tpu.pipeline_mode<synchronous>, transform_indices = @transform_6, window_bounds = array<i64: 1, 256>}, {transform_indices = @transform_7, window_bounds = array<i64: 8, 256>}]} {
    %c0 = arith.constant 0 : index
    %c0_0 = arith.constant 0 : index
    %0 = vector.load %arg1[%c0, %c0_0] : memref<8x1536xbf16, #tpu.memory_space<vmem>>, vector<8x1536xbf16>
    %c0_1 = arith.constant 0 : index
    %c0_2 = arith.constant 0 : index
    %1 = vector.load %arg2[%c0_1, %c0_2] : memref<1536x1024xbf16, #tpu.memory_space<vmem>>, vector<1536x1024xbf16>
    %cst = arith.constant dense<0.000000e+00> : vector<8x1024xf32>
    %2 = tpu.matmul %0, %1, %cst {dimension_numbers = #tpu.dot_dimension_numbers<[1], [0], [0], [1], [0, 0, 1, 1], [], []>} : vector<8x1536xbf16>, vector<1536x1024xbf16>, vector<8x1024xf32> -> vector<8x1024xf32>
    %c0_3 = arith.constant 0 : index
    %c0_4 = arith.constant 0 : index
    %3 = vector.load %arg3[%c0_3, %c0_4] : memref<1x1024xf32, #tpu.memory_space<vmem>>, vector<1x1024xf32>
    %4 = vector.broadcast %3 : vector<1x1024xf32> to vector<8x1024xf32>
    %5 = arith.addf %2, %4 : vector<8x1024xf32>
    %6 = arith.truncf %5 : vector<8x1024xf32> to vector<8x1024xbf16>
    %c0_5 = arith.constant 0 : index
    %c0_6 = arith.constant 0 : index
    %7 = vector.load %arg4[%c0_5, %c0_6] : memref<1024x256xbf16, #tpu.memory_space<vmem>>, vector<1024x256xbf16>
    %cst_7 = arith.constant dense<0.000000e+00> : vector<8x256xf32>
    %8 = tpu.matmul %6, %7, %cst_7 {dimension_numbers = #tpu.dot_dimension_numbers<[1], [0], [0], [1], [0, 0, 1, 1], [], []>} : vector<8x1024xbf16>, vector<1024x256xbf16>, vector<8x256xf32> -> vector<8x256xf32>
    %c0_8 = arith.constant 0 : index
    %c0_9 = arith.constant 0 : index
    %9 = vector.load %arg5[%c0_8, %c0_9] : memref<1x256xf32, #tpu.memory_space<vmem>>, vector<1x256xf32>
    %10 = vector.broadcast %9 : vector<1x256xf32> to vector<8x256xf32>
    %11 = arith.addf %8, %10 : vector<8x256xf32>
    %c0_10 = arith.constant 0 : index
    %c0_11 = arith.constant 0 : index
    %12 = vector.load %arg6[%c0_10, %c0_11] : memref<1x256xf32, #tpu.memory_space<vmem>>, vector<1x256xf32>
    %13 = vector.broadcast %12 : vector<1x256xf32> to vector<8x256xf32>
    %14 = arith.mulf %11, %13 : vector<8x256xf32>
    %c0_12 = arith.constant 0 : index
    %c0_13 = arith.constant 0 : index
    %15 = vector.load %arg7[%c0_12, %c0_13] : memref<1x256xf32, #tpu.memory_space<vmem>>, vector<1x256xf32>
    %16 = vector.broadcast %15 : vector<1x256xf32> to vector<8x256xf32>
    %17 = arith.addf %14, %16 : vector<8x256xf32>
    %cst_14 = arith.constant 0.000000e+00 : f32
    %18 = vector.broadcast %cst_14 : f32 to vector<8x256xf32>
    %19 = arith.cmpf oge, %17, %18 : vector<8x256xf32>
    %cst_15 = arith.constant 0.00999999977 : f32
    %20 = vector.broadcast %cst_15 : f32 to vector<8x256xf32>
    %21 = arith.mulf %20, %17 : vector<8x256xf32>
    %22 = arith.select %19, %17, %21 : vector<8x256xi1>, vector<8x256xf32>
    %c0_16 = arith.constant 0 : index
    %c0_17 = arith.constant 0 : index
    %23 = vector.load %arg8[%c0_16, %c0_17] : memref<8x256xf32, #tpu.memory_space<vmem>>, vector<8x256xf32>
    tpu.vector_store %arg8[%c0_16, %c0_17], %22 {strides = array<i32>} : memref<8x256xf32, #tpu.memory_space<vmem>>, vector<8x256xf32>,
    return
  }
  func.func @transform_0(%arg0: i32) -> (i32, i32) {
    %c0_i32 = arith.constant 0 : i32
    %c0_i32_0 = arith.constant 0 : i32
    return %arg0, %c0_i32 : i32, i32
  }
  func.func @transform_1(%arg0: i32) -> (i32, i32) {
    %c0_i32 = arith.constant 0 : i32
    %c0_i32_0 = arith.constant 0 : i32
    %c0_i32_1 = arith.constant 0 : i32
    return %c0_i32, %c0_i32_0 : i32, i32
  }
  func.func @transform_2(%arg0: i32) -> (i32, i32) {
    %c0_i32 = arith.constant 0 : i32
    %c0_i32_0 = arith.constant 0 : i32
    %c0_i32_1 = arith.constant 0 : i32
    return %c0_i32, %c0_i32_0 : i32, i32
  }
  func.func @transform_3(%arg0: i32) -> (i32, i32) {
    %c0_i32 = arith.constant 0 : i32
    %c0_i32_0 = arith.constant 0 : i32
    %c0_i32_1 = arith.constant 0 : i32
    return %c0_i32, %c0_i32_0 : i32, i32
  }
  func.func @transform_4(%arg0: i32) -> (i32, i32) {
    %c0_i32 = arith.constant 0 : i32
    %c0_i32_0 = arith.constant 0 : i32
    %c0_i32_1 = arith.constant 0 : i32
    return %c0_i32, %c0_i32_0 : i32, i32
  }
  func.func @transform_5(%arg0: i32) -> (i32, i32) {
    %c0_i32 = arith.constant 0 : i32
    %c0_i32_0 = arith.constant 0 : i32
    %c0_i32_1 = arith.constant 0 : i32
    return %c0_i32, %c0_i32_0 : i32, i32
  }
  func.func @transform_6(%arg0: i32) -> (i32, i32) {
    %c0_i32 = arith.constant 0 : i32
    %c0_i32_0 = arith.constant 0 : i32
    %c0_i32_1 = arith.constant 0 : i32
    return %c0_i32, %c0_i32_0 : i32, i32
  }
  func.func @transform_7(%arg0: i32) -> (i32, i32) {
    %c0_i32 = arith.constant 0 : i32
    %c0_i32_0 = arith.constant 0 : i32
    return %arg0, %c0_i32 : i32, i32
  }
}

</mosaic_0001>

<bundles_post_ra>
// kernel: mycnn_forward.2
= control target key start
LH: loop header
LB: loop body
LE: loop exit
PB: predicated region body
PF: predicated region fallthrough
CT: control target
= control target key end

     0   :  { %13 = vsyncpa [#allocation6], 0  ;;  %s2016_s0 = inlined_call_operand.vmem [shape: bf16[16,384], index: 0, kind: input, shape index: {}]   ;;  %s2017_s1 = inlined_call_operand.vmem [shape: f32[1,384], index: 1, kind: input, shape index: {}]   ;;  %s2018_s2 = inlined_call_operand.hbm [shape: bf16[32,80], index: 2, kind: input, shape index: {}]   ;;  %s2019_s3 = inlined_call_operand.vmem [shape: f32[32,1], index: 3, kind: input, shape index: {}]   ;;  %s2020_s4 = inlined_call_operand.hbm [shape: bf16[32,160], index: 4, kind: input, shape index: {}]   ;;  %s2021_s5 = inlined_call_operand.vmem [shape: f32[32,1], index: 5, kind: input, shape index: {}]   ;;  %s2022_s6 = inlined_call_operand.hbm [shape: bf16[32,160], index: 6, kind: input, shape index: {}]   ;;  %s2023_s7 = inlined_call_operand.vmem [shape: f32[32,1], index: 7, kind: input, shape index: {}]   ;;  %s2024_s8 = inlined_call_operand.vmem [shape: bf16[32,384], index: 8, kind: output, shape index: {}]  }
   0x1   :  { %14 = vsyncpa [#allocation8], 0  ;;  %s1498_s27 = smov [#allocation7]   ;;  %s1428_s9 = scalar_lea.hbm %s2020_s4, 512 }
   0x2   :  { %s38_s28 = sshll.u32 %s1498_s27, 4  ;;  %p1429_p0 = scmp.ne.s32.totalorder %s2020_s4, %s1428_s9  ;;  %s39_s28 = int_to_ptr.vmem [resolvable:$true] %s38_s28 }
   0x3   :  { %p1432_p1 = scmp.lt.u32.totalorder %s1428_s9, %s2020_s4 }
   0x5   :  { %p1434_p2 = pnand %p1432_p1, %p1429_p0 }
   0x7   :  { %1437 = shalt.err (!%p1434_p2)
}
   0x8   :  { %s1438_s14 = scalar_lea.vmem %s39_s28, 512  ;;  %p1443_p4 = scmp.lt.s32.totalorder %s39_s28, %s39_s28 }
   0x9   :  { %p1439_p3 = scmp.ne.s32.totalorder %s39_s28, %s1438_s14  ;;  %p1444_p5 = scmp.lt.s32.totalorder %s1438_s14, %s1438_s14 }
   0xb   :  { %p1445_p6 = por %p1444_p5, %p1443_p4 }
   0xd   :  { %p1446_p7 = pnand %p1445_p6, %p1439_p3 }
   0xf   :  { %1449 = shalt.err (!%p1446_p7)
}
  0x10   :  { %s1499_s15 = smov 128   ;;  %s1500_s16 = smov 8  }
  0x11   :  { %44 = dma.hbm_to_vmem [thread:$0]  %s2020_s4, 512, %s39_s28, [#allocation8], %s1499_s15, %s1499_s15, %s1500_s16  }
  0x12   :  { %s1501_s19 = smov [#allocation5]   ;;  %s1450_s23 = scalar_lea.hbm %s2018_s2, 256 }
  0x13   :  { %s24_s20 = sshll.u32 %s1501_s19, 4  ;;  %p1451_p8 = scmp.ne.s32.totalorder %s2018_s2, %s1450_s23  ;;  %s25_s20 = int_to_ptr.vmem [resolvable:$true] %s24_s20 }
  0x14   :  { %p1454_p9 = scmp.lt.u32.totalorder %s1450_s23, %s2018_s2 }
  0x16   :  { %p1456_p10 = pnand %p1454_p9, %p1451_p8 }
  0x18   :  { %1459 = shalt.err (!%p1456_p10)
}
  0x19   :  { %s1460_s29 = scalar_lea.vmem %s25_s20, 256  ;;  %p1465_p12 = scmp.lt.s32.totalorder %s25_s20, %s25_s20 }
  0x1a   :  { %p1461_p11 = scmp.ne.s32.totalorder %s25_s20, %s1460_s29  ;;  %p1466_p13 = scmp.lt.s32.totalorder %s1460_s29, %s1460_s29 }
  0x1c   :  { %p1467_p0 = por %p1466_p13, %p1465_p12 }
  0x1e   :  { %p1468_p1 = pnand %p1467_p0, %p1461_p11 }
  0x20   :  { %1471 = shalt.err (!%p1468_p1)
}
  0x21   :  { %s1502_s4 = smov 64   ;;  %s1503_s28 = smov 4  }
  0x22   :  { %30 = dma.hbm_to_vmem [thread:$0]  %s2018_s2, 256, %s25_s20, [#allocation6], %s1502_s4, %s1502_s4, %s1503_s28  }
  0x23   :  { %s1504_s10 = smov [#allocation9]   ;;  %s1472_s14 = scalar_lea.hbm %s2022_s6, 512 }
  0x24   :  { %s52_s11 = sshll.u32 %s1504_s10, 4  ;;  %p1473_p2 = scmp.ne.s32.totalorder %s2022_s6, %s1472_s14  ;;  %s53_s11 = int_to_ptr.vmem [resolvable:$true] %s52_s11 }
  0x25   :  { %p1476_p3 = scmp.lt.u32.totalorder %s1472_s14, %s2022_s6 }
  0x27   :  { %p1478_p4 = pnand %p1476_p3, %p1473_p2 }
  0x29   :  { %1481 = shalt.err (!%p1478_p4)
}
  0x2a   :  { %s1482_s22 = scalar_lea.vmem %s53_s11, 512  ;;  %p1487_p6 = scmp.lt.s32.totalorder %s53_s11, %s53_s11 }
  0x2b   :  { %p1483_p5 = scmp.ne.s32.totalorder %s53_s11, %s1482_s22  ;;  %p1488_p7 = scmp.lt.s32.totalorder %s1482_s22, %s1482_s22 }
  0x2d   :  { %p1489_p8 = por %p1488_p7, %p1487_p6 }
  0x2f   :  { %p1490_p9 = pnand %p1489_p8, %p1483_p5 }
  0x31   :  { %1493 = shalt.err (!%p1490_p9)
}
  0x32   :  { %58 = dma.hbm_to_vmem [thread:$0]  %s2022_s6, 512, %s53_s11, [#allocation8], %s1499_s15, %s1499_s15, %s1500_s16  }
  0x33   :  { %1494 = dma.done.wait [#allocation6], 256  }
  0x34   :  { %1495 = vsyncadd [#allocation6], 4294967040 }
  0x35   :  { %1496 = dma.done.wait [#allocation8], 1024  }
  0x36   :  { %1497 = vsyncadd [#allocation8], 4294966272  ;;  %vm72_vm0 = vcmask 1048560   ;;  %v1505_v0 = vmov 0   ;;  %vm74_vm1 = vcmask 15360   ;;  %s1506_s24 = smov 2   ;;  %v388_v42 = vlaneseq }
  0x37   :  { %73 = vst.msk [vmem:[#allocation2] sm:$0xff] %vm72_vm0, %v1505_v0  ;;  %76 = vst.msk [vmem:[#allocation3] sm:$0xff] %vm72_vm0, %v1505_v0  ;;  %305 = vmatprep.mubr.bf16.mxu0 %v1505_v0  ;;  %1409 = vset.pattern.permute.xlu1 %v1505_v0  ;;  %v1410_v1 = vld [vmem:[%s2016_s0] ss:$12 sps:$4 sm:$0xff]   ;;  %v1412_v3 = vld [vmem:[%s2016_s0 + $0x4] ss:$12 sps:$4 sm:$0xff]  }
  0x38   :  { %77 = vst.msk [vmem:[#allocation3 + $0x28] sm:$0xff] %vm72_vm0, %v1505_v0  ;;  %1408 = vset.pattern.permute.xlu0 %v1505_v0  ;;  %v1620_v4 = vld [vmem:[%s2016_s0 + $0x8] ss:$12 sps:$4 sm:$0xff]   ;;  %s1507_s27 = smov 1   ;;  %v1630_v5 = vld [vmem:[#allocation5] sm:$0xff]   ;;  %s1508_s29 = smov 127  }
  0x39   :  { %75 = vst.msk [vmem:[#allocation2 + $0x20] sm:$0xff] %vm74_vm1, %v1505_v0  ;;  %78 = vst.msk [vmem:[#allocation3 + $0x20] sm:$0xff] %vm74_vm1, %v1505_v0  ;;  %113 = vrot.lane.b32.xlu0 %v1410_v1, %s1506_s24  ;;  %vm266_vm2 = vcmask 654336   ;;  %s1509_s0 = smov 126   ;;  %v232_v7 = vld [vmem:[%s2019_s3] sm:$0xff]  ;;  %v233_v8 = vld [vmem:[%s2019_s3 + $0x8] sm:$0xff] }
  0x3a   :  { %79 = vst.msk [vmem:[#allocation3 + $0x48] sm:$0xff] %vm74_vm1, %v1505_v0  ;;  %1392 = vmatprep.mubr.msk.bf16.mxu1 %vm266_vm2, %v1630_v5  ;;  %v235_v9 = vld [vmem:[%s2019_s3 + $0x18] sm:$0xff]  ;;  %v234_v10 = vld [vmem:[%s2019_s3 + $0x10] sm:$0xff]  ;;  %vm145_vm3 = vcmask 7168   ;;  %vm177_vm4 = vcmask 1039360   ;;  %vm203_vm5 = vcmask 1031168  }
  0x3b   :  { %v1415_v39 = vld [vmem:[#allocation5 + $0x8] sm:$0xff]   ;;  %v389_v43 = vshrl.u32 %v388_v42, 7  ;;  %vm715_vm6 = vcmask 261120  }
  0x3c   :  { %v71_v47 = vld [vmem:[%s2017_s1] sm:$0x7] }
  0x3d   :  { %115 = vrot.lane.b32.xlu0 %v1412_v3, %s1506_s24  ;;  %v390_v44 = vsub.s32 0, %v389_v43  ;;  %v394_v45 = vsub.s32 1, %v389_v43 }
  0x3e   :  { %v103_v2 = vld [vmem:[#allocation2] sm:$0xff]  ;;  %v1676_v40 = vld [vmem:[#allocation3] sm:$0xff] }
  0x3f   :  { %111 = vrot.lane.b32.xlu1 %v103_v2, %s1506_s24  ;;  %v1680_v41 = vld [vmem:[#allocation3 + $0x28] sm:$0xff]  ;;  %v1691_v52 = vrot.slane %v71_v47, %v390_v44  ;;  %v1693_v54 = vrot.slane %v71_v47, %v394_v45 }
  0x40   :  { %v190_v6 = vld [vmem:[#allocation2 + $0x20] sm:$0xff] }
  0x41   :  { %141 = vrot.lane.b32.xlu0 %v1412_v3, %s1507_s27 }
  0x43   :  { %137 = vrot.lane.b32.xlu1 %v103_v2, %s1507_s27  ;;  %v398_v2 = vsub.s32 2, %v389_v43 }
  0x45   :  { %117 = vrot.lane.b32.xlu0 %v1620_v4, %s1506_s24 }
  0x47   :  { %139 = vrot.lane.b32.xlu1 %v1410_v1, %s1507_s27 }
  0x49   :  { %171 = vrot.lane.b32.xlu0 %v1412_v3, %s1508_s29 }
  0x4b   :  { %143 = vrot.lane.b32.xlu1 %v1620_v4, %s1507_s27 }
  0x4d   :  { %169 = vrot.lane.b32.xlu0 %v1410_v1, %s1508_s29 }
  0x4f   :  { %173 = vrot.lane.b32.xlu1 %v1620_v4, %s1508_s29 }
  0x51   :  { %199 = vrot.lane.b32.xlu0 %v1620_v4, %s1509_s0 }
  0x53   :  { %197 = vrot.lane.b32.xlu1 %v1412_v3, %s1509_s0 }
  0x55   :  { %175 = vrot.lane.b32.xlu0 %v190_v6, %s1508_s29 }
  0x57   :  { %195 = vrot.lane.b32.xlu1 %v1410_v1, %s1509_s0 }
  0x59   :  { %238 = vperm.xlu0 %1408, %v232_v7  }
  0x5b   :  { %201 = vrot.lane.b32.xlu1 %v190_v6, %s1509_s0 }
  0x5d   :  { %253 = vperm.xlu0 %1408, %v235_v9  }
  0x5f   :  { %243 = vperm.xlu1 %1409, %v233_v8  }
  0x63   :  { %248 = vperm.xlu1 %1409, %v234_v10  }
  0x67   :  { %443 = vrot.lane.b32.xlu1 %v1676_v40, %s1506_s24 }
  0x6b   :  { %451 = vrot.lane.b32.xlu1 %v1680_v41, %s1506_s24 }
  0x6f   :  { %493 = vrot.lane.b32.xlu1 %v1676_v40, %s1507_s27 }
  0x73   :  { %501 = vrot.lane.b32.xlu1 %v1680_v41, %s1507_s27 }
  0xab   :  { %v114_v12 = vpop.permute.xlu0 %113 }
  0xaf   :  { %v116_v14 = vpop.permute.xlu0 %115 }
  0xb0   :  { %v121_v15 = vsel %vm74_vm1, %v114_v12, %v116_v14 }
  0xb1   :  { %v112_v11 = vpop.permute.xlu1 %111  ;;  %273 = vmatprep.subr.bf16.mxu0 %v121_v15  ;;  %v1703_v15 = vrot.slane %v71_v47, %v398_v2 }
  0xb2   :  { %v120_v16 = vsel %vm74_vm1, %v112_v11, %v114_v12 }
  0xb3   :  { %274 = vmatpush1.bf16.msra.mxu0 %v120_v16  ;;  %v142_v18 = vpop.permute.xlu0 %141 }
  0xb5   :  { %v138_v13 = vpop.permute.xlu1 %137 }
  0xb7   :  { %v118_v22 = vpop.permute.xlu0 %117 }
  0xb8   :  { %v122_v23 = vsel %vm74_vm1, %v116_v14, %v118_v22 }
  0xb9   :  { %v140_v17 = vpop.permute.xlu1 %139  ;;  %1382 = vmatprep.subr.bf16.mxu1 %v122_v23 }
  0xba   :  { %v147_v19 = vsel %vm145_vm3, %v140_v17, %v142_v18  ;;  %v146_v20 = vsel %vm145_vm3, %v138_v13, %v140_v17  ;;  %1383 = vmatpush3.bf16.msra.mxu1 %v122_v23 }
  0xbb   :  { %275 = vmatprep.subr.bf16.mxu0 %v147_v19  ;;  %v172_v26 = vpop.permute.xlu0 %171 }
  0xbc   :  { %276 = vmatpush1.bf16.msra.mxu0 %v146_v20 }
  0xbd   :  { %v144_v21 = vpop.permute.xlu1 %143  ;;  %277 = vmatprep.subr.bf16.mxu0 %v1412_v3 }
  0xbe   :  { %v148_v24 = vsel %vm145_vm3, %v142_v18, %v144_v21 }
  0xbf   :  { %1384 = vmatprep.subr.bf16.mxu1 %v148_v24  ;;  %v170_v29 = vpop.permute.xlu0 %169 }
  0xc0   :  { %278 = vmatpush1.bf16.msra.mxu0 %v1410_v1  ;;  %1385 = vmatpush3.bf16.msra.mxu1 %v148_v24  ;;  %v178_v30 = vsel %vm177_vm4, %v170_v29, %v172_v26 }
  0xc1   :  { %v174_v25 = vpop.permute.xlu1 %173  ;;  %1386 = vmatprep.subr.bf16.mxu1 %v1620_v4 }
  0xc2   :  { %v179_v27 = vsel %vm177_vm4, %v172_v26, %v174_v25 }
  0xc3   :  { %279 = vmatprep.subr.bf16.mxu0 %v179_v27  ;;  %v200_v32 = vpop.permute.xlu0 %199 }
  0xc4   :  { %280 = vmatpush1.bf16.msra.mxu0 %v178_v30  ;;  %1387 = vmatpush3.bf16.msra.mxu1 %v1620_v4 }
  0xc5   :  { %v198_v28 = vpop.permute.xlu1 %197 }
  0xc6   :  { %v205_v33 = vsel %vm203_vm5, %v198_v28, %v200_v32 }
  0xc7   :  { %281 = vmatprep.subr.bf16.mxu0 %v205_v33  ;;  %v176_v36 = vpop.permute.xlu0 %175 }
  0xc8   :  { %v180_v37 = vsel %vm177_vm4, %v174_v25, %v176_v36 }
  0xc9   :  { %v196_v31 = vpop.permute.xlu1 %195  ;;  %1388 = vmatprep.subr.bf16.mxu1 %v180_v37 }
  0xca   :  { %v204_v34 = vsel %vm203_vm5, %v196_v31, %v198_v28  ;;  %1389 = vmatpush3.bf16.msra.mxu1 %v180_v37 }
  0xcb   :  { %282 = vmatpush1.bf16.msra.mxu0 %v204_v34 }
  0xcd   :  { %v202_v35 = vpop.permute.xlu1 %201 }
  0xce   :  { %1339 = vmatmul.mubr.msk.bf16.vlgmr.msra.gmra.mrb[0].mxu0 %vm266_vm2, %v1630_v5  ;;  %v206_v38 = vsel %vm203_vm5, %v200_v32, %v202_v35 }
  0xcf   :  { %315 = vmatprep.mubr.bf16.mxu0 %v1505_v0  ;;  %1390 = vmatprep.subr.bf16.mxu1 %v206_v38 }
  0xd0   :  { %1391 = vmatpush3.bf16.msra.mxu1 %v206_v38 }
  0xd1   :  { %775 = vmatprep.subr.bf16.mxu1 %v1505_v0 }
  0xd3   :  { %1393 = vmatmul.mubr.msk.bf16.vlgmr.msra.gmra.mrb[0].mxu1 %vm266_vm2, %v1415_v39 }
  0xd6   :  { %1340 = vmatmul.mubr.msk.bf16.gmra.mrb[4].mxu0 %vm266_vm2, %v1415_v39 }
  0xd8   :  { %v239_v46 = vpop.permute.xlu0 %238 }
  0xdc   :  { %v254_v4 = vpop.permute.xlu0 %253 }
  0xde   :  { %v244_v49 = vpop.permute.xlu1 %243 }
  0xe2   :  { %v249_v5 = vpop.permute.xlu1 %248 }
 0x1a1   :  { %v307_v48 = vpop.f32.mrb[0].mxu0 }
 0x1a2   :  { %v309_v50 = vpop.f32.mrb[1].mxu0  ;;  %v308_v51 = vadd.f32 %v307_v48, %v239_v46  ;;  %v1761_v48 = vld [vmem:[#allocation3 + $0x20] sm:$0xff] }
 0x1a3   :  { %v310_v53 = vadd.f32 %v309_v50, %v239_v46  ;;  %v311_v55 = vpop.f32.mrb[2].mxu0  ;;  %v1772_v50 = vld [vmem:[#allocation3 + $0x48] sm:$0xff] }
 0x1a4   :  { %v375_v56 = vmax.f32 %v308_v51, 0.0  ;;  %v312_v57 = vadd.f32 %v311_v55, %v244_v49  ;;  %v313_v58 = vpop.f32.mrb[3].mxu0  ;;  %v675_v51 = vld [vmem:[%s2021_s5 + $0x10] sm:$0xff]  ;;  %v674_v55 = vld [vmem:[%s2021_s5 + $0x8] sm:$0xff] }
 0x1a5   :  { %v376_v59 = vmax.f32 %v310_v53, 0.0  ;;  %v314_v60 = vadd.f32 %v313_v58, %v244_v49  ;;  %v1418_v53 = vld [vmem:[#allocation7 + $0x4] ss:$8 sps:$4 sm:$0xff]  }
 0x1a6   :  { %v403_v61 = vmul.f32 %v1691_v52, %v375_v56  ;;  %v378_v62 = vmax.f32 %v312_v57, 0.0  ;;  %v1394_v8 = vpop.f32.mrb[0].mxu1  ;;  %1347 = vmatprep.mubr.msk.bf16.mxu0 %vm715_vm6, %v1418_v53  ;;  %1349 = vmatprep.mubr.msk.bf16.mxu1 %vm715_vm6, %v1418_v53  ;;  %v676_v56 = vld [vmem:[%s2021_s5 + $0x18] sm:$0xff]  ;;  %v444_v57 = vpop.permute.xlu1 %443 }
 0x1a7   :  { %v404_v63 = vmul.f32 %v1693_v54, %v376_v59  ;;  %v379_v1 = vmax.f32 %v314_v60, 0.0  ;;  %v369_v11 = vadd.f32 %v1394_v8, %v249_v5  ;;  %v360_v13 = vpop.f32.mrb[1].mxu1  ;;  %v1419_v53 = vld [vmem:[#allocation7 + $0x14] ss:$8 sps:$4 sm:$0xff]  }
 0x1a8   :  { %v406_v3 = vmul.f32 %v1691_v52, %v378_v62  ;;  %v361_v17 = vadd.f32 %v360_v13, %v239_v46  ;;  %v1395_v19 = vpop.f32.mrb[2].mxu1 }
 0x1a9   :  { %v407_v6 = vmul.f32 %v1693_v54, %v379_v1  ;;  %v317_v7 = vpop.f32.mrb[4].mxu0  ;;  %v383_v21 = vmax.f32 %v369_v11, 0.0  ;;  %v372_v23 = vadd.f32 %v1395_v19, %v254_v4  ;;  %v363_v25 = vpop.f32.mrb[3].mxu1 }
 0x1aa   :  { %v1699_v9 = vpack.c.bf16 %v406_v3, %v403_v61  ;;  %v318_v10 = vadd.f32 %v317_v7, %v249_v5  ;;  %v319_v12 = vpop.f32.mrb[5].mxu0  ;;  %v377_v27 = vmax.f32 %v361_v17, 0.0  ;;  %v364_v29 = vadd.f32 %v363_v25, %v244_v49  ;;  %v673_v49 = vld [vmem:[%s2021_s5] sm:$0xff]  ;;  %v452_v58 = vpop.permute.xlu1 %451 }
 0x1ab   :  { %v1701_v14 = vpack.c.bf16 %v407_v6, %v404_v63  ;;  %v320_v16 = vadd.f32 %v319_v12, %v249_v5  ;;  %v321_v18 = vpop.f32.mrb[6].mxu0  ;;  %v386_v31 = vmax.f32 %v372_v23, 0.0  ;;  %v411_v35 = vmul.f32 %v1703_v15, %v383_v21 }
 0x1ac   :  { %v381_v20 = vmax.f32 %v318_v10, 0.0  ;;  %v322_v22 = vadd.f32 %v321_v18, %v254_v4  ;;  %v323_v24 = vpop.f32.mrb[7].mxu0  ;;  %445 = vrot.lane.b32.xlu1 %v1699_v9, %s1506_s24  ;;  %v380_v33 = vmax.f32 %v364_v29, 0.0  ;;  %v405_v39 = vmul.f32 %v1703_v15, %v377_v27 }
 0x1ad   :  { %v382_v26 = vmax.f32 %v320_v16, 0.0  ;;  %v324_v28 = vadd.f32 %v323_v24, %v254_v4  ;;  %v414_v37 = vmul.f32 %v1703_v15, %v386_v31 }
 0x1ae   :  { %v384_v30 = vmax.f32 %v322_v22, 0.0  ;;  %v409_v34 = vmul.f32 %v1691_v52, %v381_v20  ;;  %v408_v43 = vmul.f32 %v1703_v15, %v380_v33  ;;  %v494_v59 = vpop.permute.xlu1 %493 }
 0x1af   :  { %v385_v32 = vmax.f32 %v324_v28, 0.0  ;;  %v410_v38 = vmul.f32 %v1693_v54, %v382_v26  ;;  %v1719_v45 = vpack.c.bf16 %v414_v37, %v411_v35 }
 0x1b0   :  { %v412_v36 = vmul.f32 %v1691_v52, %v384_v30  ;;  %495 = vrot.lane.b32.xlu1 %v1699_v9, %s1507_s27  ;;  %v1723_v47 = vpack.c.bf16 %v408_v43, %v405_v39 }
 0x1b1   :  { %v413_v42 = vmul.f32 %v1693_v54, %v385_v32  ;;  %457 = vrot.lane.b32.xlu0 %v1719_v45, %s1506_s24 }
 0x1b2   :  { %v1717_v44 = vpack.c.bf16 %v412_v36, %v409_v34 }
 0x1b3   :  { %v1721_v46 = vpack.c.bf16 %v413_v42, %v410_v38 }
 0x1b4   :  { %453 = vrot.lane.b32.xlu1 %v1717_v44, %s1506_s24 }
 0x1b5   :  { %507 = vrot.lane.b32.xlu0 %v1719_v45, %s1507_s27 }
 0x1b8   :  { %557 = vrot.lane.b32.xlu1 %v1701_v14, %s1508_s29 }
 0x1b9   :  { %447 = vrot.lane.b32.xlu0 %v1701_v14, %s1506_s24 }
 0x1bc   :  { %503 = vrot.lane.b32.xlu1 %v1717_v44, %s1507_s27 }
 0x1bd   :  { %449 = vrot.lane.b32.xlu0 %v1723_v47, %s1506_s24 }
 0x1c0   :  { %555 = vrot.lane.b32.xlu1 %v1699_v9, %s1508_s29 }
 0x1c1   :  { %497 = vrot.lane.b32.xlu0 %v1701_v14, %s1507_s27 }
 0x1c4   :  { %563 = vrot.lane.b32.xlu1 %v1717_v44, %s1508_s29 }
 0x1c5   :  { %499 = vrot.lane.b32.xlu0 %v1723_v47, %s1507_s27 }
 0x1c8   :  { %607 = vrot.lane.b32.xlu1 %v1701_v14, %s1509_s0 }
 0x1c9   :  { %455 = vrot.lane.b32.xlu0 %v1721_v46, %s1506_s24 }
 0x1cc   :  { %565 = vrot.lane.b32.xlu1 %v1721_v46, %s1508_s29 }
 0x1cd   :  { %559 = vrot.lane.b32.xlu0 %v1723_v47, %s1508_s29 }
 0x1d0   :  { %605 = vrot.lane.b32.xlu1 %v1699_v9, %s1509_s0 }
 0x1d1   :  { %505 = vrot.lane.b32.xlu0 %v1721_v46, %s1507_s27 }
 0x1d4   :  { %615 = vrot.lane.b32.xlu1 %v1721_v46, %s1509_s0 }
 0x1d5   :  { %561 = vrot.lane.b32.xlu0 %v1761_v48, %s1508_s29 }
 0x1d8   :  { %613 = vrot.lane.b32.xlu1 %v1717_v44, %s1509_s0 }
 0x1d9   :  { %567 = vrot.lane.b32.xlu0 %v1719_v45, %s1508_s29 }
 0x1dc   :  { %679 = vperm.xlu1 %1409, %v673_v49  }
 0x1dd   :  { %569 = vrot.lane.b32.xlu0 %v1772_v50, %s1508_s29 }
 0x1e0   :  { %689 = vperm.xlu1 %1409, %v675_v51   ;;  %v1416_v51 = vld [vmem:[#allocation7] ss:$8 sps:$4 sm:$0xff]  }
 0x1e1   :  { %609 = vrot.lane.b32.xlu0 %v1723_v47, %s1509_s0 }
 0x1e4   :  { %876 = vrot.lane.b32.xlu1 %v1676_v40, %s1506_s24 }
 0x1e5   :  { %611 = vrot.lane.b32.xlu0 %v1761_v48, %s1509_s0 }
 0x1e8   :  { %884 = vrot.lane.b32.xlu1 %v1680_v41, %s1506_s24 }
 0x1e9   :  { %617 = vrot.lane.b32.xlu0 %v1719_v45, %s1509_s0 }
 0x1ec   :  { %926 = vrot.lane.b32.xlu1 %v1676_v40, %s1507_s27  ;;  %v502_v40 = vpop.permute.xlu1 %501 }
 0x1ed   :  { %619 = vrot.lane.b32.xlu0 %v1772_v50, %s1509_s0 }
 0x1f0   :  { %934 = vrot.lane.b32.xlu1 %v1680_v41, %s1507_s27 }
 0x1f1   :  { %684 = vperm.xlu0 %1408, %v674_v55  }
 0x1f5   :  { %694 = vperm.xlu0 %1408, %v676_v56  }
 0x21e   :  { %v446_v60 = vpop.permute.xlu1 %445 }
 0x21f   :  { %v459_v4 = vsel %vm74_vm1, %v444_v57, %v446_v60  ;;  %v1421_v57 = vld [vmem:[#allocation7 + $0x10] ss:$8 sps:$4 sm:$0xff]  }
 0x222   :  { %v496_v61 = vpop.permute.xlu1 %495 }
 0x223   :  { %v458_v62 = vpop.permute.xlu0 %457  ;;  %v509_v22 = vsel %vm145_vm3, %v494_v59, %v496_v61 }
 0x226   :  { %v454_v63 = vpop.permute.xlu1 %453 }
 0x227   :  { %v508_v1 = vpop.permute.xlu0 %507  ;;  %v462_v18 = vsel %vm74_vm1, %v452_v58, %v454_v63 }
 0x22a   :  { %v558_v41 = vpop.permute.xlu1 %557 }
 0x22b   :  { %v448_v2 = vpop.permute.xlu0 %447 }
 0x22c   :  { %v460_v3 = vsel %vm74_vm1, %v446_v60, %v448_v2 }
 0x22d   :  { %722 = vmatprep.subr.bf16.mxu0 %v460_v3 }
 0x22e   :  { %723 = vmatpush1.bf16.msra.mxu0 %v459_v4  ;;  %v504_v6 = vpop.permute.xlu1 %503 }
 0x22f   :  { %v450_v5 = vpop.permute.xlu0 %449  ;;  %v512_v27 = vsel %vm145_vm3, %v502_v40, %v504_v6 }
 0x230   :  { %v461_v7 = vsel %vm74_vm1, %v448_v2, %v450_v5 }
 0x231   :  { %776 = vmatpush1.bf16.msra.mxu1 %v461_v7 }
 0x232   :  { %777 = vmatprep.subr.bf16.mxu1 %v1505_v0  ;;  %v556_v10 = vpop.permute.xlu1 %555 }
 0x233   :  { %v498_v8 = vpop.permute.xlu0 %497 }
 0x234   :  { %v510_v19 = vsel %vm145_vm3, %v496_v61, %v498_v8 }
 0x236   :  { %v564_v13 = vpop.permute.xlu1 %563 }
 0x237   :  { %v500_v11 = vpop.permute.xlu0 %499 }
 0x238   :  { %v511_v21 = vsel %vm145_vm3, %v498_v8, %v500_v11 }
 0x23a   :  { %v608_v23 = vpop.permute.xlu1 %607 }
 0x23b   :  { %v456_v12 = vpop.permute.xlu0 %455 }
 0x23c   :  { %v464_v16 = vsel %vm74_vm1, %v456_v12, %v458_v62  ;;  %v463_v17 = vsel %vm74_vm1, %v454_v63, %v456_v12 }
 0x23d   :  { %724 = vmatprep.subr.bf16.mxu0 %v463_v17  ;;  %778 = vmatpush1.bf16.msra.mxu1 %v464_v16 }
 0x23e   :  { %725 = vmatpush1.bf16.msra.mxu0 %v462_v18  ;;  %779 = vmatprep.subr.bf16.mxu1 %v1505_v0  ;;  %v566_v29 = vpop.permute.xlu1 %565 }
 0x23f   :  { %v560_v20 = vpop.permute.xlu0 %559  ;;  %726 = vmatprep.subr.bf16.mxu0 %v510_v19  ;;  %v574_v38 = vsel %vm177_vm4, %v564_v13, %v566_v29 }
 0x240   :  { %v572_v32 = vsel %vm177_vm4, %v558_v41, %v560_v20 }
 0x241   :  { %780 = vmatpush1.bf16.msra.mxu1 %v511_v21 }
 0x242   :  { %727 = vmatpush1.bf16.msra.mxu0 %v509_v22  ;;  %781 = vmatprep.subr.bf16.mxu1 %v1505_v0  ;;  %v606_v31 = vpop.permute.xlu1 %605 }
 0x243   :  { %v506_v24 = vpop.permute.xlu0 %505 }
 0x244   :  { %v514_v25 = vsel %vm145_vm3, %v506_v24, %v508_v1  ;;  %v513_v26 = vsel %vm145_vm3, %v504_v6, %v506_v24 }
 0x245   :  { %728 = vmatprep.subr.bf16.mxu0 %v513_v26  ;;  %782 = vmatpush1.bf16.msra.mxu1 %v514_v25 }
 0x246   :  { %729 = vmatpush1.bf16.msra.mxu0 %v512_v27  ;;  %783 = vmatprep.subr.bf16.mxu1 %v1505_v0  ;;  %v616_v36 = vpop.permute.xlu1 %615 }
 0x247   :  { %v562_v28 = vpop.permute.xlu0 %561  ;;  %730 = vmatprep.subr.bf16.mxu0 %v1701_v14 }
 0x248   :  { %v573_v33 = vsel %vm177_vm4, %v560_v20, %v562_v28 }
 0x249   :  { %784 = vmatpush1.bf16.msra.mxu1 %v1723_v47 }
 0x24a   :  { %731 = vmatpush1.bf16.msra.mxu0 %v1699_v9  ;;  %785 = vmatprep.subr.bf16.mxu1 %v1505_v0  ;;  %v571_v9 = vsel %vm177_vm4, %v556_v10, %v558_v41 }
 0x24b   :  { %v568_v30 = vpop.permute.xlu0 %567  ;;  %732 = vmatprep.subr.bf16.mxu0 %v1721_v46 }
 0x24c   :  { %v575_v34 = vsel %vm177_vm4, %v566_v29, %v568_v30 }
 0x24d   :  { %786 = vmatpush1.bf16.msra.mxu1 %v1719_v45  ;;  %v614_v45 = vpop.permute.xlu1 %613 }
 0x24e   :  { %733 = vmatpush1.bf16.msra.mxu0 %v1717_v44  ;;  %787 = vmatprep.subr.bf16.mxu1 %v1505_v0  ;;  %v621_v44 = vsel %vm203_vm5, %v606_v31, %v608_v23  ;;  %v624_v49 = vsel %vm203_vm5, %v614_v45, %v616_v36 }
 0x24f   :  { %v570_v14 = vpop.permute.xlu0 %569  ;;  %734 = vmatprep.subr.bf16.mxu0 %v572_v32 }
 0x250   :  { %v576_v37 = vsel %vm177_vm4, %v568_v30, %v570_v14 }
 0x251   :  { %788 = vmatpush1.bf16.msra.mxu1 %v573_v33 }
 0x252   :  { %735 = vmatpush1.bf16.msra.mxu0 %v571_v9  ;;  %789 = vmatprep.subr.bf16.mxu1 %v1505_v0 }
 0x253   :  { %v610_v35 = vpop.permute.xlu0 %609  ;;  %736 = vmatprep.subr.bf16.mxu0 %v575_v34 }
 0x254   :  { %v622_v39 = vsel %vm203_vm5, %v608_v23, %v610_v35 }
 0x255   :  { %790 = vmatpush1.bf16.msra.mxu1 %v576_v37 }
 0x256   :  { %737 = vmatpush1.bf16.msra.mxu0 %v574_v38  ;;  %791 = vmatprep.subr.bf16.mxu1 %v1505_v0 }
 0x257   :  { %v612_v42 = vpop.permute.xlu0 %611  ;;  %738 = vmatprep.subr.bf16.mxu0 %v622_v39 }
 0x258   :  { %v623_v43 = vsel %vm203_vm5, %v610_v35, %v612_v42 }
 0x259   :  { %792 = vmatpush1.bf16.msra.mxu1 %v623_v43 }
 0x25a   :  { %739 = vmatpush1.bf16.msra.mxu0 %v621_v44  ;;  %793 = vmatprep.subr.bf16.mxu1 %v1505_v0 }
 0x25b   :  { %v618_v46 = vpop.permute.xlu0 %617  ;;  %v680_v58 = vpop.permute.xlu1 %679 }
 0x25c   :  { %v625_v47 = vsel %vm203_vm5, %v616_v36, %v618_v46 }
 0x25d   :  { %740 = vmatprep.subr.bf16.mxu0 %v625_v47 }
 0x25e   :  { %741 = vmatpush1.bf16.msra.mxu0 %v624_v49 }
 0x25f   :  { %v620_v55 = vpop.permute.xlu0 %619  ;;  %v690_v19 = vpop.permute.xlu1 %689 }
 0x260   :  { %v626_v56 = vsel %vm203_vm5, %v618_v46, %v620_v55 }
 0x261   :  { %755 = vmatmul.mubr.bf16.vlgmr.msra.gmra.mrb[8].mxu0 %v1416_v51  ;;  %794 = vmatpush1.bf16.msra.mxu1 %v626_v56 }
 0x262   :  { %1348 = vmatprep.mubr.msk.bf16.mxu0 %vm715_vm6, %v1419_v53  ;;  %1207 = vmatprep.subr.bf16.mxu1 %v1505_v0 }
 0x264   :  { %808 = vmatmul.mubr.bf16.vlgmr.msra.gmra.mrb[4].mxu1 %v1416_v51 }
 0x265   :  { %1350 = vmatprep.mubr.msk.bf16.mxu1 %vm715_vm6, %v1419_v53 }
 0x269   :  { %765 = vmatmul.mubr.bf16.gmra.mrb[12].mxu0 %v1421_v57 }
 0x26c   :  { %816 = vmatmul.mubr.bf16.gmra.mrb[8].mxu1 %v1421_v57 }
 0x270   :  { %v685_v61 = vpop.permute.xlu0 %684 }
 0x274   :  { %v695_v27 = vpop.permute.xlu0 %694 }
 0x334   :  { %v756_v59 = vpop.f32.mrb[8].mxu0 }
 0x335   :  { %v757_v40 = vadd.f32 %v756_v59, %v680_v58  ;;  %v758_v60 = vpop.f32.mrb[9].mxu0 }
 0x336   :  { %v759_v62 = vadd.f32 %v758_v60, %v680_v58  ;;  %v760_v63 = vpop.f32.mrb[10].mxu0 }
 0x337   :  { %v824_v1 = vmax.f32 %v757_v40, 0.0  ;;  %v761_v41 = vadd.f32 %v760_v63, %v685_v61  ;;  %v809_v2 = vpop.f32.mrb[4].mxu1  ;;  %v762_v3 = vpop.f32.mrb[11].mxu0  ;;  %v1108_v63 = vld [vmem:[%s2023_s7 + $0x10] sm:$0xff] }
 0x338   :  { %v825_v4 = vmax.f32 %v759_v62, 0.0  ;;  %v810_v5 = vadd.f32 %v809_v2, %v680_v58  ;;  %v763_v6 = vadd.f32 %v762_v3, %v685_v61  ;;  %v811_v7 = vpop.f32.mrb[5].mxu1  ;;  %v1424_v62 = vld [vmem:[#allocation9 + $0x4] ss:$8 sps:$4 sm:$0xff]   ;;  %v877_v2 = vpop.permute.xlu1 %876 }
 0x339   :  { %v827_v8 = vmax.f32 %v761_v41, 0.0  ;;  %v812_v10 = vpop.f32.mrb[6].mxu1  ;;  %v836_v17 = vmul.f32 %v824_v1, %v1691_v52  ;;  %1355 = vmatprep.mubr.msk.bf16.mxu0 %vm715_vm6, %v1424_v62  ;;  %1357 = vmatprep.mubr.msk.bf16.mxu1 %vm715_vm6, %v1424_v62  ;;  %v1107_v1 = vld [vmem:[%s2023_s7 + $0x8] sm:$0xff]  ;;  %v1109_v41 = vld [vmem:[%s2023_s7 + $0x18] sm:$0xff] }
 0x33a   :  { %v826_v11 = vmax.f32 %v810_v5, 0.0  ;;  %v828_v12 = vmax.f32 %v763_v6, 0.0  ;;  %v813_v13 = vadd.f32 %v812_v10, %v685_v61  ;;  %v814_v16 = vpop.f32.mrb[7].mxu1  ;;  %v837_v20 = vmul.f32 %v825_v4, %v1693_v54  ;;  %v1106_v61 = vld [vmem:[%s2023_s7] sm:$0xff] }
 0x33b   :  { %v839_v18 = vmul.f32 %v827_v8, %v1691_v52 }
 0x33c   :  { %v840_v21 = vmul.f32 %v828_v12, %v1693_v54  ;;  %v829_v22 = vmax.f32 %v813_v13, 0.0  ;;  %v766_v23 = vpop.f32.mrb[12].mxu0  ;;  %v838_v28 = vmul.f32 %v826_v11, %v1703_v15  ;;  %v885_v3 = vpop.permute.xlu1 %884 }
 0x33d   :  { %v1849_v24 = vpack.c.bf16 %v839_v18, %v836_v17  ;;  %v767_v25 = vadd.f32 %v766_v23, %v690_v19  ;;  %v768_v26 = vpop.f32.mrb[13].mxu0 }
 0x33e   :  { %v1852_v29 = vpack.c.bf16 %v840_v21, %v837_v20  ;;  %v841_v30 = vmul.f32 %v829_v22, %v1703_v15  ;;  %v769_v31 = vadd.f32 %v768_v26, %v690_v19  ;;  %v770_v32 = vpop.f32.mrb[14].mxu0 }
 0x33f   :  { %v830_v14 = vmax.f32 %v767_v25, 0.0  ;;  %v771_v33 = vadd.f32 %v770_v32, %v695_v27  ;;  %v817_v9 = vpop.f32.mrb[8].mxu1  ;;  %v772_v34 = vpop.f32.mrb[15].mxu0  ;;  %878 = vrot.lane.b32.xlu1 %v1849_v24, %s1506_s24 }
 0x340   :  { %v1857_v35 = vpack.c.bf16 %v841_v30, %v838_v28  ;;  %v831_v36 = vmax.f32 %v769_v31, 0.0  ;;  %v818_v37 = vadd.f32 %v817_v9, %v690_v19  ;;  %v773_v38 = vadd.f32 %v772_v34, %v695_v27  ;;  %v819_v39 = vpop.f32.mrb[9].mxu1  ;;  %v927_v4 = vpop.permute.xlu1 %926 }
 0x341   :  { %v833_v42 = vmax.f32 %v771_v33, 0.0  ;;  %v820_v43 = vpop.f32.mrb[10].mxu1  ;;  %v842_v49 = vmul.f32 %v830_v14, %v1691_v52 }
 0x342   :  { %v832_v44 = vmax.f32 %v818_v37, 0.0  ;;  %v834_v45 = vmax.f32 %v773_v38, 0.0  ;;  %v821_v46 = vadd.f32 %v820_v43, %v695_v27  ;;  %v822_v47 = vpop.f32.mrb[11].mxu1  ;;  %882 = vrot.lane.b32.xlu0 %v1857_v35, %s1506_s24  ;;  %v843_v53 = vmul.f32 %v831_v36, %v1693_v54 }
 0x343   :  { %v845_v51 = vmul.f32 %v833_v42, %v1691_v52  ;;  %928 = vrot.lane.b32.xlu1 %v1849_v24, %s1507_s27 }
 0x344   :  { %v846_v55 = vmul.f32 %v834_v45, %v1693_v54  ;;  %v835_v56 = vmax.f32 %v821_v46, 0.0  ;;  %v844_v58 = vmul.f32 %v832_v44, %v1703_v15 }
 0x345   :  { %v1867_v57 = vpack.c.bf16 %v845_v51, %v842_v49 }
 0x346   :  { %v1870_v59 = vpack.c.bf16 %v846_v55, %v843_v53  ;;  %v847_v40 = vmul.f32 %v835_v56, %v1703_v15  ;;  %932 = vrot.lane.b32.xlu0 %v1857_v35, %s1507_s27 }
 0x347   :  { %886 = vrot.lane.b32.xlu1 %v1867_v57, %s1506_s24 }
 0x348   :  { %v1877_v60 = vpack.c.bf16 %v847_v40, %v844_v58 }
 0x34a   :  { %880 = vrot.lane.b32.xlu0 %v1852_v29, %s1506_s24 }
 0x34b   :  { %990 = vrot.lane.b32.xlu1 %v1852_v29, %s1508_s29 }
 0x34e   :  { %930 = vrot.lane.b32.xlu0 %v1852_v29, %s1507_s27 }
 0x34f   :  { %936 = vrot.lane.b32.xlu1 %v1867_v57, %s1507_s27 }
 0x352   :  { %890 = vrot.lane.b32.xlu0 %v1877_v60, %s1506_s24 }
 0x353   :  { %988 = vrot.lane.b32.xlu1 %v1849_v24, %s1508_s29 }
 0x356   :  { %940 = vrot.lane.b32.xlu0 %v1877_v60, %s1507_s27 }
 0x357   :  { %996 = vrot.lane.b32.xlu1 %v1867_v57, %s1508_s29 }
 0x35a   :  { %888 = vrot.lane.b32.xlu0 %v1870_v59, %s1506_s24 }
 0x35b   :  { %1040 = vrot.lane.b32.xlu1 %v1852_v29, %s1509_s0 }
 0x35e   :  { %992 = vrot.lane.b32.xlu0 %v1857_v35, %s1508_s29 }
 0x35f   :  { %998 = vrot.lane.b32.xlu1 %v1870_v59, %s1508_s29 }
 0x362   :  { %938 = vrot.lane.b32.xlu0 %v1870_v59, %s1507_s27 }
 0x363   :  { %1038 = vrot.lane.b32.xlu1 %v1849_v24, %s1509_s0 }
 0x366   :  { %994 = vrot.lane.b32.xlu0 %v1761_v48, %s1508_s29 }
 0x367   :  { %1048 = vrot.lane.b32.xlu1 %v1870_v59, %s1509_s0 }
 0x36a   :  { %1000 = vrot.lane.b32.xlu0 %v1877_v60, %s1508_s29 }
 0x36b   :  { %1046 = vrot.lane.b32.xlu1 %v1867_v57, %s1509_s0 }
 0x36e   :  { %1002 = vrot.lane.b32.xlu0 %v1772_v50, %s1508_s29 }
 0x36f   :  { %1112 = vperm.xlu1 %1409, %v1106_v61   ;;  %v1425_v61 = vld [vmem:[#allocation9 + $0x14] ss:$8 sps:$4 sm:$0xff]  }
 0x372   :  { %1042 = vrot.lane.b32.xlu0 %v1857_v35, %s1509_s0 }
 0x373   :  { %1122 = vperm.xlu1 %1409, %v1108_v63  }
 0x376   :  { %1044 = vrot.lane.b32.xlu0 %v1761_v48, %s1509_s0  ;;  %v935_v48 = vpop.permute.xlu1 %934 }
 0x37a   :  { %1050 = vrot.lane.b32.xlu0 %v1877_v60, %s1509_s0 }
 0x37e   :  { %1052 = vrot.lane.b32.xlu0 %v1772_v50, %s1509_s0 }
 0x382   :  { %1117 = vperm.xlu0 %1408, %v1107_v1   ;;  %v1427_v1 = vld [vmem:[#allocation9 + $0x10] ss:$8 sps:$4 sm:$0xff]  }
 0x386   :  { %1127 = vperm.xlu0 %1408, %v1109_v41  }
 0x3b1   :  { %v879_v5 = vpop.permute.xlu1 %878 }
 0x3b2   :  { %v892_v16 = vsel %vm74_vm1, %v877_v2, %v879_v5 }
 0x3b4   :  { %v883_v6 = vpop.permute.xlu0 %882 }
 0x3b5   :  { %v929_v7 = vpop.permute.xlu1 %928 }
 0x3b6   :  { %v942_v32 = vsel %vm145_vm3, %v927_v4, %v929_v7 }
 0x3b8   :  { %v933_v8 = vpop.permute.xlu0 %932 }
 0x3b9   :  { %v887_v10 = vpop.permute.xlu1 %886 }
 0x3ba   :  { %v895_v27 = vsel %vm74_vm1, %v885_v3, %v887_v10 }
 0x3bc   :  { %v881_v50 = vpop.permute.xlu0 %880 }
 0x3bd   :  { %v894_v11 = vsel %vm74_vm1, %v881_v50, %v883_v6  ;;  %v991_v12 = vpop.permute.xlu1 %990  ;;  %v893_v13 = vsel %vm74_vm1, %v879_v5, %v881_v50 }
 0x3be   :  { %1154 = vmatprep.subr.bf16.mxu0 %v893_v13  ;;  %1208 = vmatpush1.bf16.msra.mxu1 %v894_v11 }
 0x3bf   :  { %1155 = vmatpush1.bf16.msra.mxu0 %v892_v16  ;;  %1209 = vmatprep.subr.bf16.mxu1 %v1505_v0 }
 0x3c0   :  { %v931_v17 = vpop.permute.xlu0 %930 }
 0x3c1   :  { %v937_v18 = vpop.permute.xlu1 %936  ;;  %v943_v28 = vsel %vm145_vm3, %v929_v7, %v931_v17  ;;  %v944_v31 = vsel %vm145_vm3, %v931_v17, %v933_v8 }
 0x3c2   :  { %v945_v36 = vsel %vm145_vm3, %v935_v48, %v937_v18 }
 0x3c4   :  { %v891_v19 = vpop.permute.xlu0 %890 }
 0x3c5   :  { %v989_v20 = vpop.permute.xlu1 %988 }
 0x3c8   :  { %v941_v21 = vpop.permute.xlu0 %940 }
 0x3c9   :  { %v997_v23 = vpop.permute.xlu1 %996 }
 0x3cc   :  { %v889_v22 = vpop.permute.xlu0 %888 }
 0x3cd   :  { %v897_v25 = vsel %vm74_vm1, %v889_v22, %v891_v19  ;;  %v896_v26 = vsel %vm74_vm1, %v887_v10, %v889_v22  ;;  %v1041_v14 = vpop.permute.xlu1 %1040 }
 0x3ce   :  { %1156 = vmatprep.subr.bf16.mxu0 %v896_v26  ;;  %1210 = vmatpush1.bf16.msra.mxu1 %v897_v25 }
 0x3cf   :  { %1157 = vmatpush1.bf16.msra.mxu0 %v895_v27  ;;  %1211 = vmatprep.subr.bf16.mxu1 %v1505_v0 }
 0x3d0   :  { %v993_v30 = vpop.permute.xlu0 %992  ;;  %1158 = vmatprep.subr.bf16.mxu0 %v943_v28 }
 0x3d1   :  { %v999_v38 = vpop.permute.xlu1 %998  ;;  %v1005_v43 = vsel %vm177_vm4, %v991_v12, %v993_v30 }
 0x3d2   :  { %1212 = vmatpush1.bf16.msra.mxu1 %v944_v31  ;;  %v1007_v49 = vsel %vm177_vm4, %v997_v23, %v999_v38 }
 0x3d3   :  { %1159 = vmatpush1.bf16.msra.mxu0 %v942_v32  ;;  %1213 = vmatprep.subr.bf16.mxu1 %v1505_v0 }
 0x3d4   :  { %v939_v33 = vpop.permute.xlu0 %938 }
 0x3d5   :  { %v947_v9 = vsel %vm145_vm3, %v939_v33, %v941_v21  ;;  %v946_v34 = vsel %vm145_vm3, %v937_v18, %v939_v33  ;;  %v1039_v42 = vpop.permute.xlu1 %1038 }
 0x3d6   :  { %1160 = vmatprep.subr.bf16.mxu0 %v946_v34  ;;  %1214 = vmatpush1.bf16.msra.mxu1 %v947_v9  ;;  %v1054_v56 = vsel %vm203_vm5, %v1039_v42, %v1041_v14 }
 0x3d7   :  { %1161 = vmatpush1.bf16.msra.mxu0 %v945_v36  ;;  %1215 = vmatprep.subr.bf16.mxu1 %v1505_v0 }
 0x3d8   :  { %v995_v37 = vpop.permute.xlu0 %994  ;;  %1162 = vmatprep.subr.bf16.mxu0 %v1852_v29 }
 0x3d9   :  { %v1049_v46 = vpop.permute.xlu1 %1048 }
 0x3da   :  { %1216 = vmatpush1.bf16.msra.mxu1 %v1857_v35  ;;  %v1006_v35 = vsel %vm177_vm4, %v993_v30, %v995_v37 }
 0x3db   :  { %1163 = vmatpush1.bf16.msra.mxu0 %v1849_v24  ;;  %1217 = vmatprep.subr.bf16.mxu1 %v1505_v0  ;;  %v1004_v24 = vsel %vm177_vm4, %v989_v20, %v991_v12 }
 0x3dc   :  { %v1001_v39 = vpop.permute.xlu0 %1000  ;;  %1164 = vmatprep.subr.bf16.mxu0 %v1870_v59 }
 0x3dd   :  { %v1008_v44 = vsel %vm177_vm4, %v999_v38, %v1001_v39 }
 0x3de   :  { %1218 = vmatpush1.bf16.msra.mxu1 %v1877_v60  ;;  %v1422_v60 = vld [vmem:[#allocation9] ss:$8 sps:$4 sm:$0xff]  }
 0x3df   :  { %1165 = vmatpush1.bf16.msra.mxu0 %v1867_v57  ;;  %1219 = vmatprep.subr.bf16.mxu1 %v1505_v0  ;;  %v1047_v57 = vpop.permute.xlu1 %1046 }
 0x3e0   :  { %v1003_v29 = vpop.permute.xlu0 %1002  ;;  %1166 = vmatprep.subr.bf16.mxu0 %v1005_v43  ;;  %v1057_v40 = vsel %vm203_vm5, %v1047_v57, %v1049_v46 }
 0x3e1   :  { %v1009_v47 = vsel %vm177_vm4, %v1001_v39, %v1003_v29 }
 0x3e2   :  { %1220 = vmatpush1.bf16.msra.mxu1 %v1006_v35 }
 0x3e3   :  { %1167 = vmatpush1.bf16.msra.mxu0 %v1004_v24  ;;  %1221 = vmatprep.subr.bf16.mxu1 %v1505_v0 }
 0x3e4   :  { %v1043_v45 = vpop.permute.xlu0 %1042  ;;  %1168 = vmatprep.subr.bf16.mxu0 %v1008_v44 }
 0x3e5   :  { %v1055_v51 = vsel %vm203_vm5, %v1041_v14, %v1043_v45 }
 0x3e6   :  { %1222 = vmatpush1.bf16.msra.mxu1 %v1009_v47 }
 0x3e7   :  { %1169 = vmatpush1.bf16.msra.mxu0 %v1007_v49  ;;  %1223 = vmatprep.subr.bf16.mxu1 %v1505_v0 }
 0x3e8   :  { %v1045_v53 = vpop.permute.xlu0 %1044  ;;  %1170 = vmatprep.subr.bf16.mxu0 %v1055_v51 }
 0x3e9   :  { %v1056_v55 = vsel %vm203_vm5, %v1043_v45, %v1045_v53 }
 0x3ea   :  { %1224 = vmatpush1.bf16.msra.mxu1 %v1056_v55 }
 0x3eb   :  { %1171 = vmatpush1.bf16.msra.mxu0 %v1054_v56  ;;  %1225 = vmatprep.subr.bf16.mxu1 %v1505_v0 }
 0x3ec   :  { %v1051_v58 = vpop.permute.xlu0 %1050 }
 0x3ed   :  { %v1058_v59 = vsel %vm203_vm5, %v1049_v46, %v1051_v58 }
 0x3ee   :  { %1172 = vmatprep.subr.bf16.mxu0 %v1058_v59  ;;  %v1113_v0 = vpop.permute.xlu1 %1112 }
 0x3ef   :  { %1173 = vmatpush1.bf16.msra.mxu0 %v1057_v40 }
 0x3f0   :  { %v1053_v62 = vpop.permute.xlu0 %1052 }
 0x3f1   :  { %v1059_v63 = vsel %vm203_vm5, %v1051_v58, %v1053_v62 }
 0x3f2   :  { %1187 = vmatmul.mubr.bf16.vlgmr.msra.gmra.mrb[16].mxu0 %v1422_v60  ;;  %1226 = vmatpush1.bf16.msra.mxu1 %v1059_v63  ;;  %v1123_v26 = vpop.permute.xlu1 %1122 }
 0x3f3   :  { %1356 = vmatprep.mubr.msk.bf16.mxu0 %vm715_vm6, %v1425_v61 }
 0x3f5   :  { %1240 = vmatmul.mubr.bf16.vlgmr.msra.gmra.mrb[12].mxu1 %v1422_v60 }
 0x3f6   :  { %1358 = vmatprep.mubr.msk.bf16.mxu1 %vm715_vm6, %v1425_v61 }
 0x3fa   :  { %1197 = vmatmul.mubr.bf16.gmra.mrb[20].mxu0 %v1427_v1 }
 0x3fd   :  { %1248 = vmatmul.mubr.bf16.gmra.mrb[16].mxu1 %v1427_v1 }
 0x401   :  { %v1118_v4 = vpop.permute.xlu0 %1117 }
 0x405   :  { %v1128_v9 = vpop.permute.xlu0 %1127 }
 0x4c5   :  { %v1188_v41 = vpop.f32.mrb[16].mxu0 }
 0x4c6   :  { %v1189_v2 = vadd.f32 %v1188_v41, %v1113_v0  ;;  %v1190_v3 = vpop.f32.mrb[17].mxu0 }
 0x4c7   :  { %v1191_v48 = vadd.f32 %v1190_v3, %v1113_v0  ;;  %v1192_v5 = vpop.f32.mrb[18].mxu0 }
 0x4c8   :  { %v1256_v6 = vmax.f32 %v1189_v2, 0.0  ;;  %v1193_v7 = vadd.f32 %v1192_v5, %v1118_v4  ;;  %v1194_v8 = vpop.f32.mrb[19].mxu0  ;;  %v1241_v10 = vpop.f32.mrb[12].mxu1 }
 0x4c9   :  { %v1257_v50 = vmax.f32 %v1191_v48, 0.0  ;;  %v1195_v11 = vadd.f32 %v1194_v8, %v1118_v4  ;;  %v1242_v12 = vadd.f32 %v1241_v10, %v1113_v0  ;;  %v1243_v13 = vpop.f32.mrb[13].mxu1 }
 0x4ca   :  { %v1268_v16 = vmul.f32 %v1256_v6, %v1691_v52  ;;  %v1259_v17 = vmax.f32 %v1193_v7, 0.0  ;;  %v1244_v18 = vpop.f32.mrb[14].mxu1 }
 0x4cb   :  { %v1269_v19 = vmul.f32 %v1257_v50, %v1693_v54  ;;  %v1260_v20 = vmax.f32 %v1195_v11, 0.0  ;;  %v1258_v21 = vmax.f32 %v1242_v12, 0.0  ;;  %v1245_v22 = vadd.f32 %v1244_v18, %v1118_v4  ;;  %v1246_v23 = vpop.f32.mrb[15].mxu1 }
 0x4cc   :  { %v1271_v25 = vmul.f32 %v1259_v17, %v1691_v52 }
 0x4cd   :  { %v1367_v27 = vpack.c.bf16 %v1269_v19, %v1268_v16  ;;  %v1272_v28 = vmul.f32 %v1260_v20, %v1693_v54  ;;  %v1270_v30 = vmul.f32 %v1258_v21, %v1703_v15  ;;  %v1261_v31 = vmax.f32 %v1245_v22, 0.0  ;;  %v1198_v32 = vpop.f32.mrb[20].mxu0 }
 0x4ce   :  { %v1199_v14 = vadd.f32 %v1198_v32, %v1123_v26  ;;  %v1200_v33 = vpop.f32.mrb[21].mxu0 }
 0x4cf   :  { %1320 = vst [vmem:[%s2024_s8] sm:$0xff] %v1367_v27  ;;  %v1369_v34 = vpack.c.bf16 %v1272_v28, %v1271_v25  ;;  %v1368_v36 = vpack.c.bf16 %v1270_v30, %v1270_v30  ;;  %v1273_v37 = vmul.f32 %v1261_v31, %v1703_v15  ;;  %v1201_v38 = vadd.f32 %v1200_v33, %v1123_v26  ;;  %v1202_v39 = vpop.f32.mrb[22].mxu0 }
 0x4d0   :  { %v1262_v42 = vmax.f32 %v1199_v14, 0.0  ;;  %v1203_v43 = vadd.f32 %v1202_v39, %v1128_v9  ;;  %v1204_v29 = vpop.f32.mrb[23].mxu0  ;;  %v1249_v35 = vpop.f32.mrb[16].mxu1 }
 0x4d1   :  { %1322 = vst [vmem:[%s2024_s8 + $0xc] sm:$0xff] %v1369_v34  ;;  %1321 = vst [vmem:[%s2024_s8 + $0x8] sm:$0xf] %v1368_v36  ;;  %v1370_v24 = vpack.c.bf16 %v1273_v37, %v1273_v37  ;;  %v1263_v44 = vmax.f32 %v1201_v38, 0.0  ;;  %v1205_v45 = vadd.f32 %v1204_v29, %v1128_v9  ;;  %v1250_v46 = vadd.f32 %v1249_v35, %v1123_v26  ;;  %v1251_v47 = vpop.f32.mrb[17].mxu1 }
 0x4d2   :  { %v1274_v49 = vmul.f32 %v1262_v42, %v1691_v52  ;;  %v1265_v51 = vmax.f32 %v1203_v43, 0.0  ;;  %v1252_v53 = vpop.f32.mrb[18].mxu1 }
 0x4d3   :  { %1323 = vst [vmem:[%s2024_s8 + $0x14] sm:$0xf] %v1370_v24  ;;  %v1275_v55 = vmul.f32 %v1263_v44, %v1693_v54  ;;  %v1266_v56 = vmax.f32 %v1205_v45, 0.0  ;;  %v1264_v57 = vmax.f32 %v1250_v46, 0.0  ;;  %v1253_v58 = vadd.f32 %v1252_v53, %v1128_v9  ;;  %v1254_v59 = vpop.f32.mrb[19].mxu1 }
 0x4d4   :  { %v1277_v40 = vmul.f32 %v1265_v51, %v1691_v52 }
 0x4d5   :  { %v1371_v60 = vpack.c.bf16 %v1275_v55, %v1274_v49  ;;  %v1278_v61 = vmul.f32 %v1266_v56, %v1693_v54  ;;  %v1276_v62 = vmul.f32 %v1264_v57, %v1703_v15  ;;  %v1267_v63 = vmax.f32 %v1253_v58, 0.0 }
 0x4d7   :  { %1324 = vst [vmem:[%s2024_s8 + $0x18] sm:$0xff] %v1371_v60  ;;  %v1373_v1 = vpack.c.bf16 %v1278_v61, %v1277_v40  ;;  %v1372_v0 = vpack.c.bf16 %v1276_v62, %v1276_v62  ;;  %v1279_v41 = vmul.f32 %v1267_v63, %v1703_v15 }
 0x4d9   :  { %1326 = vst [vmem:[%s2024_s8 + $0x24] sm:$0xff] %v1373_v1  ;;  %1325 = vst [vmem:[%s2024_s8 + $0x20] sm:$0xf] %v1372_v0  ;;  %v1374_v52 = vpack.c.bf16 %v1279_v41, %v1279_v41 }
 0x4db   :  { %1327 = vst [vmem:[%s2024_s8 + $0x2c] sm:$0xf] %v1374_v52 }
 0x4dc   :  { %1332 = vsyncpa [#allocation6], 1 }
 0x4dd   :  { %1333 = vsyncpa [#allocation8], 1 }

// kernel: mycnn_forward.3
= control target key start
LH: loop header
LB: loop body
LE: loop exit
PB: predicated region body
PF: predicated region fallthrough
CT: control target
= control target key end

     0   :  { %12 = vsyncpa [#allocation3], 0  ;;  %s8485_s0 = inlined_call_operand.vmem [shape: bf16[8,1536], index: 0, kind: input, shape index: {}]   ;;  %s8486_s1 = inlined_call_operand.hbm [shape: bf16[1536,1024], index: 1, kind: input, shape index: {}]   ;;  %s8487_s2 = inlined_call_operand.hbm [shape: f32[1,1024], index: 2, kind: input, shape index: {}]   ;;  %s8488_s3 = inlined_call_operand.hbm [shape: bf16[1024,256], index: 3, kind: input, shape index: {}]   ;;  %s8489_s4 = inlined_call_operand.hbm [shape: f32[1,256], index: 4, kind: input, shape index: {}]   ;;  %s8490_s5 = inlined_call_operand.hbm [shape: f32[1,256], index: 5, kind: input, shape index: {}]   ;;  %s8491_s6 = inlined_call_operand.hbm [shape: f32[1,256], index: 6, kind: input, shape index: {}]   ;;  %s8492_s7 = inlined_call_operand.hbm [shape: f32[8,256], index: 7, kind: output, shape index: {}]  }
   0x1   :  { %13 = vsyncpa [#allocation6], 0 }
   0x2   :  { %14 = vsyncpa [#allocation9], 0 }
   0x3   :  { %15 = vsyncpa [#allocation12], 0 }
   0x4   :  { %16 = vsyncpa [#allocation4], 0  ;;  %s8177_s24 = smov [#allocation5]   ;;  %s8178_s26 = smov [#allocation8]  }
   0x5   :  { %s37_s25 = sshll.u32 %s8177_s24, 4  ;;  %s59_s27 = sshll.u32 %s8178_s26, 4  ;;  %s38_s25 = int_to_ptr.vmem [resolvable:$true] %s37_s25  ;;  %s60_s27 = int_to_ptr.vmem [resolvable:$true] %s59_s27 }
   0x6   :  { %s8013_s30 = scalar_lea.hbm %s8487_s2, 128 }
   0x7   :  { %p8014_p0 = scmp.ne.s32.totalorder %s8487_s2, %s8013_s30  ;;  %p8017_p1 = scmp.lt.u32.totalorder %s8013_s30, %s8487_s2 }
   0x9   :  { %p8019_p2 = pnand %p8017_p1, %p8014_p0 }
   0xb   :  { %8022 = shalt.err (!%p8019_p2)
}
   0xc   :  { %s8023_s12 = scalar_lea.vmem %s38_s25, 128  ;;  %p8028_p4 = scmp.lt.s32.totalorder %s38_s25, %s38_s25 }
   0xd   :  { %p8024_p3 = scmp.ne.s32.totalorder %s38_s25, %s8023_s12  ;;  %p8029_p5 = scmp.lt.s32.totalorder %s8023_s12, %s8023_s12 }
   0xf   :  { %p8030_p6 = por %p8029_p5, %p8028_p4 }
  0x11   :  { %p8031_p7 = pnand %p8030_p6, %p8024_p3 }
  0x13   :  { %8034 = shalt.err (!%p8031_p7)
}
  0x14   :  { %40 = dma.hbm_to_vmem [thread:$0]  %s8487_s2, 128, %s38_s25, [#allocation6]  }
  0x15   :  { %s8035_s17 = scalar_lea.hbm %s8489_s4, 32 }
  0x16   :  { %p8036_p8 = scmp.ne.s32.totalorder %s8489_s4, %s8035_s17  ;;  %p8039_p9 = scmp.lt.u32.totalorder %s8035_s17, %s8489_s4 }
  0x18   :  { %p8041_p10 = pnand %p8039_p9, %p8036_p8 }
  0x1a   :  { %8044 = shalt.err (!%p8041_p10)
}
  0x1b   :  { %s8045_s22 = scalar_lea.vmem %s60_s27, 32  ;;  %p8050_p12 = scmp.lt.s32.totalorder %s60_s27, %s60_s27 }
  0x1c   :  { %p8046_p11 = scmp.ne.s32.totalorder %s60_s27, %s8045_s22  ;;  %p8051_p13 = scmp.lt.s32.totalorder %s8045_s22, %s8045_s22 }
  0x1e   :  { %p8052_p0 = por %p8051_p13, %p8050_p12 }
  0x20   :  { %p8053_p1 = pnand %p8052_p0, %p8046_p11 }
  0x22   :  { %8056 = shalt.err (!%p8053_p1)
}
  0x23   :  { %62 = dma.hbm_to_vmem [thread:$0]  %s8489_s4, 32, %s60_s27, [#allocation9]  }
  0x24   :  { %s8179_s24 = smov [#allocation2]   ;;  %s8057_s29 = scalar_lea.hbm %s8486_s1, 98304 }
  0x25   :  { %s24_s25 = sshll.u32 %s8179_s24, 4  ;;  %p8058_p2 = scmp.ne.s32.totalorder %s8486_s1, %s8057_s29  ;;  %s25_s25 = int_to_ptr.vmem [resolvable:$true] %s24_s25 }
  0x26   :  { %p8061_p3 = scmp.lt.u32.totalorder %s8057_s29, %s8486_s1 }
  0x28   :  { %p8063_p4 = pnand %p8061_p3, %p8058_p2 }
  0x2a   :  { %8066 = shalt.err (!%p8063_p4)
}
  0x2b   :  { %s8067_s11 = scalar_lea.vmem %s25_s25, 98304  ;;  %p8072_p6 = scmp.lt.s32.totalorder %s25_s25, %s25_s25 }
  0x2c   :  { %p8068_p5 = scmp.ne.s32.totalorder %s25_s25, %s8067_s11  ;;  %p8073_p7 = scmp.lt.s32.totalorder %s8067_s11, %s8067_s11 }
  0x2e   :  { %p8074_p8 = por %p8073_p7, %p8072_p6 }
  0x30   :  { %p8075_p9 = pnand %p8074_p8, %p8068_p5 }
  0x32   :  { %8078 = shalt.err (!%p8075_p9)
}
  0x33   :  { %s8180_s4 = smov 512   ;;  %s8181_s27 = smov 32  }
  0x34   :  { %30 = dma.hbm_to_vmem [thread:$0]  %s8486_s1, 98304, %s25_s25, [#allocation3], %s8180_s4, %s8180_s4, %s8181_s27  }
  0x35   :  { %s8182_s14 = smov [#allocation7]   ;;  %s8079_s18 = scalar_lea.hbm %s8488_s3, 16384 }
  0x36   :  { %s46_s15 = sshll.u32 %s8182_s14, 4  ;;  %p8080_p10 = scmp.ne.s32.totalorder %s8488_s3, %s8079_s18  ;;  %s47_s15 = int_to_ptr.vmem [resolvable:$true] %s46_s15 }
  0x37   :  { %p8083_p11 = scmp.lt.u32.totalorder %s8079_s18, %s8488_s3 }
  0x39   :  { %p8085_p12 = pnand %p8083_p11, %p8080_p10 }
  0x3b   :  { %8088 = shalt.err (!%p8085_p12)
}
  0x3c   :  { %s8089_s2 = scalar_lea.vmem %s47_s15, 16384  ;;  %p8094_p0 = scmp.lt.s32.totalorder %s47_s15, %s47_s15 }
  0x3d   :  { %p8090_p13 = scmp.ne.s32.totalorder %s47_s15, %s8089_s2  ;;  %p8095_p1 = scmp.lt.s32.totalorder %s8089_s2, %s8089_s2 }
  0x3f   :  { %p8096_p2 = por %p8095_p1, %p8094_p0 }
  0x41   :  { %p8097_p3 = pnand %p8096_p2, %p8090_p13 }
  0x43   :  { %8100 = shalt.err (!%p8097_p3)
}
  0x44   :  { %s8183_s1 = smov 128   ;;  %s8184_s23 = smov 8  }
  0x45   :  { %52 = dma.hbm_to_vmem [thread:$0]  %s8488_s3, 16384, %s47_s15, [#allocation6], %s8183_s1, %s8183_s1, %s8184_s23  }
  0x46   :  { %s8185_s26 = smov [#allocation10]   ;;  %s8186_s29 = smov [#allocation11]  }
  0x47   :  { %s69_s28 = sshll.u32 %s8185_s26, 4  ;;  %s79_s30 = sshll.u32 %s8186_s29, 4  ;;  %s70_s28 = int_to_ptr.vmem [resolvable:$true] %s69_s28  ;;  %s80_s30 = int_to_ptr.vmem [resolvable:$true] %s79_s30 }
  0x48   :  { %s8101_s10 = scalar_lea.hbm %s8490_s5, 32 }
  0x49   :  { %p8102_p4 = scmp.ne.s32.totalorder %s8490_s5, %s8101_s10  ;;  %p8105_p5 = scmp.lt.u32.totalorder %s8101_s10, %s8490_s5 }
  0x4b   :  { %p8107_p6 = pnand %p8105_p5, %p8102_p4 }
  0x4d   :  { %8110 = shalt.err (!%p8107_p6)
}
  0x4e   :  { %s8111_s3 = scalar_lea.vmem %s70_s28, 32  ;;  %p8116_p8 = scmp.lt.s32.totalorder %s70_s28, %s70_s28 }
  0x4f   :  { %p8112_p7 = scmp.ne.s32.totalorder %s70_s28, %s8111_s3  ;;  %p8117_p9 = scmp.lt.s32.totalorder %s8111_s3, %s8111_s3 }
  0x51   :  { %p8118_p10 = por %p8117_p9, %p8116_p8 }
  0x53   :  { %p8119_p11 = pnand %p8118_p10, %p8112_p7 }
  0x55   :  { %8122 = shalt.err (!%p8119_p11)
}
  0x56   :  { %72 = dma.hbm_to_vmem [thread:$0]  %s8490_s5, 32, %s70_s28, [#allocation9]  }
  0x57   :  { %s8123_s17 = scalar_lea.hbm %s8491_s6, 32 }
  0x58   :  { %p8124_p12 = scmp.ne.s32.totalorder %s8491_s6, %s8123_s17  ;;  %p8127_p13 = scmp.lt.u32.totalorder %s8123_s17, %s8491_s6 }
  0x5a   :  { %p8129_p0 = pnand %p8127_p13, %p8124_p12 }
  0x5c   :  { %8132 = shalt.err (!%p8129_p0)
}
  0x5d   :  { %s8133_s22 = scalar_lea.vmem %s80_s30, 32  ;;  %p8138_p2 = scmp.lt.s32.totalorder %s80_s30, %s80_s30 }
  0x5e   :  { %p8134_p1 = scmp.ne.s32.totalorder %s80_s30, %s8133_s22  ;;  %p8139_p3 = scmp.lt.s32.totalorder %s8133_s22, %s8133_s22 }
  0x60   :  { %p8140_p4 = por %p8139_p3, %p8138_p2 }
  0x62   :  { %p8141_p5 = pnand %p8140_p4, %p8134_p1 }
  0x64   :  { %8144 = shalt.err (!%p8141_p5)
}
  0x65   :  { %82 = dma.hbm_to_vmem [thread:$0]  %s8491_s6, 32, %s80_s30, [#allocation12]  }
  0x66   :  { %8167 = dma.done.wait [#allocation3], 98304  }
  0x67   :  { %8168 = vsyncadd [#allocation3], 4294868992 }
  0x68   :  { %8169 = dma.done.wait [#allocation6], 16512  }
  0x69   :  { %8170 = vsyncadd [#allocation6], 4294950784 }
  0x6a   :  { %8171 = dma.done.wait [#allocation9], 64  }
  0x6b   :  { %8172 = vsyncadd [#allocation9], 4294967232 }
  0x6c   :  { %8173 = dma.done.wait [#allocation12], 32  }
  0x6d   :  { %8174 = vsyncadd [#allocation12], 4294967264  ;;  %v107_v0 = vld [vmem:[#allocation2] sm:$0xff]  ;;  %v8312_v58 = vld [vmem:[%s8485_s0 + $0x10] sm:$0xff] }
  0x6e   :  { %v111_v1 = vld [vmem:[#allocation2 + $0x20] sm:$0xff]  ;;  %v8316_v61 = vcombine.high %v8312_v58, %v8312_v58 }
  0x6f   :  { %v363_v2 = vld [vmem:[#allocation2 + $0x800] sm:$0xff]  ;;  %v6802_v3 = vcombine.high %v107_v0, %v111_v1  ;;  %v6801_v5 = vcombine.low %v107_v0, %v111_v1 }
  0x70   :  { %v367_v4 = vld [vmem:[#allocation2 + $0x820] sm:$0xff]  ;;  %4913 = vmatprep.mubr.bf16.mxu0 %v8316_v61 }
  0x71   :  { %v115_v6 = vld [vmem:[#allocation2 + $0x40] sm:$0xff]  ;;  %v7058_v8 = vcombine.high %v363_v2, %v367_v4  ;;  %v7057_v9 = vcombine.low %v363_v2, %v367_v4  ;;  %4799 = vmatprep.subr.bf16.mxu1 %v6802_v3 }
  0x72   :  { %v119_v7 = vld [vmem:[#allocation2 + $0x60] sm:$0xff]  ;;  %4800 = vmatpush1.bf16.msra.mxu1 %v6801_v5 }
  0x73   :  { %v6810_v10 = vcombine.high %v115_v6, %v119_v7  ;;  %v371_v11 = vld [vmem:[#allocation2 + $0x840] sm:$0xff]  ;;  %4881 = vmatprep.subr.bf16.mxu0 %v7058_v8  ;;  %v6809_v18 = vcombine.low %v115_v6, %v119_v7 }
  0x74   :  { %v375_v12 = vld [vmem:[#allocation2 + $0x860] sm:$0xff]  ;;  %4882 = vmatpush1.bf16.msra.mxu0 %v7057_v9 }
  0x75   :  { %v123_v13 = vld [vmem:[#allocation2 + $0x80] sm:$0xff]  ;;  %v7066_v14 = vcombine.high %v371_v11, %v375_v12  ;;  %4801 = vmatprep.subr.bf16.mxu1 %v6810_v10  ;;  %v7065_v19 = vcombine.low %v371_v11, %v375_v12 }
  0x76   :  { %v127_v15 = vld [vmem:[#allocation2 + $0xa0] sm:$0xff]  ;;  %4802 = vmatpush1.bf16.msra.mxu1 %v6809_v18 }
  0x77   :  { %v379_v16 = vld [vmem:[#allocation2 + $0x880] sm:$0xff]  ;;  %v6818_v20 = vcombine.high %v123_v13, %v127_v15  ;;  %4883 = vmatprep.subr.bf16.mxu0 %v7066_v14  ;;  %v6817_v26 = vcombine.low %v123_v13, %v127_v15 }
  0x78   :  { %v383_v17 = vld [vmem:[#allocation2 + $0x8a0] sm:$0xff]  ;;  %4884 = vmatpush1.bf16.msra.mxu0 %v7065_v19 }
  0x79   :  { %v7074_v21 = vcombine.high %v379_v16, %v383_v17  ;;  %v131_v22 = vld [vmem:[#allocation2 + $0xc0] sm:$0xff]  ;;  %4803 = vmatprep.subr.bf16.mxu1 %v6818_v20  ;;  %v7073_v27 = vcombine.low %v379_v16, %v383_v17 }
  0x7a   :  { %v135_v23 = vld [vmem:[#allocation2 + $0xe0] sm:$0xff]  ;;  %4804 = vmatpush1.bf16.msra.mxu1 %v6817_v26 }
  0x7b   :  { %v387_v24 = vld [vmem:[#allocation2 + $0x8c0] sm:$0xff]  ;;  %v6826_v28 = vcombine.high %v131_v22, %v135_v23  ;;  %4885 = vmatprep.subr.bf16.mxu0 %v7074_v21  ;;  %v6825_v34 = vcombine.low %v131_v22, %v135_v23 }
  0x7c   :  { %v391_v25 = vld [vmem:[#allocation2 + $0x8e0] sm:$0xff]  ;;  %4886 = vmatpush1.bf16.msra.mxu0 %v7073_v27 }
  0x7d   :  { %v7082_v29 = vcombine.high %v387_v24, %v391_v25  ;;  %v139_v30 = vld [vmem:[#allocation2 + $0x100] sm:$0xff]  ;;  %4805 = vmatprep.subr.bf16.mxu1 %v6826_v28  ;;  %v7081_v35 = vcombine.low %v387_v24, %v391_v25 }
  0x7e   :  { %v143_v31 = vld [vmem:[#allocation2 + $0x120] sm:$0xff]  ;;  %4806 = vmatpush1.bf16.msra.mxu1 %v6825_v34 }
  0x7f   :  { %v395_v32 = vld [vmem:[#allocation2 + $0x900] sm:$0xff]  ;;  %v6834_v36 = vcombine.high %v139_v30, %v143_v31  ;;  %4887 = vmatprep.subr.bf16.mxu0 %v7082_v29  ;;  %v6833_v42 = vcombine.low %v139_v30, %v143_v31 }
  0x80   :  { %v399_v33 = vld [vmem:[#allocation2 + $0x920] sm:$0xff]  ;;  %4888 = vmatpush1.bf16.msra.mxu0 %v7081_v35 }
  0x81   :  { %v7090_v37 = vcombine.high %v395_v32, %v399_v33  ;;  %v147_v38 = vld [vmem:[#allocation2 + $0x140] sm:$0xff]  ;;  %4807 = vmatprep.subr.bf16.mxu1 %v6834_v36  ;;  %v7089_v43 = vcombine.low %v395_v32, %v399_v33 }
  0x82   :  { %v151_v39 = vld [vmem:[#allocation2 + $0x160] sm:$0xff]  ;;  %4808 = vmatpush1.bf16.msra.mxu1 %v6833_v42 }
  0x83   :  { %v403_v40 = vld [vmem:[#allocation2 + $0x940] sm:$0xff]  ;;  %v6842_v44 = vcombine.high %v147_v38, %v151_v39  ;;  %4889 = vmatprep.subr.bf16.mxu0 %v7090_v37  ;;  %v6841_v50 = vcombine.low %v147_v38, %v151_v39 }
  0x84   :  { %v407_v41 = vld [vmem:[#allocation2 + $0x960] sm:$0xff]  ;;  %4890 = vmatpush1.bf16.msra.mxu0 %v7089_v43 }
  0x85   :  { %v7098_v45 = vcombine.high %v403_v40, %v407_v41  ;;  %v155_v46 = vld [vmem:[#allocation2 + $0x180] sm:$0xff]  ;;  %4809 = vmatprep.subr.bf16.mxu1 %v6842_v44  ;;  %v7097_v51 = vcombine.low %v403_v40, %v407_v41 }
  0x86   :  { %v159_v47 = vld [vmem:[#allocation2 + $0x1a0] sm:$0xff]  ;;  %4810 = vmatpush1.bf16.msra.mxu1 %v6841_v50 }
  0x87   :  { %v411_v48 = vld [vmem:[#allocation2 + $0x980] sm:$0xff]  ;;  %v6850_v52 = vcombine.high %v155_v46, %v159_v47  ;;  %4891 = vmatprep.subr.bf16.mxu0 %v7098_v45  ;;  %v6849_v62 = vcombine.low %v155_v46, %v159_v47 }
  0x88   :  { %v415_v49 = vld [vmem:[#allocation2 + $0x9a0] sm:$0xff]  ;;  %4892 = vmatpush1.bf16.msra.mxu0 %v7097_v51 }
  0x89   :  { %v8303_v53 = vld [vmem:[%s8485_s0] sm:$0xff]  ;;  %v7106_v54 = vcombine.high %v411_v48, %v415_v49  ;;  %4811 = vmatprep.subr.bf16.mxu1 %v6850_v52  ;;  %v7105_v63 = vcombine.low %v411_v48, %v415_v49 }
  0x8a   :  { %v163_v55 = vld [vmem:[#allocation2 + $0x1c0] sm:$0xff]  ;;  %v8307_v57 = vcombine.high %v8303_v53, %v8303_v53  ;;  %4812 = vmatpush1.bf16.msra.mxu1 %v6849_v62 }
  0x8b   :  { %v167_v56 = vld [vmem:[#allocation2 + $0x1e0] sm:$0xff]  ;;  %4893 = vmatprep.subr.bf16.mxu0 %v7106_v54 }
  0x8c   :  { %v419_v59 = vld [vmem:[#allocation2 + $0x9c0] sm:$0xff]  ;;  %4831 = vmatprep.mubr.bf16.mxu1 %v8307_v57  ;;  %v6858_v0 = vcombine.high %v163_v55, %v167_v56  ;;  %v6857_v6 = vcombine.low %v163_v55, %v167_v56  ;;  %4894 = vmatpush1.bf16.msra.mxu0 %v7105_v63 }
  0x8d   :  { %v423_v60 = vld [vmem:[#allocation2 + $0x9e0] sm:$0xff] }
  0x8e   :  { %v7114_v1 = vcombine.high %v419_v59, %v423_v60  ;;  %v171_v2 = vld [vmem:[#allocation2 + $0x200] sm:$0xff]  ;;  %4813 = vmatprep.subr.bf16.mxu1 %v6858_v0  ;;  %v7113_v7 = vcombine.low %v419_v59, %v423_v60 }
  0x8f   :  { %v175_v3 = vld [vmem:[#allocation2 + $0x220] sm:$0xff]  ;;  %4814 = vmatpush1.bf16.msra.mxu1 %v6857_v6 }
  0x90   :  { %v427_v4 = vld [vmem:[#allocation2 + $0xa00] sm:$0xff]  ;;  %v6866_v8 = vcombine.high %v171_v2, %v175_v3  ;;  %4895 = vmatprep.subr.bf16.mxu0 %v7114_v1  ;;  %v6865_v14 = vcombine.low %v171_v2, %v175_v3 }
  0x91   :  { %v431_v5 = vld [vmem:[#allocation2 + $0xa20] sm:$0xff]  ;;  %4896 = vmatpush1.bf16.msra.mxu0 %v7113_v7 }
  0x92   :  { %v7122_v9 = vcombine.high %v427_v4, %v431_v5  ;;  %v179_v10 = vld [vmem:[#allocation2 + $0x240] sm:$0xff]  ;;  %4815 = vmatprep.subr.bf16.mxu1 %v6866_v8  ;;  %v7121_v15 = vcombine.low %v427_v4, %v431_v5 }
  0x93   :  { %v183_v11 = vld [vmem:[#allocation2 + $0x260] sm:$0xff]  ;;  %4816 = vmatpush1.bf16.msra.mxu1 %v6865_v14 }
  0x94   :  { %v435_v12 = vld [vmem:[#allocation2 + $0xa40] sm:$0xff]  ;;  %v6874_v16 = vcombine.high %v179_v10, %v183_v11  ;;  %4897 = vmatprep.subr.bf16.mxu0 %v7122_v9  ;;  %v6873_v22 = vcombine.low %v179_v10, %v183_v11 }
  0x95   :  { %v439_v13 = vld [vmem:[#allocation2 + $0xa60] sm:$0xff]  ;;  %4898 = vmatpush1.bf16.msra.mxu0 %v7121_v15 }
  0x96   :  { %v7130_v17 = vcombine.high %v435_v12, %v439_v13  ;;  %v187_v18 = vld [vmem:[#allocation2 + $0x280] sm:$0xff]  ;;  %4817 = vmatprep.subr.bf16.mxu1 %v6874_v16  ;;  %v7129_v23 = vcombine.low %v435_v12, %v439_v13  ;;  %v8322_v16 = vcombine.low %v8303_v53, %v8303_v53 }
  0x97   :  { %v191_v19 = vld [vmem:[#allocation2 + $0x2a0] sm:$0xff]  ;;  %4818 = vmatpush1.bf16.msra.mxu1 %v6873_v22  ;;  %v8336_v22 = vld [vmem:[%s8485_s0 + $0x18] sm:$0xff] }
  0x98   :  { %v443_v20 = vld [vmem:[#allocation2 + $0xa80] sm:$0xff]  ;;  %v6882_v24 = vcombine.high %v187_v18, %v191_v19  ;;  %4899 = vmatprep.subr.bf16.mxu0 %v7130_v17  ;;  %v6881_v30 = vcombine.low %v187_v18, %v191_v19  ;;  %v8327_v19 = vld [vmem:[%s8485_s0 + $0x8] sm:$0xff] }
  0x99   :  { %v447_v21 = vld [vmem:[#allocation2 + $0xaa0] sm:$0xff]  ;;  %4900 = vmatpush1.bf16.msra.mxu0 %v7129_v23 }
  0x9a   :  { %v7138_v25 = vcombine.high %v443_v20, %v447_v21  ;;  %v195_v26 = vld [vmem:[#allocation2 + $0x2c0] sm:$0xff]  ;;  %4819 = vmatprep.subr.bf16.mxu1 %v6882_v24  ;;  %v7137_v31 = vcombine.low %v443_v20, %v447_v21  ;;  %v8331_v21 = vcombine.low %v8312_v58, %v8312_v58  ;;  %v8345_v58 = vcombine.high %v8336_v22, %v8336_v22 }
  0x9b   :  { %v199_v27 = vld [vmem:[#allocation2 + $0x2e0] sm:$0xff]  ;;  %4820 = vmatpush1.bf16.msra.mxu1 %v6881_v30 }
  0x9c   :  { %v451_v28 = vld [vmem:[#allocation2 + $0xac0] sm:$0xff]  ;;  %v6890_v32 = vcombine.high %v195_v26, %v199_v27  ;;  %4901 = vmatprep.subr.bf16.mxu0 %v7138_v25  ;;  %v6889_v38 = vcombine.low %v195_v26, %v199_v27 }
  0x9d   :  { %v455_v29 = vld [vmem:[#allocation2 + $0xae0] sm:$0xff]  ;;  %4902 = vmatpush1.bf16.msra.mxu0 %v7137_v31 }
  0x9e   :  { %v7146_v33 = vcombine.high %v451_v28, %v455_v29  ;;  %v203_v34 = vld [vmem:[#allocation2 + $0x300] sm:$0xff]  ;;  %4821 = vmatprep.subr.bf16.mxu1 %v6890_v32  ;;  %v7145_v39 = vcombine.low %v451_v28, %v455_v29  ;;  %v8340_v29 = vcombine.high %v8327_v19, %v8327_v19 }
  0x9f   :  { %v207_v35 = vld [vmem:[#allocation2 + $0x320] sm:$0xff]  ;;  %4822 = vmatpush1.bf16.msra.mxu1 %v6889_v38 }
  0xa0   :  { %v459_v36 = vld [vmem:[#allocation2 + $0xb00] sm:$0xff]  ;;  %v6898_v40 = vcombine.high %v203_v34, %v207_v35  ;;  %4903 = vmatprep.subr.bf16.mxu0 %v7146_v33  ;;  %v6897_v46 = vcombine.low %v203_v34, %v207_v35 }
  0xa1   :  { %v463_v37 = vld [vmem:[#allocation2 + $0xb20] sm:$0xff]  ;;  %4904 = vmatpush1.bf16.msra.mxu0 %v7145_v39 }
  0xa2   :  { %v7154_v41 = vcombine.high %v459_v36, %v463_v37  ;;  %v211_v42 = vld [vmem:[#allocation2 + $0x340] sm:$0xff]  ;;  %4823 = vmatprep.subr.bf16.mxu1 %v6898_v40  ;;  %v7153_v47 = vcombine.low %v459_v36, %v463_v37 }
  0xa3   :  { %v215_v43 = vld [vmem:[#allocation2 + $0x360] sm:$0xff]  ;;  %4824 = vmatpush1.bf16.msra.mxu1 %v6897_v46 }
  0xa4   :  { %v467_v44 = vld [vmem:[#allocation2 + $0xb40] sm:$0xff]  ;;  %v6906_v48 = vcombine.high %v211_v42, %v215_v43  ;;  %4905 = vmatprep.subr.bf16.mxu0 %v7154_v41  ;;  %v6905_v55 = vcombine.low %v211_v42, %v215_v43 }
  0xa5   :  { %v471_v45 = vld [vmem:[#allocation2 + $0xb60] sm:$0xff]  ;;  %4906 = vmatpush1.bf16.msra.mxu0 %v7153_v47 }
  0xa6   :  { %v7162_v49 = vcombine.high %v467_v44, %v471_v45  ;;  %v219_v50 = vld [vmem:[#allocation2 + $0x380] sm:$0xff]  ;;  %4825 = vmatprep.subr.bf16.mxu1 %v6906_v48  ;;  %v7161_v56 = vcombine.low %v467_v44, %v471_v45 }
  0xa7   :  { %v223_v51 = vld [vmem:[#allocation2 + $0x3a0] sm:$0xff]  ;;  %4826 = vmatpush1.bf16.msra.mxu1 %v6905_v55 }
  0xa8   :  { %v475_v52 = vld [vmem:[#allocation2 + $0xb80] sm:$0xff]  ;;  %v6914_v59 = vcombine.high %v219_v50, %v223_v51  ;;  %4907 = vmatprep.subr.bf16.mxu0 %v7162_v49  ;;  %v6913_v2 = vcombine.low %v219_v50, %v223_v51 }
  0xa9   :  { %v479_v54 = vld [vmem:[#allocation2 + $0xba0] sm:$0xff]  ;;  %4908 = vmatpush1.bf16.msra.mxu0 %v7161_v56 }
  0xaa   :  { %v7170_v60 = vcombine.high %v475_v52, %v479_v54  ;;  %v227_v62 = vld [vmem:[#allocation2 + $0x3c0] sm:$0xff]  ;;  %4827 = vmatprep.subr.bf16.mxu1 %v6914_v59  ;;  %v7169_v3 = vcombine.low %v475_v52, %v479_v54 }
  0xab   :  { %v231_v63 = vld [vmem:[#allocation2 + $0x3e0] sm:$0xff]  ;;  %4828 = vmatpush1.bf16.msra.mxu1 %v6913_v2 }
  0xac   :  { %v483_v0 = vld [vmem:[#allocation2 + $0xbc0] sm:$0xff]  ;;  %v6922_v4 = vcombine.high %v227_v62, %v231_v63  ;;  %4909 = vmatprep.subr.bf16.mxu0 %v7170_v60  ;;  %v6921_v10 = vcombine.low %v227_v62, %v231_v63 }
  0xad   :  { %v487_v1 = vld [vmem:[#allocation2 + $0xbe0] sm:$0xff]  ;;  %4910 = vmatpush1.bf16.msra.mxu0 %v7169_v3 }
  0xae   :  { %v7178_v5 = vcombine.high %v483_v0, %v487_v1  ;;  %v235_v6 = vld [vmem:[#allocation2 + $0x400] sm:$0xff]  ;;  %4829 = vmatprep.subr.bf16.mxu1 %v6922_v4  ;;  %v7177_v11 = vcombine.low %v483_v0, %v487_v1 }
  0xaf   :  { %v239_v7 = vld [vmem:[#allocation2 + $0x420] sm:$0xff]  ;;  %4830 = vmatpush1.bf16.msra.mxu1 %v6921_v10 }
  0xb0   :  { %v491_v8 = vld [vmem:[#allocation2 + $0xc00] sm:$0xff]  ;;  %v6930_v12 = vcombine.high %v235_v6, %v239_v7  ;;  %4911 = vmatprep.subr.bf16.mxu0 %v7178_v5  ;;  %v6929_v20 = vcombine.low %v235_v6, %v239_v7 }
  0xb1   :  { %v495_v9 = vld [vmem:[#allocation2 + $0xc20] sm:$0xff]  ;;  %4912 = vmatpush1.bf16.msra.mxu0 %v7177_v11 }
  0xb2   :  { %v7186_v13 = vcombine.high %v491_v8, %v495_v9  ;;  %v243_v14 = vld [vmem:[#allocation2 + $0x440] sm:$0xff]  ;;  %4840 = vmatprep.subr.bf16.mxu1 %v6930_v12  ;;  %v7185_v53 = vcombine.low %v491_v8, %v495_v9  ;;  %4832 = vmatmul.mubr.bf16.vlgmr.msra.gmra.mrb[0].mxu1 %v8322_v16 }
  0xb3   :  { %v247_v15 = vld [vmem:[#allocation2 + $0x460] sm:$0xff]  ;;  %4841 = vmatpush1.bf16.msra.mxu1 %v6929_v20  ;;  %4872 = vmatprep.mubr.bf16.mxu1 %v8340_v29 }
  0xb4   :  { %v499_v17 = vld [vmem:[#allocation2 + $0xc40] sm:$0xff]  ;;  %v6938_v23 = vcombine.high %v243_v14, %v247_v15  ;;  %4922 = vmatprep.subr.bf16.mxu0 %v7186_v13  ;;  %4914 = vmatmul.mubr.bf16.vlgmr.msra.gmra.mrb[0].mxu0 %v8331_v21  ;;  %v6937_v30 = vcombine.low %v243_v14, %v247_v15 }
  0xb5   :  { %v503_v18 = vld [vmem:[#allocation2 + $0xc60] sm:$0xff]  ;;  %4923 = vmatpush1.bf16.msra.mxu0 %v7185_v53  ;;  %4954 = vmatprep.mubr.bf16.mxu0 %v8345_v58 }
  0xb6   :  { %v251_v24 = vld [vmem:[#allocation2 + $0x480] sm:$0xff]  ;;  %v7194_v25 = vcombine.high %v499_v17, %v503_v18  ;;  %4842 = vmatprep.subr.bf16.mxu1 %v6938_v23  ;;  %v7193_v31 = vcombine.low %v499_v17, %v503_v18 }
  0xb7   :  { %v255_v26 = vld [vmem:[#allocation2 + $0x4a0] sm:$0xff]  ;;  %4843 = vmatpush1.bf16.msra.mxu1 %v6937_v30 }
  0xb8   :  { %v507_v27 = vld [vmem:[#allocation2 + $0xc80] sm:$0xff]  ;;  %v6946_v32 = vcombine.high %v251_v24, %v255_v26  ;;  %4924 = vmatprep.subr.bf16.mxu0 %v7194_v25  ;;  %v6945_v38 = vcombine.low %v251_v24, %v255_v26 }
  0xb9   :  { %v511_v28 = vld [vmem:[#allocation2 + $0xca0] sm:$0xff]  ;;  %4925 = vmatpush1.bf16.msra.mxu0 %v7193_v31 }
  0xba   :  { %v259_v33 = vld [vmem:[#allocation2 + $0x4c0] sm:$0xff]  ;;  %v7202_v36 = vcombine.high %v507_v27, %v511_v28  ;;  %4844 = vmatprep.subr.bf16.mxu1 %v6946_v32  ;;  %v7201_v39 = vcombine.low %v507_v27, %v511_v28 }
  0xbb   :  { %v263_v34 = vld [vmem:[#allocation2 + $0x4e0] sm:$0xff]  ;;  %4845 = vmatpush1.bf16.msra.mxu1 %v6945_v38 }
  0xbc   :  { %v515_v35 = vld [vmem:[#allocation2 + $0xcc0] sm:$0xff]  ;;  %v6954_v40 = vcombine.high %v259_v33, %v263_v34  ;;  %4926 = vmatprep.subr.bf16.mxu0 %v7202_v36  ;;  %v6953_v46 = vcombine.low %v259_v33, %v263_v34 }
  0xbd   :  { %v519_v37 = vld [vmem:[#allocation2 + $0xce0] sm:$0xff]  ;;  %4927 = vmatpush1.bf16.msra.mxu0 %v7201_v39 }
  0xbe   :  { %v267_v41 = vld [vmem:[#allocation2 + $0x500] sm:$0xff]  ;;  %v7210_v44 = vcombine.high %v515_v35, %v519_v37  ;;  %4846 = vmatprep.subr.bf16.mxu1 %v6954_v40  ;;  %v7209_v47 = vcombine.low %v515_v35, %v519_v37 }
  0xbf   :  { %v271_v42 = vld [vmem:[#allocation2 + $0x520] sm:$0xff]  ;;  %4847 = vmatpush1.bf16.msra.mxu1 %v6953_v46 }
  0xc0   :  { %v523_v43 = vld [vmem:[#allocation2 + $0xd00] sm:$0xff]  ;;  %v6962_v48 = vcombine.high %v267_v41, %v271_v42  ;;  %4928 = vmatprep.subr.bf16.mxu0 %v7210_v44  ;;  %v6961_v55 = vcombine.low %v267_v41, %v271_v42 }
  0xc1   :  { %v527_v45 = vld [vmem:[#allocation2 + $0xd20] sm:$0xff]  ;;  %4929 = vmatpush1.bf16.msra.mxu0 %v7209_v47 }
  0xc2   :  { %v275_v49 = vld [vmem:[#allocation2 + $0x540] sm:$0xff]  ;;  %v7218_v52 = vcombine.high %v523_v43, %v527_v45  ;;  %4848 = vmatprep.subr.bf16.mxu1 %v6962_v48  ;;  %v7217_v56 = vcombine.low %v523_v43, %v527_v45 }
  0xc3   :  { %v279_v50 = vld [vmem:[#allocation2 + $0x560] sm:$0xff]  ;;  %4849 = vmatpush1.bf16.msra.mxu1 %v6961_v55 }
  0xc4   :  { %v531_v51 = vld [vmem:[#allocation2 + $0xd40] sm:$0xff]  ;;  %v6970_v59 = vcombine.high %v275_v49, %v279_v50  ;;  %4930 = vmatprep.subr.bf16.mxu0 %v7218_v52  ;;  %v6969_v2 = vcombine.low %v275_v49, %v279_v50 }
  0xc5   :  { %v535_v54 = vld [vmem:[#allocation2 + $0xd60] sm:$0xff]  ;;  %4931 = vmatpush1.bf16.msra.mxu0 %v7217_v56 }
  0xc6   :  { %v283_v60 = vld [vmem:[#allocation2 + $0x580] sm:$0xff]  ;;  %v7226_v0 = vcombine.high %v531_v51, %v535_v54  ;;  %4850 = vmatprep.subr.bf16.mxu1 %v6970_v59  ;;  %v7225_v3 = vcombine.low %v531_v51, %v535_v54 }
  0xc7   :  { %v287_v62 = vld [vmem:[#allocation2 + $0x5a0] sm:$0xff]  ;;  %4851 = vmatpush1.bf16.msra.mxu1 %v6969_v2 }
  0xc8   :  { %v539_v63 = vld [vmem:[#allocation2 + $0xd80] sm:$0xff]  ;;  %v6978_v4 = vcombine.high %v283_v60, %v287_v62  ;;  %4932 = vmatprep.subr.bf16.mxu0 %v7226_v0  ;;  %v6977_v10 = vcombine.low %v283_v60, %v287_v62 }
  0xc9   :  { %v543_v1 = vld [vmem:[#allocation2 + $0xda0] sm:$0xff]  ;;  %4933 = vmatpush1.bf16.msra.mxu0 %v7225_v3 }
  0xca   :  { %v291_v5 = vld [vmem:[#allocation2 + $0x5c0] sm:$0xff]  ;;  %v7234_v8 = vcombine.high %v539_v63, %v543_v1  ;;  %4852 = vmatprep.subr.bf16.mxu1 %v6978_v4  ;;  %v7233_v11 = vcombine.low %v539_v63, %v543_v1 }
  0xcb   :  { %v295_v6 = vld [vmem:[#allocation2 + $0x5e0] sm:$0xff]  ;;  %4853 = vmatpush1.bf16.msra.mxu1 %v6977_v10 }
  0xcc   :  { %v547_v7 = vld [vmem:[#allocation2 + $0xdc0] sm:$0xff]  ;;  %v6986_v12 = vcombine.high %v291_v5, %v295_v6  ;;  %4934 = vmatprep.subr.bf16.mxu0 %v7234_v8  ;;  %v6985_v20 = vcombine.low %v291_v5, %v295_v6 }
  0xcd   :  { %v551_v9 = vld [vmem:[#allocation2 + $0xde0] sm:$0xff]  ;;  %4935 = vmatpush1.bf16.msra.mxu0 %v7233_v11 }
  0xce   :  { %v299_v13 = vld [vmem:[#allocation2 + $0x600] sm:$0xff]  ;;  %v7242_v17 = vcombine.high %v547_v7, %v551_v9  ;;  %4854 = vmatprep.subr.bf16.mxu1 %v6986_v12  ;;  %v7241_v53 = vcombine.low %v547_v7, %v551_v9 }
  0xcf   :  { %v303_v14 = vld [vmem:[#allocation2 + $0x620] sm:$0xff]  ;;  %4855 = vmatpush1.bf16.msra.mxu1 %v6985_v20 }
  0xd0   :  { %v555_v15 = vld [vmem:[#allocation2 + $0xe00] sm:$0xff]  ;;  %v6994_v23 = vcombine.high %v299_v13, %v303_v14  ;;  %4936 = vmatprep.subr.bf16.mxu0 %v7242_v17  ;;  %v6993_v30 = vcombine.low %v299_v13, %v303_v14 }
  0xd1   :  { %v559_v18 = vld [vmem:[#allocation2 + $0xe20] sm:$0xff]  ;;  %4937 = vmatpush1.bf16.msra.mxu0 %v7241_v53 }
  0xd2   :  { %v307_v24 = vld [vmem:[#allocation2 + $0x640] sm:$0xff]  ;;  %v7250_v27 = vcombine.high %v555_v15, %v559_v18  ;;  %4856 = vmatprep.subr.bf16.mxu1 %v6994_v23  ;;  %v7249_v31 = vcombine.low %v555_v15, %v559_v18 }
  0xd3   :  { %v311_v25 = vld [vmem:[#allocation2 + $0x660] sm:$0xff]  ;;  %4857 = vmatpush1.bf16.msra.mxu1 %v6993_v30 }
  0xd4   :  { %v563_v26 = vld [vmem:[#allocation2 + $0xe40] sm:$0xff]  ;;  %v7002_v32 = vcombine.high %v307_v24, %v311_v25  ;;  %4938 = vmatprep.subr.bf16.mxu0 %v7250_v27  ;;  %v7001_v38 = vcombine.low %v307_v24, %v311_v25 }
  0xd5   :  { %v567_v28 = vld [vmem:[#allocation2 + $0xe60] sm:$0xff]  ;;  %4939 = vmatpush1.bf16.msra.mxu0 %v7249_v31 }
  0xd6   :  { %v315_v33 = vld [vmem:[#allocation2 + $0x680] sm:$0xff]  ;;  %v7258_v36 = vcombine.high %v563_v26, %v567_v28  ;;  %4858 = vmatprep.subr.bf16.mxu1 %v7002_v32  ;;  %v7257_v39 = vcombine.low %v563_v26, %v567_v28  ;;  %v108_v26 = vld [vmem:[#allocation2 + $0x8] sm:$0xff] }
  0xd7   :  { %v319_v34 = vld [vmem:[#allocation2 + $0x6a0] sm:$0xff]  ;;  %4859 = vmatpush1.bf16.msra.mxu1 %v7001_v38  ;;  %v112_v28 = vld [vmem:[#allocation2 + $0x28] sm:$0xff] }
  0xd8   :  { %v571_v35 = vld [vmem:[#allocation2 + $0xe80] sm:$0xff]  ;;  %v7010_v40 = vcombine.high %v315_v33, %v319_v34  ;;  %4940 = vmatprep.subr.bf16.mxu0 %v7258_v36  ;;  %v7009_v46 = vcombine.low %v315_v33, %v319_v34  ;;  %v6804_v32 = vcombine.high %v108_v26, %v112_v28  ;;  %v120_v36 = vld [vmem:[#allocation2 + $0x68] sm:$0xff] }
  0xd9   :  { %v575_v37 = vld [vmem:[#allocation2 + $0xea0] sm:$0xff]  ;;  %4941 = vmatpush1.bf16.msra.mxu0 %v7257_v39  ;;  %v8357_v39 = vcombine.low %v8327_v19, %v8327_v19 }
  0xda   :  { %v323_v41 = vld [vmem:[#allocation2 + $0x6c0] sm:$0xff]  ;;  %v7266_v44 = vcombine.high %v571_v35, %v575_v37  ;;  %4860 = vmatprep.subr.bf16.mxu1 %v7010_v40  ;;  %v7265_v47 = vcombine.low %v571_v35, %v575_v37  ;;  %v116_v35 = vld [vmem:[#allocation2 + $0x48] sm:$0xff]  ;;  %v6803_v40 = vcombine.low %v108_v26, %v112_v28 }
  0xdb   :  { %v327_v42 = vld [vmem:[#allocation2 + $0x6e0] sm:$0xff]  ;;  %4861 = vmatpush1.bf16.msra.mxu1 %v7009_v46  ;;  %v128_v46 = vld [vmem:[#allocation2 + $0xa8] sm:$0xff] }
  0xdc   :  { %v579_v43 = vld [vmem:[#allocation2 + $0xec0] sm:$0xff]  ;;  %v7018_v48 = vcombine.high %v323_v41, %v327_v42  ;;  %4942 = vmatprep.subr.bf16.mxu0 %v7266_v44  ;;  %v7017_v55 = vcombine.low %v323_v41, %v327_v42  ;;  %v8361_v41 = vcombine.low %v8336_v22, %v8336_v22  ;;  %v124_v44 = vld [vmem:[#allocation2 + $0x88] sm:$0xff]  ;;  %v6811_v22 = vcombine.low %v116_v35, %v120_v36 }
  0xdd   :  { %v583_v45 = vld [vmem:[#allocation2 + $0xee0] sm:$0xff]  ;;  %4943 = vmatpush1.bf16.msra.mxu0 %v7265_v47  ;;  %v168_v28 = vld [vmem:[#allocation2 + $0x1e8] sm:$0xff] }
  0xde   :  { %v331_v49 = vld [vmem:[#allocation2 + $0x700] sm:$0xff]  ;;  %v7274_v52 = vcombine.high %v579_v43, %v583_v45  ;;  %4862 = vmatprep.subr.bf16.mxu1 %v7018_v48  ;;  %v7273_v56 = vcombine.low %v579_v43, %v583_v45  ;;  %v6812_v43 = vcombine.high %v116_v35, %v120_v36  ;;  %v172_v36 = vld [vmem:[#allocation2 + $0x208] sm:$0xff] }
  0xdf   :  { %v335_v50 = vld [vmem:[#allocation2 + $0x720] sm:$0xff]  ;;  %4863 = vmatpush1.bf16.msra.mxu1 %v7017_v55 }
  0xe0   :  { %v587_v51 = vld [vmem:[#allocation2 + $0xf00] sm:$0xff]  ;;  %v7026_v59 = vcombine.high %v331_v49, %v335_v50  ;;  %4944 = vmatprep.subr.bf16.mxu0 %v7274_v52  ;;  %v7025_v2 = vcombine.low %v331_v49, %v335_v50  ;;  %v6820_v50 = vcombine.high %v124_v44, %v128_v46  ;;  %v132_v52 = vld [vmem:[#allocation2 + $0xc8] sm:$0xff] }
  0xe1   :  { %v591_v54 = vld [vmem:[#allocation2 + $0xf20] sm:$0xff]  ;;  %4945 = vmatpush1.bf16.msra.mxu0 %v7273_v56 }
  0xe2   :  { %v339_v60 = vld [vmem:[#allocation2 + $0x740] sm:$0xff]  ;;  %v7282_v0 = vcombine.high %v587_v51, %v591_v54  ;;  %4864 = vmatprep.subr.bf16.mxu1 %v7026_v59  ;;  %v7281_v3 = vcombine.low %v587_v51, %v591_v54  ;;  %v136_v54 = vld [vmem:[#allocation2 + $0xe8] sm:$0xff]  ;;  %v6819_v59 = vcombine.low %v124_v44, %v128_v46 }
  0xe3   :  { %v343_v62 = vld [vmem:[#allocation2 + $0x760] sm:$0xff]  ;;  %4865 = vmatpush1.bf16.msra.mxu1 %v7025_v2 }
  0xe4   :  { %v595_v63 = vld [vmem:[#allocation2 + $0xf40] sm:$0xff]  ;;  %v7034_v4 = vcombine.high %v339_v60, %v343_v62  ;;  %4946 = vmatprep.subr.bf16.mxu0 %v7282_v0  ;;  %v7033_v10 = vcombine.low %v339_v60, %v343_v62  ;;  %v6828_v62 = vcombine.high %v132_v52, %v136_v54  ;;  %v140_v0 = vld [vmem:[#allocation2 + $0x108] sm:$0xff] }
  0xe5   :  { %v599_v1 = vld [vmem:[#allocation2 + $0xf60] sm:$0xff]  ;;  %4947 = vmatpush1.bf16.msra.mxu0 %v7281_v3 }
  0xe6   :  { %v347_v5 = vld [vmem:[#allocation2 + $0x780] sm:$0xff]  ;;  %v7290_v8 = vcombine.high %v595_v63, %v599_v1  ;;  %4866 = vmatprep.subr.bf16.mxu1 %v7034_v4  ;;  %v7289_v11 = vcombine.low %v595_v63, %v599_v1  ;;  %v144_v1 = vld [vmem:[#allocation2 + $0x128] sm:$0xff]  ;;  %v6827_v4 = vcombine.low %v132_v52, %v136_v54 }
  0xe7   :  { %v351_v6 = vld [vmem:[#allocation2 + $0x7a0] sm:$0xff]  ;;  %4867 = vmatpush1.bf16.msra.mxu1 %v7033_v10 }
  0xe8   :  { %v603_v7 = vld [vmem:[#allocation2 + $0xf80] sm:$0xff]  ;;  %v7042_v12 = vcombine.high %v347_v5, %v351_v6  ;;  %4948 = vmatprep.subr.bf16.mxu0 %v7290_v8  ;;  %v7041_v20 = vcombine.low %v347_v5, %v351_v6  ;;  %v6836_v6 = vcombine.high %v140_v0, %v144_v1  ;;  %v148_v8 = vld [vmem:[#allocation2 + $0x148] sm:$0xff] }
  0xe9   :  { %v607_v9 = vld [vmem:[#allocation2 + $0xfa0] sm:$0xff]  ;;  %4949 = vmatpush1.bf16.msra.mxu0 %v7289_v11 }
  0xea   :  { %v355_v13 = vld [vmem:[#allocation2 + $0x7c0] sm:$0xff]  ;;  %v7298_v17 = vcombine.high %v603_v7, %v607_v9  ;;  %4868 = vmatprep.subr.bf16.mxu1 %v7042_v12  ;;  %v7297_v53 = vcombine.low %v603_v7, %v607_v9  ;;  %v152_v9 = vld [vmem:[#allocation2 + $0x168] sm:$0xff]  ;;  %v6835_v12 = vcombine.low %v140_v0, %v144_v1 }
  0xeb   :  { %v359_v14 = vld [vmem:[#allocation2 + $0x7e0] sm:$0xff]  ;;  %4869 = vmatpush1.bf16.msra.mxu1 %v7041_v20 }
  0xec   :  { %v611_v15 = vld [vmem:[#allocation2 + $0xfc0] sm:$0xff]  ;;  %v7050_v23 = vcombine.high %v355_v13, %v359_v14  ;;  %4950 = vmatprep.subr.bf16.mxu0 %v7298_v17  ;;  %v7049_v30 = vcombine.low %v355_v13, %v359_v14  ;;  %v6844_v14 = vcombine.high %v148_v8, %v152_v9  ;;  %v156_v17 = vld [vmem:[#allocation2 + $0x188] sm:$0xff] }
  0xed   :  { %v615_v18 = vld [vmem:[#allocation2 + $0xfe0] sm:$0xff]  ;;  %4951 = vmatpush1.bf16.msra.mxu0 %v7297_v53 }
  0xee   :  { %v619_v24 = vld [vmem:[#allocation2 + $0x1000] sm:$0xff]  ;;  %v7306_v27 = vcombine.high %v611_v15, %v615_v18  ;;  %4870 = vmatprep.subr.bf16.mxu1 %v7050_v23  ;;  %v7305_v31 = vcombine.low %v611_v15, %v615_v18  ;;  %v160_v18 = vld [vmem:[#allocation2 + $0x1a8] sm:$0xff]  ;;  %v6843_v23 = vcombine.low %v148_v8, %v152_v9 }
  0xef   :  { %v623_v25 = vld [vmem:[#allocation2 + $0x1020] sm:$0xff]  ;;  %4871 = vmatpush1.bf16.msra.mxu1 %v7049_v30 }
  0xf0   :  { %v627_v33 = vld [vmem:[#allocation2 + $0x1040] sm:$0xff]  ;;  %4952 = vmatprep.subr.bf16.mxu0 %v7306_v27  ;;  %v7314_v37 = vcombine.high %v619_v24, %v623_v25  ;;  %v7313_v42 = vcombine.low %v619_v24, %v623_v25  ;;  %5045 = vmatprep.subr.bf16.mxu1 %v6804_v32  ;;  %v6852_v25 = vcombine.high %v156_v17, %v160_v18  ;;  %v164_v27 = vld [vmem:[#allocation2 + $0x1c8] sm:$0xff] }
  0xf1   :  { %v631_v34 = vld [vmem:[#allocation2 + $0x1060] sm:$0xff]  ;;  %4953 = vmatpush1.bf16.msra.mxu0 %v7305_v31  ;;  %v6851_v32 = vcombine.low %v156_v17, %v160_v18 }
  0xf2   :  { %v8353_v38 = vld [vmem:[%s8485_s0 + $0x20] sm:$0xff]  ;;  %4963 = vmatprep.subr.bf16.mxu0 %v7314_v37  ;;  %v7322_v45 = vcombine.high %v627_v33, %v631_v34  ;;  %4873 = vmatmul.mubr.bf16.vlgmr.msra.gmra.mrb[0].mxu1 %v8357_v39  ;;  %v7321_v49 = vcombine.low %v627_v33, %v631_v34  ;;  %v6860_v34 = vcombine.high %v164_v27, %v168_v28  ;;  %v176_v37 = vld [vmem:[#allocation2 + $0x228] sm:$0xff] }
  0xf3   :  { %v8365_v47 = vcombine.high %v8353_v38, %v8353_v38  ;;  %v635_v19 = vld [vmem:[#allocation2 + $0x1080] sm:$0xff]  ;;  %5046 = vmatpush1.bf16.msra.mxu1 %v6803_v40  ;;  %5077 = vmatprep.mubr.bf16.mxu1 %v8307_v57 }
  0xf4   :  { %v639_v48 = vld [vmem:[#allocation2 + $0x10a0] sm:$0xff]  ;;  %4955 = vmatmul.mubr.bf16.vlgmr.msra.gmra.mrb[0].mxu0 %v8361_v41  ;;  %5047 = vmatprep.subr.bf16.mxu1 %v6812_v43  ;;  %v6859_v43 = vcombine.low %v164_v27, %v168_v28 }
  0xf5   :  { %4964 = vmatpush1.bf16.msra.mxu0 %v7313_v42  ;;  %v7330_v51 = vcombine.high %v635_v19, %v639_v48  ;;  %4995 = vmatprep.mubr.bf16.mxu0 %v8365_v47  ;;  %v643_v55 = vld [vmem:[#allocation2 + $0x10c0] sm:$0xff]  ;;  %v7329_v60 = vcombine.low %v635_v19, %v639_v48  ;;  %v180_v19 = vld [vmem:[#allocation2 + $0x248] sm:$0xff] }
  0xf6   :  { %4965 = vmatprep.subr.bf16.mxu0 %v7322_v45  ;;  %v647_v56 = vld [vmem:[#allocation2 + $0x10e0] sm:$0xff]  ;;  %v6868_v45 = vcombine.high %v172_v36, %v176_v37  ;;  %v184_v48 = vld [vmem:[#allocation2 + $0x268] sm:$0xff] }
  0xf7   :  { %5048 = vmatpush1.bf16.msra.mxu1 %v6811_v22  ;;  %v7338_v63 = vcombine.high %v643_v55, %v647_v56  ;;  %v651_v2 = vld [vmem:[#allocation2 + $0x1100] sm:$0xff]  ;;  %v7337_v5 = vcombine.low %v643_v55, %v647_v56  ;;  %v6876_v52 = vcombine.high %v180_v19, %v184_v48  ;;  %v188_v55 = vld [vmem:[#allocation2 + $0x288] sm:$0xff] }
  0xf8   :  { %5049 = vmatprep.subr.bf16.mxu1 %v6820_v50  ;;  %v655_v3 = vld [vmem:[#allocation2 + $0x1120] sm:$0xff]  ;;  %v6867_v50 = vcombine.low %v172_v36, %v176_v37  ;;  %v192_v56 = vld [vmem:[#allocation2 + $0x2a8] sm:$0xff] }
  0xf9   :  { %4966 = vmatpush1.bf16.msra.mxu0 %v7321_v49  ;;  %v7346_v7 = vcombine.high %v651_v2, %v655_v3  ;;  %v659_v10 = vld [vmem:[#allocation2 + $0x1140] sm:$0xff]  ;;  %v7345_v13 = vcombine.low %v651_v2, %v655_v3  ;;  %v6884_v0 = vcombine.high %v188_v55, %v192_v56  ;;  %v196_v2 = vld [vmem:[#allocation2 + $0x2c8] sm:$0xff] }
  0xfa   :  { %4967 = vmatprep.subr.bf16.mxu0 %v7330_v51  ;;  %v663_v11 = vld [vmem:[#allocation2 + $0x1160] sm:$0xff]  ;;  %v200_v3 = vld [vmem:[#allocation2 + $0x2e8] sm:$0xff] }
  0xfb   :  { %5050 = vmatpush1.bf16.msra.mxu1 %v6819_v59  ;;  %v7354_v15 = vcombine.high %v659_v10, %v663_v11  ;;  %v667_v20 = vld [vmem:[#allocation2 + $0x1180] sm:$0xff]  ;;  %v7353_v24 = vcombine.low %v659_v10, %v663_v11  ;;  %v6892_v8 = vcombine.high %v196_v2, %v200_v3  ;;  %v204_v10 = vld [vmem:[#allocation2 + $0x308] sm:$0xff] }
  0xfc   :  { %5051 = vmatprep.subr.bf16.mxu1 %v6828_v62  ;;  %v671_v53 = vld [vmem:[#allocation2 + $0x11a0] sm:$0xff]  ;;  %v6875_v62 = vcombine.low %v180_v19, %v184_v48  ;;  %v208_v11 = vld [vmem:[#allocation2 + $0x328] sm:$0xff] }
  0xfd   :  { %4968 = vmatpush1.bf16.msra.mxu0 %v7329_v60  ;;  %v7362_v26 = vcombine.high %v667_v20, %v671_v53  ;;  %v675_v30 = vld [vmem:[#allocation2 + $0x11c0] sm:$0xff]  ;;  %v7361_v33 = vcombine.low %v667_v20, %v671_v53  ;;  %v6900_v17 = vcombine.high %v204_v10, %v208_v11  ;;  %v212_v20 = vld [vmem:[#allocation2 + $0x348] sm:$0xff] }
  0xfe   :  { %4969 = vmatprep.subr.bf16.mxu0 %v7338_v63  ;;  %v679_v31 = vld [vmem:[#allocation2 + $0x11e0] sm:$0xff]  ;;  %v216_v53 = vld [vmem:[#allocation2 + $0x368] sm:$0xff] }
  0xff   :  { %5052 = vmatpush1.bf16.msra.mxu1 %v6827_v4  ;;  %v7370_v35 = vcombine.high %v675_v30, %v679_v31  ;;  %v683_v40 = vld [vmem:[#allocation2 + $0x1200] sm:$0xff]  ;;  %v7369_v44 = vcombine.low %v675_v30, %v679_v31  ;;  %v6908_v27 = vcombine.high %v212_v20, %v216_v53  ;;  %v220_v30 = vld [vmem:[#allocation2 + $0x388] sm:$0xff] }
 0x100   :  { %5053 = vmatprep.subr.bf16.mxu1 %v6836_v6  ;;  %v687_v42 = vld [vmem:[#allocation2 + $0x1220] sm:$0xff]  ;;  %v6883_v6 = vcombine.low %v188_v55, %v192_v56  ;;  %v224_v31 = vld [vmem:[#allocation2 + $0x3a8] sm:$0xff] }
 0x101   :  { %4970 = vmatpush1.bf16.msra.mxu0 %v7337_v5  ;;  %v7378_v46 = vcombine.high %v683_v40, %v687_v42  ;;  %v691_v22 = vld [vmem:[#allocation2 + $0x1240] sm:$0xff]  ;;  %v7377_v51 = vcombine.low %v683_v40, %v687_v42  ;;  %v6916_v36 = vcombine.high %v220_v30, %v224_v31  ;;  %v228_v40 = vld [vmem:[#allocation2 + $0x3c8] sm:$0xff] }
 0x102   :  { %4971 = vmatprep.subr.bf16.mxu0 %v7346_v7  ;;  %v695_v49 = vld [vmem:[#allocation2 + $0x1260] sm:$0xff]  ;;  %v232_v42 = vld [vmem:[#allocation2 + $0x3e8] sm:$0xff] }
 0x103   :  { %5054 = vmatpush1.bf16.msra.mxu1 %v6835_v12  ;;  %v7386_v54 = vcombine.high %v691_v22, %v695_v49  ;;  %v699_v59 = vld [vmem:[#allocation2 + $0x1280] sm:$0xff]  ;;  %v7385_v63 = vcombine.low %v691_v22, %v695_v49  ;;  %v6924_v19 = vcombine.high %v228_v40, %v232_v42  ;;  %v236_v22 = vld [vmem:[#allocation2 + $0x408] sm:$0xff] }
 0x104   :  { %5055 = vmatprep.subr.bf16.mxu1 %v6844_v14  ;;  %v703_v60 = vld [vmem:[#allocation2 + $0x12a0] sm:$0xff]  ;;  %v6891_v14 = vcombine.low %v196_v2, %v200_v3  ;;  %v240_v49 = vld [vmem:[#allocation2 + $0x428] sm:$0xff]  ;;  %v8378_v2 = vcombine.low %v8353_v38, %v8353_v38 }
 0x105   :  { %4972 = vmatpush1.bf16.msra.mxu0 %v7345_v13  ;;  %v7394_v1 = vcombine.high %v699_v59, %v703_v60  ;;  %v707_v4 = vld [vmem:[#allocation2 + $0x12c0] sm:$0xff]  ;;  %v7393_v7 = vcombine.low %v699_v59, %v703_v60  ;;  %v6932_v55 = vcombine.high %v236_v22, %v240_v49  ;;  %v244_v59 = vld [vmem:[#allocation2 + $0x448] sm:$0xff] }
 0x106   :  { %4973 = vmatprep.subr.bf16.mxu0 %v7354_v15  ;;  %v711_v5 = vld [vmem:[#allocation2 + $0x12e0] sm:$0xff]  ;;  %v248_v60 = vld [vmem:[#allocation2 + $0x468] sm:$0xff] }
 0x107   :  { %5056 = vmatpush1.bf16.msra.mxu1 %v6843_v23  ;;  %v7402_v9 = vcombine.high %v707_v4, %v711_v5  ;;  %v715_v12 = vld [vmem:[#allocation2 + $0x1300] sm:$0xff]  ;;  %v7401_v15 = vcombine.low %v707_v4, %v711_v5  ;;  %v6940_v4 = vcombine.high %v244_v59, %v248_v60  ;;  %v6939_v38 = vcombine.low %v244_v59, %v248_v60 }
 0x108   :  { %5057 = vmatprep.subr.bf16.mxu1 %v6852_v25  ;;  %v719_v13 = vld [vmem:[#allocation2 + $0x1320] sm:$0xff]  ;;  %v6899_v25 = vcombine.low %v204_v10, %v208_v11 }
 0x109   :  { %4974 = vmatpush1.bf16.msra.mxu0 %v7353_v24  ;;  %v7410_v18 = vcombine.high %v715_v12, %v719_v13  ;;  %v723_v23 = vld [vmem:[#allocation2 + $0x1340] sm:$0xff] }
 0x10a   :  { %4975 = vmatprep.subr.bf16.mxu0 %v7362_v26  ;;  %v727_v24 = vld [vmem:[#allocation2 + $0x1360] sm:$0xff]  ;;  %v7409_v26 = vcombine.low %v715_v12, %v719_v13 }
 0x10b   :  { %5058 = vmatpush1.bf16.msra.mxu1 %v6851_v32  ;;  %v7418_v28 = vcombine.high %v723_v23, %v727_v24  ;;  %v731_v32 = vld [vmem:[#allocation2 + $0x1380] sm:$0xff] }
 0x10c   :  { %5059 = vmatprep.subr.bf16.mxu1 %v6860_v34  ;;  %v6907_v34 = vcombine.low %v212_v20, %v216_v53  ;;  %v767_v10 = vld [vmem:[#allocation2 + $0x14a0] sm:$0xff] }
 0x10d   :  { %4976 = vmatpush1.bf16.msra.mxu0 %v7361_v33  ;;  %v735_v33 = vld [vmem:[#allocation2 + $0x13a0] sm:$0xff] }
 0x10e   :  { %4977 = vmatprep.subr.bf16.mxu0 %v7370_v35  ;;  %v7417_v35 = vcombine.low %v723_v23, %v727_v24  ;;  %v7426_v37 = vcombine.high %v731_v32, %v735_v33 }
 0x10f   :  { %5060 = vmatpush1.bf16.msra.mxu1 %v6859_v43  ;;  %v739_v43 = vld [vmem:[#allocation2 + $0x13c0] sm:$0xff] }
 0x110   :  { %5061 = vmatprep.subr.bf16.mxu1 %v6868_v45  ;;  %v6915_v45 = vcombine.low %v220_v30, %v224_v31 }
 0x111   :  { %4978 = vmatpush1.bf16.msra.mxu0 %v7369_v44  ;;  %v743_v44 = vld [vmem:[#allocation2 + $0x13e0] sm:$0xff] }
 0x112   :  { %4979 = vmatprep.subr.bf16.mxu0 %v7378_v46  ;;  %v7425_v46 = vcombine.low %v731_v32, %v735_v33  ;;  %v7434_v48 = vcombine.high %v739_v43, %v743_v44 }
 0x113   :  { %5062 = vmatpush1.bf16.msra.mxu1 %v6867_v50  ;;  %v747_v50 = vld [vmem:[#allocation2 + $0x1400] sm:$0xff] }
 0x114   :  { %5063 = vmatprep.subr.bf16.mxu1 %v6876_v52  ;;  %v6923_v52 = vcombine.low %v228_v40, %v232_v42 }
 0x115   :  { %4980 = vmatpush1.bf16.msra.mxu0 %v7377_v51  ;;  %v751_v51 = vld [vmem:[#allocation2 + $0x1420] sm:$0xff] }
 0x116   :  { %4981 = vmatprep.subr.bf16.mxu0 %v7386_v54  ;;  %v7433_v54 = vcombine.low %v739_v43, %v743_v44  ;;  %v7442_v56 = vcombine.high %v747_v50, %v751_v51  ;;  %v7441_v3 = vcombine.low %v747_v50, %v751_v51 }
 0x117   :  { %5064 = vmatpush1.bf16.msra.mxu1 %v6875_v62  ;;  %v755_v62 = vld [vmem:[#allocation2 + $0x1440] sm:$0xff] }
 0x118   :  { %5065 = vmatprep.subr.bf16.mxu1 %v6884_v0  ;;  %v8374_v0 = vld [vmem:[%s8485_s0 + $0x28] sm:$0xff]  ;;  %s8187_s0 = smov [#allocation13]  }
 0x119   :  { %4982 = vmatpush1.bf16.msra.mxu0 %v7385_v63  ;;  %v759_v63 = vld [vmem:[#allocation2 + $0x1460] sm:$0xff]  ;;  %s6777_s11 = sshll.u32 %s8187_s0, 4  ;;  %s6778_s11 = int_to_ptr.vmem [resolvable:$true] %s6777_s11 }
 0x11a   :  { %4983 = vmatprep.subr.bf16.mxu0 %v7394_v1  ;;  %v6931_v1 = vcombine.low %v236_v22, %v240_v49  ;;  %v7450_v5 = vcombine.high %v755_v62, %v759_v63  ;;  %v7449_v11 = vcombine.low %v755_v62, %v759_v63  ;;  %s8145_s4 = scalar_lea.vmem %s6778_s11, 256  ;;  %p8150_p7 = scmp.lt.s32.totalorder %s6778_s11, %s6778_s11 }
 0x11b   :  { %5066 = vmatpush1.bf16.msra.mxu1 %v6883_v6  ;;  %v252_v6 = vld [vmem:[#allocation2 + $0x488] sm:$0xff]  ;;  %p8146_p6 = scmp.ne.s32.totalorder %s6778_s11, %s8145_s4  ;;  %p8151_p8 = scmp.lt.s32.totalorder %s8145_s4, %s8145_s4 }
 0x11c   :  { %5067 = vmatprep.subr.bf16.mxu1 %v6892_v8  ;;  %v8382_v8 = vcombine.high %v8374_v0, %v8374_v0 }
 0x11d   :  { %4984 = vmatpush1.bf16.msra.mxu0 %v7393_v7  ;;  %v256_v7 = vld [vmem:[#allocation2 + $0x4a8] sm:$0xff]  ;;  %p8152_p9 = por %p8151_p8, %p8150_p7 }
 0x11e   :  { %4985 = vmatprep.subr.bf16.mxu0 %v7402_v9  ;;  %v763_v9 = vld [vmem:[#allocation2 + $0x1480] sm:$0xff]  ;;  %v6948_v12 = vcombine.high %v252_v6, %v256_v7  ;;  %v6947_v20 = vcombine.low %v252_v6, %v256_v7 }
 0x11f   :  { %5068 = vmatpush1.bf16.msra.mxu1 %v6891_v14  ;;  %v7458_v13 = vcombine.high %v763_v9, %v767_v10  ;;  %v260_v14 = vld [vmem:[#allocation2 + $0x4c8] sm:$0xff]  ;;  %v7457_v53 = vcombine.low %v763_v9, %v767_v10  ;;  %p8153_p10 = pnand %p8152_p9, %p8146_p6 }
 0x120   :  { %5069 = vmatprep.subr.bf16.mxu1 %v6900_v17  ;;  %v771_v17 = vld [vmem:[#allocation2 + $0x14c0] sm:$0xff] }
 0x121   :  { %4986 = vmatpush1.bf16.msra.mxu0 %v7401_v15  ;;  %v264_v15 = vld [vmem:[#allocation2 + $0x4e8] sm:$0xff] }
 0x122   :  { %4987 = vmatprep.subr.bf16.mxu0 %v7410_v18  ;;  %v775_v18 = vld [vmem:[#allocation2 + $0x14e0] sm:$0xff]  ;;  %v6956_v23 = vcombine.high %v260_v14, %v264_v15  ;;  %v6955_v30 = vcombine.low %v260_v14, %v264_v15 }
 0x123   :  { %5070 = vmatpush1.bf16.msra.mxu1 %v6899_v25  ;;  %v7466_v24 = vcombine.high %v771_v17, %v775_v18  ;;  %v268_v25 = vld [vmem:[#allocation2 + $0x508] sm:$0xff]  ;;  %v7465_v31 = vcombine.low %v771_v17, %v775_v18 }
 0x124   :  { %5071 = vmatprep.subr.bf16.mxu1 %v6908_v27  ;;  %v779_v27 = vld [vmem:[#allocation2 + $0x1500] sm:$0xff] }
 0x125   :  { %4988 = vmatpush1.bf16.msra.mxu0 %v7409_v26  ;;  %v272_v26 = vld [vmem:[#allocation2 + $0x528] sm:$0xff] }
 0x126   :  { %4989 = vmatprep.subr.bf16.mxu0 %v7418_v28  ;;  %v783_v28 = vld [vmem:[#allocation2 + $0x1520] sm:$0xff]  ;;  %v6964_v32 = vcombine.high %v268_v25, %v272_v26  ;;  %v6963_v40 = vcombine.low %v268_v25, %v272_v26 }
 0x127   :  { %5072 = vmatpush1.bf16.msra.mxu1 %v6907_v34  ;;  %v7474_v33 = vcombine.high %v779_v27, %v783_v28  ;;  %v276_v34 = vld [vmem:[#allocation2 + $0x548] sm:$0xff]  ;;  %v7473_v42 = vcombine.low %v779_v27, %v783_v28 }
 0x128   :  { %5073 = vmatprep.subr.bf16.mxu1 %v6916_v36  ;;  %v787_v36 = vld [vmem:[#allocation2 + $0x1540] sm:$0xff] }
 0x129   :  { %4990 = vmatpush1.bf16.msra.mxu0 %v7417_v35  ;;  %v280_v35 = vld [vmem:[#allocation2 + $0x568] sm:$0xff] }
 0x12a   :  { %4991 = vmatprep.subr.bf16.mxu0 %v7426_v37  ;;  %v791_v37 = vld [vmem:[#allocation2 + $0x1560] sm:$0xff]  ;;  %v6972_v43 = vcombine.high %v276_v34, %v280_v35  ;;  %v6971_v22 = vcombine.low %v276_v34, %v280_v35 }
 0x12b   :  { %5074 = vmatpush1.bf16.msra.mxu1 %v6915_v45  ;;  %v7482_v44 = vcombine.high %v787_v36, %v791_v37  ;;  %v284_v45 = vld [vmem:[#allocation2 + $0x588] sm:$0xff]  ;;  %v7481_v49 = vcombine.low %v787_v36, %v791_v37 }
 0x12c   :  { %5075 = vmatprep.subr.bf16.mxu1 %v6924_v19  ;;  %v795_v19 = vld [vmem:[#allocation2 + $0x1580] sm:$0xff] }
 0x12d   :  { %4992 = vmatpush1.bf16.msra.mxu0 %v7425_v46  ;;  %v288_v46 = vld [vmem:[#allocation2 + $0x5a8] sm:$0xff] }
 0x12e   :  { %4993 = vmatprep.subr.bf16.mxu0 %v7434_v48  ;;  %v799_v48 = vld [vmem:[#allocation2 + $0x15a0] sm:$0xff]  ;;  %v6980_v50 = vcombine.high %v284_v45, %v288_v46  ;;  %v6979_v59 = vcombine.low %v284_v45, %v288_v46 }
 0x12f   :  { %5076 = vmatpush1.bf16.msra.mxu1 %v6923_v52  ;;  %v7490_v51 = vcombine.high %v795_v19, %v799_v48  ;;  %v292_v52 = vld [vmem:[#allocation2 + $0x5c8] sm:$0xff]  ;;  %v7489_v60 = vcombine.low %v795_v19, %v799_v48 }
 0x130   :  { %5086 = vmatprep.subr.bf16.mxu1 %v6932_v55  ;;  %v803_v55 = vld [vmem:[#allocation2 + $0x15c0] sm:$0xff] }
 0x131   :  { %4994 = vmatpush1.bf16.msra.mxu0 %v7433_v54  ;;  %v296_v54 = vld [vmem:[#allocation2 + $0x5e8] sm:$0xff] }
 0x132   :  { %5004 = vmatprep.subr.bf16.mxu0 %v7442_v56  ;;  %5078 = vmatmul.mubr.bf16.vlgmr.msra.gmra.mrb[4].mxu1 %v8322_v16  ;;  %v807_v56 = vld [vmem:[#allocation2 + $0x15e0] sm:$0xff]  ;;  %v6988_v62 = vcombine.high %v292_v52, %v296_v54  ;;  %v6987_v6 = vcombine.low %v292_v52, %v296_v54 }
 0x133   :  { %5087 = vmatpush1.bf16.msra.mxu1 %v6931_v1  ;;  %5118 = vmatprep.mubr.bf16.mxu1 %v8340_v29  ;;  %v7498_v63 = vcombine.high %v803_v55, %v807_v56  ;;  %v300_v1 = vld [vmem:[#allocation2 + $0x608] sm:$0xff]  ;;  %v7497_v7 = vcombine.low %v803_v55, %v807_v56 }
 0x134   :  { %4996 = vmatmul.mubr.bf16.vlgmr.msra.gmra.mrb[0].mxu0 %v8378_v2  ;;  %5088 = vmatprep.subr.bf16.mxu1 %v6940_v4  ;;  %v811_v4 = vld [vmem:[#allocation2 + $0x1600] sm:$0xff] }
 0x135   :  { %5005 = vmatpush1.bf16.msra.mxu0 %v7441_v3  ;;  %5036 = vmatprep.mubr.bf16.mxu0 %v8382_v8  ;;  %v304_v3 = vld [vmem:[#allocation2 + $0x628] sm:$0xff] }
 0x136   :  { %5006 = vmatprep.subr.bf16.mxu0 %v7450_v5  ;;  %v815_v5 = vld [vmem:[#allocation2 + $0x1620] sm:$0xff]  ;;  %v6996_v9 = vcombine.high %v300_v1, %v304_v3  ;;  %v6995_v14 = vcombine.low %v300_v1, %v304_v3 }
 0x137   :  { %5089 = vmatpush1.bf16.msra.mxu1 %v6939_v38  ;;  %v7506_v10 = vcombine.high %v811_v4, %v815_v5  ;;  %v308_v38 = vld [vmem:[#allocation2 + $0x648] sm:$0xff]  ;;  %v7505_v15 = vcombine.low %v811_v4, %v815_v5 }
 0x138   :  { %5090 = vmatprep.subr.bf16.mxu1 %v6948_v12  ;;  %v819_v12 = vld [vmem:[#allocation2 + $0x1640] sm:$0xff] }
 0x139   :  { %5007 = vmatpush1.bf16.msra.mxu0 %v7449_v11  ;;  %v312_v11 = vld [vmem:[#allocation2 + $0x668] sm:$0xff] }
 0x13a   :  { %5008 = vmatprep.subr.bf16.mxu0 %v7458_v13  ;;  %v823_v13 = vld [vmem:[#allocation2 + $0x1660] sm:$0xff]  ;;  %v7004_v17 = vcombine.high %v308_v38, %v312_v11  ;;  %v7003_v25 = vcombine.low %v308_v38, %v312_v11 }
 0x13b   :  { %5091 = vmatpush1.bf16.msra.mxu1 %v6947_v20  ;;  %v7514_v18 = vcombine.high %v819_v12, %v823_v13  ;;  %v316_v20 = vld [vmem:[#allocation2 + $0x688] sm:$0xff]  ;;  %v7513_v26 = vcombine.low %v819_v12, %v823_v13 }
 0x13c   :  { %5092 = vmatprep.subr.bf16.mxu1 %v6956_v23  ;;  %v827_v23 = vld [vmem:[#allocation2 + $0x1680] sm:$0xff] }
 0x13d   :  { %5009 = vmatpush1.bf16.msra.mxu0 %v7457_v53  ;;  %v320_v53 = vld [vmem:[#allocation2 + $0x6a8] sm:$0xff] }
 0x13e   :  { %5010 = vmatprep.subr.bf16.mxu0 %v7466_v24  ;;  %v831_v24 = vld [vmem:[#allocation2 + $0x16a0] sm:$0xff]  ;;  %v7012_v27 = vcombine.high %v316_v20, %v320_v53  ;;  %v7011_v34 = vcombine.low %v316_v20, %v320_v53 }
 0x13f   :  { %5093 = vmatpush1.bf16.msra.mxu1 %v6955_v30  ;;  %v7522_v28 = vcombine.high %v827_v23, %v831_v24  ;;  %v324_v30 = vld [vmem:[#allocation2 + $0x6c8] sm:$0xff]  ;;  %v7521_v35 = vcombine.low %v827_v23, %v831_v24 }
 0x140   :  { %5094 = vmatprep.subr.bf16.mxu1 %v6964_v32  ;;  %v835_v32 = vld [vmem:[#allocation2 + $0x16c0] sm:$0xff] }
 0x141   :  { %5011 = vmatpush1.bf16.msra.mxu0 %v7465_v31  ;;  %v328_v31 = vld [vmem:[#allocation2 + $0x6e8] sm:$0xff] }
 0x142   :  { %5012 = vmatprep.subr.bf16.mxu0 %v7474_v33  ;;  %v839_v33 = vld [vmem:[#allocation2 + $0x16e0] sm:$0xff]  ;;  %v7020_v36 = vcombine.high %v324_v30, %v328_v31  ;;  %v7019_v45 = vcombine.low %v324_v30, %v328_v31  ;;  %v8390_v30 = vcombine.low %v8374_v0, %v8374_v0 }
 0x143   :  { %5095 = vmatpush1.bf16.msra.mxu1 %v6963_v40  ;;  %v7530_v37 = vcombine.high %v835_v32, %v839_v33  ;;  %v332_v40 = vld [vmem:[#allocation2 + $0x708] sm:$0xff]  ;;  %v7529_v46 = vcombine.low %v835_v32, %v839_v33 }
 0x144   :  { %5096 = vmatprep.subr.bf16.mxu1 %v6972_v43  ;;  %v843_v43 = vld [vmem:[#allocation2 + $0x1700] sm:$0xff] }
 0x145   :  { %5013 = vmatpush1.bf16.msra.mxu0 %v7473_v42  ;;  %v336_v42 = vld [vmem:[#allocation2 + $0x728] sm:$0xff] }
 0x146   :  { %5014 = vmatprep.subr.bf16.mxu0 %v7482_v44  ;;  %v847_v44 = vld [vmem:[#allocation2 + $0x1720] sm:$0xff]  ;;  %v7028_v19 = vcombine.high %v332_v40, %v336_v42  ;;  %v7027_v52 = vcombine.low %v332_v40, %v336_v42  ;;  %v129_v40 = vld [vmem:[#allocation2 + $0xb0] sm:$0xff] }
 0x147   :  { %5097 = vmatpush1.bf16.msra.mxu1 %v6971_v22  ;;  %v7538_v48 = vcombine.high %v843_v43, %v847_v44  ;;  %v340_v22 = vld [vmem:[#allocation2 + $0x748] sm:$0xff]  ;;  %v7537_v54 = vcombine.low %v843_v43, %v847_v44 }
 0x148   :  { %5098 = vmatprep.subr.bf16.mxu1 %v6980_v50  ;;  %v851_v50 = vld [vmem:[#allocation2 + $0x1740] sm:$0xff] }
 0x149   :  { %5015 = vmatpush1.bf16.msra.mxu0 %v7481_v49  ;;  %v344_v49 = vld [vmem:[#allocation2 + $0x768] sm:$0xff] }
 0x14a   :  { %5016 = vmatprep.subr.bf16.mxu0 %v7490_v51  ;;  %v855_v51 = vld [vmem:[#allocation2 + $0x1760] sm:$0xff]  ;;  %v7036_v55 = vcombine.high %v340_v22, %v344_v49  ;;  %v7035_v1 = vcombine.low %v340_v22, %v344_v49 }
 0x14b   :  { %5099 = vmatpush1.bf16.msra.mxu1 %v6979_v59  ;;  %v7546_v56 = vcombine.high %v851_v50, %v855_v51  ;;  %v348_v59 = vld [vmem:[#allocation2 + $0x788] sm:$0xff]  ;;  %v7545_v3 = vcombine.low %v851_v50, %v855_v51 }
 0x14c   :  { %5100 = vmatprep.subr.bf16.mxu1 %v6988_v62  ;;  %v859_v62 = vld [vmem:[#allocation2 + $0x1780] sm:$0xff] }
 0x14d   :  { %5017 = vmatpush1.bf16.msra.mxu0 %v7489_v60  ;;  %v352_v60 = vld [vmem:[#allocation2 + $0x7a8] sm:$0xff] }
 0x14e   :  { %5018 = vmatprep.subr.bf16.mxu0 %v7498_v63  ;;  %v863_v63 = vld [vmem:[#allocation2 + $0x17a0] sm:$0xff]  ;;  %v7044_v4 = vcombine.high %v348_v59, %v352_v60  ;;  %v7043_v38 = vcombine.low %v348_v59, %v352_v60 }
 0x14f   :  { %5101 = vmatpush1.bf16.msra.mxu1 %v6987_v6  ;;  %v7554_v5 = vcombine.high %v859_v62, %v863_v63  ;;  %v356_v6 = vld [vmem:[#allocation2 + $0x7c8] sm:$0xff]  ;;  %v7553_v11 = vcombine.low %v859_v62, %v863_v63 }
 0x150   :  { %5102 = vmatprep.subr.bf16.mxu1 %v6996_v9  ;;  %v867_v9 = vld [vmem:[#allocation2 + $0x17c0] sm:$0xff] }
 0x151   :  { %5019 = vmatpush1.bf16.msra.mxu0 %v7497_v7  ;;  %v360_v7 = vld [vmem:[#allocation2 + $0x7e8] sm:$0xff] }
 0x152   :  { %5020 = vmatprep.subr.bf16.mxu0 %v7506_v10  ;;  %v871_v10 = vld [vmem:[#allocation2 + $0x17e0] sm:$0xff]  ;;  %v7052_v12 = vcombine.high %v356_v6, %v360_v7  ;;  %v7051_v20 = vcombine.low %v356_v6, %v360_v7 }
 0x153   :  { %5103 = vmatpush1.bf16.msra.mxu1 %v6995_v14  ;;  %v7562_v13 = vcombine.high %v867_v9, %v871_v10  ;;  %v364_v14 = vld [vmem:[#allocation2 + $0x808] sm:$0xff]  ;;  %v7561_v53 = vcombine.low %v867_v9, %v871_v10 }
 0x154   :  { %5104 = vmatprep.subr.bf16.mxu1 %v7004_v17  ;;  %v109_v17 = vld [vmem:[#allocation2 + $0x10] sm:$0xff] }
 0x155   :  { %5021 = vmatpush1.bf16.msra.mxu0 %v7505_v15  ;;  %v368_v15 = vld [vmem:[#allocation2 + $0x828] sm:$0xff] }
 0x156   :  { %5022 = vmatprep.subr.bf16.mxu0 %v7514_v18  ;;  %v113_v18 = vld [vmem:[#allocation2 + $0x30] sm:$0xff]  ;;  %v7060_v23 = vcombine.high %v364_v14, %v368_v15  ;;  %v7059_v31 = vcombine.low %v364_v14, %v368_v15 }
 0x157   :  { %5105 = vmatpush1.bf16.msra.mxu1 %v7003_v25  ;;  %v6806_v24 = vcombine.high %v109_v17, %v113_v18  ;;  %v372_v25 = vld [vmem:[#allocation2 + $0x848] sm:$0xff]  ;;  %v6805_v32 = vcombine.low %v109_v17, %v113_v18 }
 0x158   :  { %5106 = vmatprep.subr.bf16.mxu1 %v7012_v27  ;;  %v117_v27 = vld [vmem:[#allocation2 + $0x50] sm:$0xff] }
 0x159   :  { %5023 = vmatpush1.bf16.msra.mxu0 %v7513_v26  ;;  %v376_v26 = vld [vmem:[#allocation2 + $0x868] sm:$0xff] }
 0x15a   :  { %5024 = vmatprep.subr.bf16.mxu0 %v7522_v28  ;;  %v121_v28 = vld [vmem:[#allocation2 + $0x70] sm:$0xff]  ;;  %v7068_v33 = vcombine.high %v372_v25, %v376_v26  ;;  %v7067_v42 = vcombine.low %v372_v25, %v376_v26 }
 0x15b   :  { %5107 = vmatpush1.bf16.msra.mxu1 %v7011_v34  ;;  %v6814_v34 = vcombine.high %v117_v27, %v121_v28  ;;  %v6813_v0 = vcombine.low %v117_v27, %v121_v28 }
 0x15c   :  { %5108 = vmatprep.subr.bf16.mxu1 %v7020_v36  ;;  %v384_v36 = vld [vmem:[#allocation2 + $0x8a8] sm:$0xff] }
 0x15d   :  { %5025 = vmatpush1.bf16.msra.mxu0 %v7521_v35  ;;  %v380_v35 = vld [vmem:[#allocation2 + $0x888] sm:$0xff] }
 0x15e   :  { %5026 = vmatprep.subr.bf16.mxu0 %v7530_v37  ;;  %v125_v37 = vld [vmem:[#allocation2 + $0x90] sm:$0xff]  ;;  %v7076_v43 = vcombine.high %v380_v35, %v384_v36  ;;  %v7075_v22 = vcombine.low %v380_v35, %v384_v36 }
 0x15f   :  { %5109 = vmatpush1.bf16.msra.mxu1 %v7019_v45  ;;  %v6822_v44 = vcombine.high %v125_v37, %v129_v40  ;;  %v388_v45 = vld [vmem:[#allocation2 + $0x8c8] sm:$0xff]  ;;  %v6821_v49 = vcombine.low %v125_v37, %v129_v40 }
 0x160   :  { %5110 = vmatprep.subr.bf16.mxu1 %v7028_v19  ;;  %v133_v19 = vld [vmem:[#allocation2 + $0xd0] sm:$0xff] }
 0x161   :  { %5027 = vmatpush1.bf16.msra.mxu0 %v7529_v46  ;;  %v392_v46 = vld [vmem:[#allocation2 + $0x8e8] sm:$0xff] }
 0x162   :  { %5028 = vmatprep.subr.bf16.mxu0 %v7538_v48  ;;  %v137_v48 = vld [vmem:[#allocation2 + $0xf0] sm:$0xff]  ;;  %v7084_v50 = vcombine.high %v388_v45, %v392_v46  ;;  %v7083_v59 = vcombine.low %v388_v45, %v392_v46 }
 0x163   :  { %5111 = vmatpush1.bf16.msra.mxu1 %v7027_v52  ;;  %v6830_v51 = vcombine.high %v133_v19, %v137_v48  ;;  %v396_v52 = vld [vmem:[#allocation2 + $0x908] sm:$0xff]  ;;  %v6829_v60 = vcombine.low %v133_v19, %v137_v48 }
 0x164   :  { %5112 = vmatprep.subr.bf16.mxu1 %v7036_v55  ;;  %v141_v55 = vld [vmem:[#allocation2 + $0x110] sm:$0xff] }
 0x165   :  { %5029 = vmatpush1.bf16.msra.mxu0 %v7537_v54  ;;  %v400_v54 = vld [vmem:[#allocation2 + $0x928] sm:$0xff] }
 0x166   :  { %5030 = vmatprep.subr.bf16.mxu0 %v7546_v56  ;;  %v145_v56 = vld [vmem:[#allocation2 + $0x130] sm:$0xff]  ;;  %v7092_v62 = vcombine.high %v396_v52, %v400_v54  ;;  %v7091_v6 = vcombine.low %v396_v52, %v400_v54 }
 0x167   :  { %5113 = vmatpush1.bf16.msra.mxu1 %v7035_v1  ;;  %v6838_v63 = vcombine.high %v141_v55, %v145_v56  ;;  %v404_v1 = vld [vmem:[#allocation2 + $0x948] sm:$0xff]  ;;  %v6837_v7 = vcombine.low %v141_v55, %v145_v56 }
 0x168   :  { %5114 = vmatprep.subr.bf16.mxu1 %v7044_v4  ;;  %v149_v4 = vld [vmem:[#allocation2 + $0x150] sm:$0xff] }
 0x169   :  { %5031 = vmatpush1.bf16.msra.mxu0 %v7545_v3  ;;  %v408_v3 = vld [vmem:[#allocation2 + $0x968] sm:$0xff] }
 0x16a   :  { %5032 = vmatprep.subr.bf16.mxu0 %v7554_v5  ;;  %v153_v5 = vld [vmem:[#allocation2 + $0x170] sm:$0xff]  ;;  %v7100_v9 = vcombine.high %v404_v1, %v408_v3  ;;  %v7099_v14 = vcombine.low %v404_v1, %v408_v3 }
 0x16b   :  { %5115 = vmatpush1.bf16.msra.mxu1 %v7043_v38  ;;  %v6846_v10 = vcombine.high %v149_v4, %v153_v5  ;;  %v412_v38 = vld [vmem:[#allocation2 + $0x988] sm:$0xff]  ;;  %v6845_v15 = vcombine.low %v149_v4, %v153_v5 }
 0x16c   :  { %5116 = vmatprep.subr.bf16.mxu1 %v7052_v12  ;;  %v157_v12 = vld [vmem:[#allocation2 + $0x190] sm:$0xff] }
 0x16d   :  { %5033 = vmatpush1.bf16.msra.mxu0 %v7553_v11  ;;  %v416_v11 = vld [vmem:[#allocation2 + $0x9a8] sm:$0xff] }
 0x16e   :  { %5034 = vmatprep.subr.bf16.mxu0 %v7562_v13  ;;  %v161_v13 = vld [vmem:[#allocation2 + $0x1b0] sm:$0xff]  ;;  %v7108_v17 = vcombine.high %v412_v38, %v416_v11  ;;  %v7107_v25 = vcombine.low %v412_v38, %v416_v11 }
 0x16f   :  { %5117 = vmatpush1.bf16.msra.mxu1 %v7051_v20  ;;  %v6854_v18 = vcombine.high %v157_v12, %v161_v13  ;;  %v420_v20 = vld [vmem:[#allocation2 + $0x9c8] sm:$0xff]  ;;  %v6853_v26 = vcombine.low %v157_v12, %v161_v13 }
 0x170   :  { %5127 = vmatprep.subr.bf16.mxu1 %v7060_v23  ;;  %v165_v23 = vld [vmem:[#allocation2 + $0x1d0] sm:$0xff] }
 0x171   :  { %5035 = vmatpush1.bf16.msra.mxu0 %v7561_v53  ;;  %v424_v53 = vld [vmem:[#allocation2 + $0x9e8] sm:$0xff] }
 0x172   :  { %5291 = vmatprep.subr.bf16.mxu0 %v6806_v24  ;;  %5119 = vmatmul.mubr.bf16.vlgmr.msra.gmra.mrb[4].mxu1 %v8357_v39  ;;  %v169_v24 = vld [vmem:[#allocation2 + $0x1f0] sm:$0xff]  ;;  %v7116_v27 = vcombine.high %v420_v20, %v424_v53  ;;  %v7115_v35 = vcombine.low %v420_v20, %v424_v53 }
 0x173   :  { %5128 = vmatpush1.bf16.msra.mxu1 %v7059_v31  ;;  %5159 = vmatprep.mubr.bf16.mxu1 %v8316_v61  ;;  %v6862_v28 = vcombine.high %v165_v23, %v169_v24  ;;  %v428_v31 = vld [vmem:[#allocation2 + $0xa08] sm:$0xff]  ;;  %v6861_v36 = vcombine.low %v165_v23, %v169_v24 }
 0x174   :  { %5037 = vmatmul.mubr.bf16.vlgmr.msra.gmra.mrb[0].mxu0 %v8390_v30  ;;  %5129 = vmatprep.subr.bf16.mxu1 %v7068_v33  ;;  %v173_v33 = vld [vmem:[#allocation2 + $0x210] sm:$0xff] }
 0x175   :  { %5292 = vmatpush1.bf16.msra.mxu0 %v6805_v32  ;;  %5323 = vmatprep.mubr.bf16.mxu0 %v8307_v57  ;;  %v432_v32 = vld [vmem:[#allocation2 + $0xa28] sm:$0xff] }
 0x176   :  { %5293 = vmatprep.subr.bf16.mxu0 %v6814_v34  ;;  %v177_v34 = vld [vmem:[#allocation2 + $0x230] sm:$0xff]  ;;  %v7124_v37 = vcombine.high %v428_v31, %v432_v32  ;;  %v7123_v45 = vcombine.low %v428_v31, %v432_v32 }
 0x177   :  { %5130 = vmatpush1.bf16.msra.mxu1 %v7067_v42  ;;  %v6870_v40 = vcombine.high %v173_v33, %v177_v34  ;;  %v436_v42 = vld [vmem:[#allocation2 + $0xa48] sm:$0xff]  ;;  %v6869_v46 = vcombine.low %v173_v33, %v177_v34 }
 0x178   :  { %5131 = vmatprep.subr.bf16.mxu1 %v7076_v43  ;;  %v181_v43 = vld [vmem:[#allocation2 + $0x250] sm:$0xff] }
 0x179   :  { %5294 = vmatpush1.bf16.msra.mxu0 %v6813_v0  ;;  %v440_v0 = vld [vmem:[#allocation2 + $0xa68] sm:$0xff] }
 0x17a   :  { %5295 = vmatprep.subr.bf16.mxu0 %v6822_v44  ;;  %v185_v44 = vld [vmem:[#allocation2 + $0x270] sm:$0xff]  ;;  %v7132_v19 = vcombine.high %v436_v42, %v440_v0  ;;  %v7131_v52 = vcombine.low %v436_v42, %v440_v0 }
 0x17b   :  { %5132 = vmatpush1.bf16.msra.mxu1 %v7075_v22  ;;  %v6878_v48 = vcombine.high %v181_v43, %v185_v44  ;;  %v444_v22 = vld [vmem:[#allocation2 + $0xa88] sm:$0xff]  ;;  %v6877_v54 = vcombine.low %v181_v43, %v185_v44 }
 0x17c   :  { %5133 = vmatprep.subr.bf16.mxu1 %v7084_v50  ;;  %v189_v50 = vld [vmem:[#allocation2 + $0x290] sm:$0xff] }
 0x17d   :  { %5296 = vmatpush1.bf16.msra.mxu0 %v6821_v49  ;;  %v448_v49 = vld [vmem:[#allocation2 + $0xaa8] sm:$0xff] }
 0x17e   :  { %5297 = vmatprep.subr.bf16.mxu0 %v6830_v51  ;;  %v193_v51 = vld [vmem:[#allocation2 + $0x2b0] sm:$0xff]  ;;  %v7140_v55 = vcombine.high %v444_v22, %v448_v49  ;;  %v7139_v1 = vcombine.low %v444_v22, %v448_v49 }
 0x17f   :  { %5134 = vmatpush1.bf16.msra.mxu1 %v7083_v59  ;;  %v6886_v56 = vcombine.high %v189_v50, %v193_v51  ;;  %v452_v59 = vld [vmem:[#allocation2 + $0xac8] sm:$0xff]  ;;  %v6885_v3 = vcombine.low %v189_v50, %v193_v51 }
 0x180   :  { %5135 = vmatprep.subr.bf16.mxu1 %v7092_v62  ;;  %v197_v62 = vld [vmem:[#allocation2 + $0x2d0] sm:$0xff] }
 0x181   :  { %5298 = vmatpush1.bf16.msra.mxu0 %v6829_v60  ;;  %v456_v60 = vld [vmem:[#allocation2 + $0xae8] sm:$0xff] }
 0x182   :  { %5299 = vmatprep.subr.bf16.mxu0 %v6838_v63  ;;  %v201_v63 = vld [vmem:[#allocation2 + $0x2f0] sm:$0xff]  ;;  %v7148_v4 = vcombine.high %v452_v59, %v456_v60  ;;  %v7147_v38 = vcombine.low %v452_v59, %v456_v60 }
 0x183   :  { %5136 = vmatpush1.bf16.msra.mxu1 %v7091_v6  ;;  %v6894_v5 = vcombine.high %v197_v62, %v201_v63  ;;  %v460_v6 = vld [vmem:[#allocation2 + $0xb08] sm:$0xff]  ;;  %v6893_v11 = vcombine.low %v197_v62, %v201_v63 }
 0x184   :  { %5137 = vmatprep.subr.bf16.mxu1 %v7100_v9  ;;  %v205_v9 = vld [vmem:[#allocation2 + $0x310] sm:$0xff] }
 0x185   :  { %5300 = vmatpush1.bf16.msra.mxu0 %v6837_v7  ;;  %v464_v7 = vld [vmem:[#allocation2 + $0xb28] sm:$0xff] }
 0x186   :  { %5301 = vmatprep.subr.bf16.mxu0 %v6846_v10  ;;  %v209_v10 = vld [vmem:[#allocation2 + $0x330] sm:$0xff]  ;;  %v7156_v12 = vcombine.high %v460_v6, %v464_v7  ;;  %v7155_v20 = vcombine.low %v460_v6, %v464_v7 }
 0x187   :  { %5138 = vmatpush1.bf16.msra.mxu1 %v7099_v14  ;;  %v6902_v13 = vcombine.high %v205_v9, %v209_v10  ;;  %v468_v14 = vld [vmem:[#allocation2 + $0xb48] sm:$0xff]  ;;  %v6901_v53 = vcombine.low %v205_v9, %v209_v10 }
 0x188   :  { %5139 = vmatprep.subr.bf16.mxu1 %v7108_v17  ;;  %v213_v17 = vld [vmem:[#allocation2 + $0x350] sm:$0xff] }
 0x189   :  { %5302 = vmatpush1.bf16.msra.mxu0 %v6845_v15  ;;  %v472_v15 = vld [vmem:[#allocation2 + $0xb68] sm:$0xff] }
 0x18a   :  { %5303 = vmatprep.subr.bf16.mxu0 %v6854_v18  ;;  %v217_v18 = vld [vmem:[#allocation2 + $0x370] sm:$0xff]  ;;  %v7164_v23 = vcombine.high %v468_v14, %v472_v15  ;;  %v7163_v31 = vcombine.low %v468_v14, %v472_v15 }
 0x18b   :  { %5140 = vmatpush1.bf16.msra.mxu1 %v7107_v25  ;;  %v6910_v24 = vcombine.high %v213_v17, %v217_v18  ;;  %v476_v25 = vld [vmem:[#allocation2 + $0xb88] sm:$0xff]  ;;  %v6909_v32 = vcombine.low %v213_v17, %v217_v18 }
 0x18c   :  { %5141 = vmatprep.subr.bf16.mxu1 %v7116_v27  ;;  %v221_v27 = vld [vmem:[#allocation2 + $0x390] sm:$0xff] }
 0x18d   :  { %5304 = vmatpush1.bf16.msra.mxu0 %v6853_v26  ;;  %v480_v26 = vld [vmem:[#allocation2 + $0xba8] sm:$0xff] }
 0x18e   :  { %5305 = vmatprep.subr.bf16.mxu0 %v6862_v28  ;;  %v225_v28 = vld [vmem:[#allocation2 + $0x3b0] sm:$0xff]  ;;  %v7172_v33 = vcombine.high %v476_v25, %v480_v26  ;;  %v7171_v42 = vcombine.low %v476_v25, %v480_v26 }
 0x18f   :  { %5142 = vmatpush1.bf16.msra.mxu1 %v7115_v35  ;;  %v6918_v34 = vcombine.high %v221_v27, %v225_v28  ;;  %v484_v35 = vld [vmem:[#allocation2 + $0xbc8] sm:$0xff]  ;;  %v6917_v0 = vcombine.low %v221_v27, %v225_v28 }
 0x190   :  { %5143 = vmatprep.subr.bf16.mxu1 %v7124_v37  ;;  %v229_v37 = vld [vmem:[#allocation2 + $0x3d0] sm:$0xff] }
 0x191   :  { %5306 = vmatpush1.bf16.msra.mxu0 %v6861_v36  ;;  %v488_v36 = vld [vmem:[#allocation2 + $0xbe8] sm:$0xff] }
 0x192   :  { %5307 = vmatprep.subr.bf16.mxu0 %v6870_v40  ;;  %v233_v40 = vld [vmem:[#allocation2 + $0x3f0] sm:$0xff]  ;;  %v7180_v43 = vcombine.high %v484_v35, %v488_v36  ;;  %v7179_v22 = vcombine.low %v484_v35, %v488_v36 }
 0x193   :  { %5144 = vmatpush1.bf16.msra.mxu1 %v7123_v45  ;;  %v6926_v44 = vcombine.high %v229_v37, %v233_v40  ;;  %v492_v45 = vld [vmem:[#allocation2 + $0xc08] sm:$0xff]  ;;  %v6925_v49 = vcombine.low %v229_v37, %v233_v40 }
 0x194   :  { %5145 = vmatprep.subr.bf16.mxu1 %v7132_v19  ;;  %v237_v19 = vld [vmem:[#allocation2 + $0x410] sm:$0xff] }
 0x195   :  { %5308 = vmatpush1.bf16.msra.mxu0 %v6869_v46  ;;  %v496_v46 = vld [vmem:[#allocation2 + $0xc28] sm:$0xff] }
 0x196   :  { %5309 = vmatprep.subr.bf16.mxu0 %v6878_v48  ;;  %v241_v48 = vld [vmem:[#allocation2 + $0x430] sm:$0xff]  ;;  %v7188_v50 = vcombine.high %v492_v45, %v496_v46  ;;  %v7187_v59 = vcombine.low %v492_v45, %v496_v46 }
 0x197   :  { %5146 = vmatpush1.bf16.msra.mxu1 %v7131_v52  ;;  %v6934_v51 = vcombine.high %v237_v19, %v241_v48  ;;  %v500_v52 = vld [vmem:[#allocation2 + $0xc48] sm:$0xff]  ;;  %v6933_v60 = vcombine.low %v237_v19, %v241_v48 }
 0x198   :  { %5147 = vmatprep.subr.bf16.mxu1 %v7140_v55  ;;  %v245_v55 = vld [vmem:[#allocation2 + $0x450] sm:$0xff] }
 0x199   :  { %5310 = vmatpush1.bf16.msra.mxu0 %v6877_v54  ;;  %v504_v54 = vld [vmem:[#allocation2 + $0xc68] sm:$0xff] }
 0x19a   :  { %5311 = vmatprep.subr.bf16.mxu0 %v6886_v56  ;;  %v249_v56 = vld [vmem:[#allocation2 + $0x470] sm:$0xff]  ;;  %v7196_v62 = vcombine.high %v500_v52, %v504_v54  ;;  %v7195_v6 = vcombine.low %v500_v52, %v504_v54 }
 0x19b   :  { %5148 = vmatpush1.bf16.msra.mxu1 %v7139_v1  ;;  %v6942_v63 = vcombine.high %v245_v55, %v249_v56  ;;  %v508_v1 = vld [vmem:[#allocation2 + $0xc88] sm:$0xff]  ;;  %v6941_v7 = vcombine.low %v245_v55, %v249_v56  ;;  %v293_v52 = vld [vmem:[#allocation2 + $0x5d0] sm:$0xff] }
 0x19c   :  { %5149 = vmatprep.subr.bf16.mxu1 %v7148_v4  ;;  %v253_v4 = vld [vmem:[#allocation2 + $0x490] sm:$0xff] }
 0x19d   :  { %5312 = vmatpush1.bf16.msra.mxu0 %v6885_v3  ;;  %v512_v3 = vld [vmem:[#allocation2 + $0xca8] sm:$0xff]  ;;  %v297_v54 = vld [vmem:[#allocation2 + $0x5f0] sm:$0xff] }
 0x19e   :  { %5313 = vmatprep.subr.bf16.mxu0 %v6894_v5  ;;  %v257_v5 = vld [vmem:[#allocation2 + $0x4b0] sm:$0xff]  ;;  %v7204_v9 = vcombine.high %v508_v1, %v512_v3  ;;  %v7203_v14 = vcombine.low %v508_v1, %v512_v3  ;;  %v556_v1 = vld [vmem:[#allocation2 + $0xe08] sm:$0xff] }
 0x19f   :  { %5150 = vmatpush1.bf16.msra.mxu1 %v7147_v38  ;;  %v6950_v10 = vcombine.high %v253_v4, %v257_v5  ;;  %v516_v38 = vld [vmem:[#allocation2 + $0xcc8] sm:$0xff]  ;;  %v6949_v15 = vcombine.low %v253_v4, %v257_v5  ;;  %v301_v4 = vld [vmem:[#allocation2 + $0x610] sm:$0xff] }
 0x1a0   :  { %5151 = vmatprep.subr.bf16.mxu1 %v7156_v12  ;;  %v261_v12 = vld [vmem:[#allocation2 + $0x4d0] sm:$0xff]  ;;  %v560_v3 = vld [vmem:[#allocation2 + $0xe28] sm:$0xff] }
 0x1a1   :  { %5314 = vmatpush1.bf16.msra.mxu0 %v6893_v11  ;;  %v520_v11 = vld [vmem:[#allocation2 + $0xce8] sm:$0xff]  ;;  %v305_v5 = vld [vmem:[#allocation2 + $0x630] sm:$0xff] }
 0x1a2   :  { %5315 = vmatprep.subr.bf16.mxu0 %v6902_v13  ;;  %v265_v13 = vld [vmem:[#allocation2 + $0x4f0] sm:$0xff]  ;;  %v7212_v17 = vcombine.high %v516_v38, %v520_v11  ;;  %v7211_v25 = vcombine.low %v516_v38, %v520_v11  ;;  %v564_v38 = vld [vmem:[#allocation2 + $0xe48] sm:$0xff] }
 0x1a3   :  { %5152 = vmatpush1.bf16.msra.mxu1 %v7155_v20  ;;  %v6958_v18 = vcombine.high %v261_v12, %v265_v13  ;;  %v524_v20 = vld [vmem:[#allocation2 + $0xd08] sm:$0xff]  ;;  %v6957_v26 = vcombine.low %v261_v12, %v265_v13  ;;  %v309_v12 = vld [vmem:[#allocation2 + $0x650] sm:$0xff] }
 0x1a4   :  { %5153 = vmatprep.subr.bf16.mxu1 %v7164_v23  ;;  %v269_v23 = vld [vmem:[#allocation2 + $0x510] sm:$0xff]  ;;  %v568_v11 = vld [vmem:[#allocation2 + $0xe68] sm:$0xff] }
 0x1a5   :  { %5316 = vmatpush1.bf16.msra.mxu0 %v6901_v53  ;;  %v528_v53 = vld [vmem:[#allocation2 + $0xd28] sm:$0xff]  ;;  %v313_v13 = vld [vmem:[#allocation2 + $0x670] sm:$0xff] }
 0x1a6   :  { %5317 = vmatprep.subr.bf16.mxu0 %v6910_v24  ;;  %v273_v24 = vld [vmem:[#allocation2 + $0x530] sm:$0xff]  ;;  %v7220_v27 = vcombine.high %v524_v20, %v528_v53  ;;  %v7219_v35 = vcombine.low %v524_v20, %v528_v53  ;;  %v572_v20 = vld [vmem:[#allocation2 + $0xe88] sm:$0xff] }
 0x1a7   :  { %5154 = vmatpush1.bf16.msra.mxu1 %v7163_v31  ;;  %v6966_v28 = vcombine.high %v269_v23, %v273_v24  ;;  %v532_v31 = vld [vmem:[#allocation2 + $0xd48] sm:$0xff]  ;;  %v6965_v36 = vcombine.low %v269_v23, %v273_v24  ;;  %v317_v23 = vld [vmem:[#allocation2 + $0x690] sm:$0xff] }
 0x1a8   :  { %5155 = vmatprep.subr.bf16.mxu1 %v7172_v33  ;;  %v277_v33 = vld [vmem:[#allocation2 + $0x550] sm:$0xff]  ;;  %v576_v53 = vld [vmem:[#allocation2 + $0xea8] sm:$0xff] }
 0x1a9   :  { %5318 = vmatpush1.bf16.msra.mxu0 %v6909_v32  ;;  %v536_v32 = vld [vmem:[#allocation2 + $0xd68] sm:$0xff]  ;;  %v321_v24 = vld [vmem:[#allocation2 + $0x6b0] sm:$0xff] }
 0x1aa   :  { %5319 = vmatprep.subr.bf16.mxu0 %v6918_v34  ;;  %v281_v34 = vld [vmem:[#allocation2 + $0x570] sm:$0xff]  ;;  %v7228_v37 = vcombine.high %v532_v31, %v536_v32  ;;  %v7227_v45 = vcombine.low %v532_v31, %v536_v32  ;;  %v580_v31 = vld [vmem:[#allocation2 + $0xec8] sm:$0xff] }
 0x1ab   :  { %5156 = vmatpush1.bf16.msra.mxu1 %v7171_v42  ;;  %v6974_v40 = vcombine.high %v277_v33, %v281_v34  ;;  %v540_v42 = vld [vmem:[#allocation2 + $0xd88] sm:$0xff]  ;;  %v6973_v46 = vcombine.low %v277_v33, %v281_v34  ;;  %v325_v33 = vld [vmem:[#allocation2 + $0x6d0] sm:$0xff] }
 0x1ac   :  { %5157 = vmatprep.subr.bf16.mxu1 %v7180_v43  ;;  %v285_v43 = vld [vmem:[#allocation2 + $0x590] sm:$0xff]  ;;  %v584_v32 = vld [vmem:[#allocation2 + $0xee8] sm:$0xff] }
 0x1ad   :  { %5320 = vmatpush1.bf16.msra.mxu0 %v6917_v0  ;;  %v544_v0 = vld [vmem:[#allocation2 + $0xda8] sm:$0xff]  ;;  %v329_v34 = vld [vmem:[#allocation2 + $0x6f0] sm:$0xff] }
 0x1ae   :  { %5321 = vmatprep.subr.bf16.mxu0 %v6926_v44  ;;  %v289_v44 = vld [vmem:[#allocation2 + $0x5b0] sm:$0xff]  ;;  %v7236_v19 = vcombine.high %v540_v42, %v544_v0  ;;  %v7235_v56 = vcombine.low %v540_v42, %v544_v0  ;;  %v588_v42 = vld [vmem:[#allocation2 + $0xf08] sm:$0xff] }
 0x1af   :  { %5158 = vmatpush1.bf16.msra.mxu1 %v7179_v22  ;;  %v6982_v22 = vcombine.high %v285_v43, %v289_v44  ;;  %v592_v0 = vld [vmem:[#allocation2 + $0xf28] sm:$0xff] }
 0x1b0   :  { %5168 = vmatprep.subr.bf16.mxu1 %v7188_v50  ;;  %v552_v50 = vld [vmem:[#allocation2 + $0xde8] sm:$0xff] }
 0x1b1   :  { %5322 = vmatpush1.bf16.msra.mxu0 %v6925_v49  ;;  %v548_v49 = vld [vmem:[#allocation2 + $0xdc8] sm:$0xff] }
 0x1b2   :  { %5332 = vmatprep.subr.bf16.mxu0 %v6934_v51  ;;  %5160 = vmatmul.mubr.bf16.vlgmr.msra.gmra.mrb[4].mxu1 %v8331_v21 }
 0x1b3   :  { %5169 = vmatpush1.bf16.msra.mxu1 %v7187_v59  ;;  %5200 = vmatprep.mubr.bf16.mxu1 %v8345_v58 }
 0x1b4   :  { %5324 = vmatmul.mubr.bf16.vlgmr.msra.gmra.mrb[4].mxu0 %v8322_v16  ;;  %5170 = vmatprep.subr.bf16.mxu1 %v7196_v62  ;;  %v7244_v62 = vcombine.high %v548_v49, %v552_v50 }
 0x1b5   :  { %5333 = vmatpush1.bf16.msra.mxu0 %v6933_v60  ;;  %5364 = vmatprep.mubr.bf16.mxu0 %v8340_v29  ;;  %v6981_v60 = vcombine.low %v285_v43, %v289_v44  ;;  %v333_v43 = vld [vmem:[#allocation2 + $0x710] sm:$0xff] }
 0x1b6   :  { %5334 = vmatprep.subr.bf16.mxu0 %v6942_v63  ;;  %v6990_v63 = vcombine.high %v293_v52, %v297_v54  ;;  %v337_v44 = vld [vmem:[#allocation2 + $0x730] sm:$0xff] }
 0x1b7   :  { %5171 = vmatpush1.bf16.msra.mxu1 %v7195_v6  ;;  %v7243_v6 = vcombine.low %v548_v49, %v552_v50  ;;  %v596_v49 = vld [vmem:[#allocation2 + $0xf48] sm:$0xff] }
 0x1b8   :  { %5172 = vmatprep.subr.bf16.mxu1 %v7204_v9  ;;  %v7252_v9 = vcombine.high %v556_v1, %v560_v3  ;;  %v600_v50 = vld [vmem:[#allocation2 + $0xf68] sm:$0xff] }
 0x1b9   :  { %5335 = vmatpush1.bf16.msra.mxu0 %v6941_v7  ;;  %v6989_v7 = vcombine.low %v293_v52, %v297_v54  ;;  %v341_v52 = vld [vmem:[#allocation2 + $0x750] sm:$0xff] }
 0x1ba   :  { %5336 = vmatprep.subr.bf16.mxu0 %v6950_v10  ;;  %v6998_v10 = vcombine.high %v301_v4, %v305_v5  ;;  %v345_v54 = vld [vmem:[#allocation2 + $0x770] sm:$0xff] }
 0x1bb   :  { %5173 = vmatpush1.bf16.msra.mxu1 %v7203_v14  ;;  %v7251_v14 = vcombine.low %v556_v1, %v560_v3  ;;  %v349_v1 = vld [vmem:[#allocation2 + $0x790] sm:$0xff] }
 0x1bc   :  { %5174 = vmatprep.subr.bf16.mxu1 %v7212_v17  ;;  %v7260_v17 = vcombine.high %v564_v38, %v568_v11  ;;  %v353_v3 = vld [vmem:[#allocation2 + $0x7b0] sm:$0xff] }
 0x1bd   :  { %5337 = vmatpush1.bf16.msra.mxu0 %v6949_v15  ;;  %v6997_v15 = vcombine.low %v301_v4, %v305_v5  ;;  %v7291_v4 = vcombine.low %v596_v49, %v600_v50  ;;  %v7037_v5 = vcombine.low %v341_v52, %v345_v54 }
 0x1be   :  { %5338 = vmatprep.subr.bf16.mxu0 %v6958_v18  ;;  %v7006_v18 = vcombine.high %v309_v12, %v313_v13 }
 0x1bf   :  { %5175 = vmatpush1.bf16.msra.mxu1 %v7211_v25  ;;  %v7259_v25 = vcombine.low %v564_v38, %v568_v11  ;;  %v357_v38 = vld [vmem:[#allocation2 + $0x7d0] sm:$0xff] }
 0x1c0   :  { %5176 = vmatprep.subr.bf16.mxu1 %v7220_v27  ;;  %v7268_v27 = vcombine.high %v572_v20, %v576_v53  ;;  %v361_v11 = vld [vmem:[#allocation2 + $0x7f0] sm:$0xff] }
 0x1c1   :  { %5339 = vmatpush1.bf16.msra.mxu0 %v6957_v26  ;;  %v7005_v26 = vcombine.low %v309_v12, %v313_v13  ;;  %v7045_v13 = vcombine.low %v349_v1, %v353_v3 }
 0x1c2   :  { %5340 = vmatprep.subr.bf16.mxu0 %v6966_v28  ;;  %v7014_v28 = vcombine.high %v317_v23, %v321_v24 }
 0x1c3   :  { %5177 = vmatpush1.bf16.msra.mxu1 %v7219_v35  ;;  %v7267_v35 = vcombine.low %v572_v20, %v576_v53  ;;  %v365_v20 = vld [vmem:[#allocation2 + $0x810] sm:$0xff] }
 0x1c4   :  { %5178 = vmatprep.subr.bf16.mxu1 %v7228_v37  ;;  %v7276_v37 = vcombine.high %v580_v31, %v584_v32  ;;  %v369_v53 = vld [vmem:[#allocation2 + $0x830] sm:$0xff] }
 0x1c5   :  { %5341 = vmatpush1.bf16.msra.mxu0 %v6965_v36  ;;  %v8400_v48 = vpop.f32.mrb[0].mxu1  ;;  %v7013_v36 = vcombine.low %v317_v23, %v321_v24  ;;  %v7053_v24 = vcombine.low %v357_v38, %v361_v11 }
 0x1c6   :  { %5342 = vmatprep.subr.bf16.mxu0 %v6974_v40  ;;  %v8402_v51 = vpop.f32.mrb[1].mxu1  ;;  %v7022_v40 = vcombine.high %v325_v33, %v329_v34 }
 0x1c7   :  { %v4878_v55 = vpop.f32.mrb[2].mxu1  ;;  %5179 = vmatpush1.bf16.msra.mxu1 %v7227_v45  ;;  %v7275_v45 = vcombine.low %v580_v31, %v584_v32  ;;  %v373_v31 = vld [vmem:[#allocation2 + $0x850] sm:$0xff] }
 0x1c8   :  { %v4879_v59 = vpop.f32.mrb[3].mxu1  ;;  %5180 = vmatprep.subr.bf16.mxu1 %v7236_v19  ;;  %v7284_v19 = vcombine.high %v588_v42, %v592_v0  ;;  %v7283_v55 = vcombine.low %v588_v42, %v592_v0  ;;  %v377_v32 = vld [vmem:[#allocation2 + $0x870] sm:$0xff] }
 0x1c9   :  { %5343 = vmatpush1.bf16.msra.mxu0 %v6973_v46  ;;  %v7021_v46 = vcombine.low %v325_v33, %v329_v34  ;;  %v7292_v59 = vcombine.high %v596_v49, %v600_v50  ;;  %v7061_v34 = vcombine.low %v365_v20, %v369_v53  ;;  %v381_v42 = vld [vmem:[#allocation2 + $0x890] sm:$0xff] }
 0x1ca   :  { %5344 = vmatprep.subr.bf16.mxu0 %v6982_v22  ;;  %v7030_v22 = vcombine.high %v333_v43, %v337_v44  ;;  %v385_v0 = vld [vmem:[#allocation2 + $0x8b0] sm:$0xff] }
 0x1cb   :  { %5181 = vmatpush1.bf16.msra.mxu1 %v7235_v56  ;;  %v7029_v56 = vcombine.low %v333_v43, %v337_v44  ;;  %v7069_v44 = vcombine.low %v373_v31, %v377_v32  ;;  %v389_v49 = vld [vmem:[#allocation2 + $0x8d0] sm:$0xff] }
 0x1cc   :  { %5182 = vmatprep.subr.bf16.mxu1 %v7244_v62  ;;  %v604_v62 = vld [vmem:[#allocation2 + $0xf88] sm:$0xff]  ;;  %v393_v50 = vld [vmem:[#allocation2 + $0x8f0] sm:$0xff] }
 0x1cd   :  { %5345 = vmatpush1.bf16.msra.mxu0 %v6981_v60  ;;  %v7038_v60 = vcombine.high %v341_v52, %v345_v54  ;;  %v7077_v54 = vcombine.low %v381_v42, %v385_v0 }
 0x1ce   :  { %5346 = vmatprep.subr.bf16.mxu0 %v6990_v63  ;;  %v608_v63 = vld [vmem:[#allocation2 + $0xfa8] sm:$0xff] }
 0x1cf   :  { %5183 = vmatpush1.bf16.msra.mxu1 %v7243_v6  ;;  %v7300_v6 = vcombine.high %v604_v62, %v608_v63  ;;  %v7299_v12 = vcombine.low %v604_v62, %v608_v63  ;;  %v397_v62 = vld [vmem:[#allocation2 + $0x910] sm:$0xff] }
 0x1d0   :  { %5184 = vmatprep.subr.bf16.mxu1 %v7252_v9  ;;  %v612_v9 = vld [vmem:[#allocation2 + $0xfc8] sm:$0xff]  ;;  %v401_v63 = vld [vmem:[#allocation2 + $0x930] sm:$0xff] }
 0x1d1   :  { %5347 = vmatpush1.bf16.msra.mxu0 %v6989_v7  ;;  %v7046_v7 = vcombine.high %v349_v1, %v353_v3  ;;  %v7085_v3 = vcombine.low %v389_v49, %v393_v50 }
 0x1d2   :  { %5348 = vmatprep.subr.bf16.mxu0 %v6998_v10  ;;  %v616_v10 = vld [vmem:[#allocation2 + $0xfe8] sm:$0xff] }
 0x1d3   :  { %5185 = vmatpush1.bf16.msra.mxu1 %v7251_v14  ;;  %v7308_v14 = vcombine.high %v612_v9, %v616_v10  ;;  %v7307_v23 = vcombine.low %v612_v9, %v616_v10  ;;  %v405_v9 = vld [vmem:[#allocation2 + $0x950] sm:$0xff] }
 0x1d4   :  { %5186 = vmatprep.subr.bf16.mxu1 %v7260_v17  ;;  %v620_v17 = vld [vmem:[#allocation2 + $0x1008] sm:$0xff]  ;;  %v409_v10 = vld [vmem:[#allocation2 + $0x970] sm:$0xff] }
 0x1d5   :  { %5349 = vmatpush1.bf16.msra.mxu0 %v6997_v15  ;;  %v7054_v15 = vcombine.high %v357_v38, %v361_v11  ;;  %v7093_v11 = vcombine.low %v397_v62, %v401_v63 }
 0x1d6   :  { %5350 = vmatprep.subr.bf16.mxu0 %v7006_v18  ;;  %v624_v18 = vld [vmem:[#allocation2 + $0x1028] sm:$0xff] }
 0x1d7   :  { %5187 = vmatpush1.bf16.msra.mxu1 %v7259_v25  ;;  %v7316_v25 = vcombine.high %v620_v17, %v624_v18  ;;  %v7315_v33 = vcombine.low %v620_v17, %v624_v18  ;;  %v413_v17 = vld [vmem:[#allocation2 + $0x990] sm:$0xff] }
 0x1d8   :  { %5188 = vmatprep.subr.bf16.mxu1 %v7268_v27  ;;  %v628_v27 = vld [vmem:[#allocation2 + $0x1048] sm:$0xff]  ;;  %v417_v18 = vld [vmem:[#allocation2 + $0x9b0] sm:$0xff] }
 0x1d9   :  { %5351 = vmatpush1.bf16.msra.mxu0 %v7005_v26  ;;  %v7062_v26 = vcombine.high %v365_v20, %v369_v53  ;;  %v7101_v53 = vcombine.low %v405_v9, %v409_v10 }
 0x1da   :  { %5352 = vmatprep.subr.bf16.mxu0 %v7014_v28  ;;  %v632_v28 = vld [vmem:[#allocation2 + $0x1068] sm:$0xff] }
 0x1db   :  { %5189 = vmatpush1.bf16.msra.mxu1 %v7267_v35  ;;  %v7324_v35 = vcombine.high %v628_v27, %v632_v28  ;;  %v7323_v43 = vcombine.low %v628_v27, %v632_v28  ;;  %v421_v27 = vld [vmem:[#allocation2 + $0x9d0] sm:$0xff] }
 0x1dc   :  { %5190 = vmatprep.subr.bf16.mxu1 %v7276_v37  ;;  %v636_v37 = vld [vmem:[#allocation2 + $0x1088] sm:$0xff]  ;;  %v425_v28 = vld [vmem:[#allocation2 + $0x9f0] sm:$0xff] }
 0x1dd   :  { %5353 = vmatpush1.bf16.msra.mxu0 %v7013_v36  ;;  %v7070_v36 = vcombine.high %v373_v31, %v377_v32  ;;  %v7109_v32 = vcombine.low %v413_v17, %v417_v18 }
 0x1de   :  { %5354 = vmatprep.subr.bf16.mxu0 %v7022_v40  ;;  %v640_v40 = vld [vmem:[#allocation2 + $0x10a8] sm:$0xff] }
 0x1df   :  { %5191 = vmatpush1.bf16.msra.mxu1 %v7275_v45  ;;  %v7332_v45 = vcombine.high %v636_v37, %v640_v40  ;;  %v7331_v52 = vcombine.low %v636_v37, %v640_v40  ;;  %v429_v37 = vld [vmem:[#allocation2 + $0xa10] sm:$0xff] }
 0x1e0   :  { %5192 = vmatprep.subr.bf16.mxu1 %v7284_v19  ;;  %v644_v19 = vld [vmem:[#allocation2 + $0x10c8] sm:$0xff]  ;;  %v433_v40 = vld [vmem:[#allocation2 + $0xa30] sm:$0xff] }
 0x1e1   :  { %5355 = vmatpush1.bf16.msra.mxu0 %v7021_v46  ;;  %v7078_v46 = vcombine.high %v381_v42, %v385_v0  ;;  %v7117_v0 = vcombine.low %v421_v27, %v425_v28 }
 0x1e2   :  { %5356 = vmatprep.subr.bf16.mxu0 %v7030_v22  ;;  %v648_v22 = vld [vmem:[#allocation2 + $0x10e8] sm:$0xff] }
 0x1e3   :  { %5193 = vmatpush1.bf16.msra.mxu1 %v7283_v55  ;;  %v7340_v55 = vcombine.high %v644_v19, %v648_v22  ;;  %v7339_v1 = vcombine.low %v644_v19, %v648_v22  ;;  %v437_v19 = vld [vmem:[#allocation2 + $0xa50] sm:$0xff] }
 0x1e4   :  { %5194 = vmatprep.subr.bf16.mxu1 %v7292_v59  ;;  %v652_v59 = vld [vmem:[#allocation2 + $0x1108] sm:$0xff]  ;;  %v441_v22 = vld [vmem:[#allocation2 + $0xa70] sm:$0xff] }
 0x1e5   :  { %5357 = vmatpush1.bf16.msra.mxu0 %v7029_v56  ;;  %v7086_v56 = vcombine.high %v389_v49, %v393_v50  ;;  %v7125_v50 = vcombine.low %v429_v37, %v433_v40 }
 0x1e6   :  { %5358 = vmatprep.subr.bf16.mxu0 %v7038_v60  ;;  %v656_v60 = vld [vmem:[#allocation2 + $0x1128] sm:$0xff] }
 0x1e7   :  { %5195 = vmatpush1.bf16.msra.mxu1 %v7291_v4  ;;  %v7348_v4 = vcombine.high %v652_v59, %v656_v60  ;;  %v7347_v38 = vcombine.low %v652_v59, %v656_v60  ;;  %v445_v59 = vld [vmem:[#allocation2 + $0xa90] sm:$0xff] }
 0x1e8   :  { %5196 = vmatprep.subr.bf16.mxu1 %v7300_v6  ;;  %v660_v6 = vld [vmem:[#allocation2 + $0x1148] sm:$0xff]  ;;  %v449_v60 = vld [vmem:[#allocation2 + $0xab0] sm:$0xff] }
 0x1e9   :  { %5359 = vmatpush1.bf16.msra.mxu0 %v7037_v5  ;;  %v7094_v5 = vcombine.high %v397_v62, %v401_v63  ;;  %v7133_v63 = vcombine.low %v437_v19, %v441_v22 }
 0x1ea   :  { %5360 = vmatprep.subr.bf16.mxu0 %v7046_v7  ;;  %v664_v7 = vld [vmem:[#allocation2 + $0x1168] sm:$0xff] }
 0x1eb   :  { %5197 = vmatpush1.bf16.msra.mxu1 %v7299_v12  ;;  %v7356_v12 = vcombine.high %v660_v6, %v664_v7  ;;  %v7355_v20 = vcombine.low %v660_v6, %v664_v7  ;;  %v453_v6 = vld [vmem:[#allocation2 + $0xad0] sm:$0xff] }
 0x1ec   :  { %5198 = vmatprep.subr.bf16.mxu1 %v7308_v14  ;;  %v668_v14 = vld [vmem:[#allocation2 + $0x1188] sm:$0xff]  ;;  %v457_v7 = vld [vmem:[#allocation2 + $0xaf0] sm:$0xff] }
 0x1ed   :  { %5361 = vmatpush1.bf16.msra.mxu0 %v7045_v13  ;;  %v7102_v13 = vcombine.high %v405_v9, %v409_v10  ;;  %v7141_v10 = vcombine.low %v445_v59, %v449_v60 }
 0x1ee   :  { %5362 = vmatprep.subr.bf16.mxu0 %v7054_v15  ;;  %v672_v15 = vld [vmem:[#allocation2 + $0x11a8] sm:$0xff] }
 0x1ef   :  { %5199 = vmatpush1.bf16.msra.mxu1 %v7307_v23  ;;  %v7364_v23 = vcombine.high %v668_v14, %v672_v15  ;;  %v7363_v31 = vcombine.low %v668_v14, %v672_v15  ;;  %v461_v14 = vld [vmem:[#allocation2 + $0xb10] sm:$0xff] }
 0x1f0   :  { %5209 = vmatprep.subr.bf16.mxu1 %v7316_v25  ;;  %v676_v25 = vld [vmem:[#allocation2 + $0x11c8] sm:$0xff]  ;;  %v465_v15 = vld [vmem:[#allocation2 + $0xb30] sm:$0xff] }
 0x1f1   :  { %5363 = vmatpush1.bf16.msra.mxu0 %v7053_v24  ;;  %v7110_v24 = vcombine.high %v413_v17, %v417_v18  ;;  %v7149_v18 = vcombine.low %v453_v6, %v457_v7 }
 0x1f2   :  { %5373 = vmatprep.subr.bf16.mxu0 %v7062_v26  ;;  %5201 = vmatmul.mubr.bf16.vlgmr.msra.gmra.mrb[4].mxu1 %v8361_v41  ;;  %v680_v26 = vld [vmem:[#allocation2 + $0x11e8] sm:$0xff] }
 0x1f3   :  { %5210 = vmatpush1.bf16.msra.mxu1 %v7315_v33  ;;  %5241 = vmatprep.mubr.bf16.mxu1 %v8365_v47  ;;  %v7372_v33 = vcombine.high %v676_v25, %v680_v26  ;;  %v7371_v42 = vcombine.low %v676_v25, %v680_v26  ;;  %v469_v25 = vld [vmem:[#allocation2 + $0xb50] sm:$0xff] }
 0x1f4   :  { %5365 = vmatmul.mubr.bf16.vlgmr.msra.gmra.mrb[4].mxu0 %v8357_v39  ;;  %5211 = vmatprep.subr.bf16.mxu1 %v7324_v35  ;;  %v684_v35 = vld [vmem:[#allocation2 + $0x1208] sm:$0xff]  ;;  %v473_v26 = vld [vmem:[#allocation2 + $0xb70] sm:$0xff] }
 0x1f5   :  { %5374 = vmatpush1.bf16.msra.mxu0 %v7061_v34  ;;  %5405 = vmatprep.mubr.bf16.mxu0 %v8316_v61  ;;  %v7118_v34 = vcombine.high %v421_v27, %v425_v28  ;;  %v7157_v28 = vcombine.low %v461_v14, %v465_v15 }
 0x1f6   :  { %5375 = vmatprep.subr.bf16.mxu0 %v7070_v36  ;;  %v688_v36 = vld [vmem:[#allocation2 + $0x1228] sm:$0xff] }
 0x1f7   :  { %5212 = vmatpush1.bf16.msra.mxu1 %v7323_v43  ;;  %v7380_v43 = vcombine.high %v684_v35, %v688_v36  ;;  %v7379_v49 = vcombine.low %v684_v35, %v688_v36  ;;  %v477_v35 = vld [vmem:[#allocation2 + $0xb90] sm:$0xff] }
 0x1f8   :  { %5213 = vmatprep.subr.bf16.mxu1 %v7332_v45  ;;  %v692_v45 = vld [vmem:[#allocation2 + $0x1248] sm:$0xff]  ;;  %v481_v36 = vld [vmem:[#allocation2 + $0xbb0] sm:$0xff] }
 0x1f9   :  { %5376 = vmatpush1.bf16.msra.mxu0 %v7069_v44  ;;  %v7126_v44 = vcombine.high %v429_v37, %v433_v40  ;;  %v7165_v40 = vcombine.low %v469_v25, %v473_v26 }
 0x1fa   :  { %5377 = vmatprep.subr.bf16.mxu0 %v7078_v46  ;;  %v696_v46 = vld [vmem:[#allocation2 + $0x1268] sm:$0xff] }
 0x1fb   :  { %5214 = vmatpush1.bf16.msra.mxu1 %v7331_v52  ;;  %v7388_v52 = vcombine.high %v692_v45, %v696_v46  ;;  %v7387_v62 = vcombine.low %v692_v45, %v696_v46  ;;  %v485_v45 = vld [vmem:[#allocation2 + $0xbd0] sm:$0xff] }
 0x1fc   :  { %5215 = vmatprep.subr.bf16.mxu1 %v7340_v55  ;;  %v700_v55 = vld [vmem:[#allocation2 + $0x1288] sm:$0xff]  ;;  %v489_v46 = vld [vmem:[#allocation2 + $0xbf0] sm:$0xff] }
 0x1fd   :  { %5378 = vmatpush1.bf16.msra.mxu0 %v7077_v54  ;;  %v7134_v54 = vcombine.high %v437_v19, %v441_v22  ;;  %v7173_v22 = vcombine.low %v477_v35, %v481_v36 }
 0x1fe   :  { %5379 = vmatprep.subr.bf16.mxu0 %v7086_v56  ;;  %v704_v56 = vld [vmem:[#allocation2 + $0x12a8] sm:$0xff] }
 0x1ff   :  { %5216 = vmatpush1.bf16.msra.mxu1 %v7339_v1  ;;  %v7396_v1 = vcombine.high %v700_v55, %v704_v56  ;;  %v7395_v9 = vcombine.low %v700_v55, %v704_v56  ;;  %v493_v55 = vld [vmem:[#allocation2 + $0xc10] sm:$0xff] }
 0x200   :  { %5217 = vmatprep.subr.bf16.mxu1 %v7348_v4  ;;  %v708_v4 = vld [vmem:[#allocation2 + $0x12c8] sm:$0xff]  ;;  %v497_v56 = vld [vmem:[#allocation2 + $0xc30] sm:$0xff] }
 0x201   :  { %5380 = vmatpush1.bf16.msra.mxu0 %v7085_v3  ;;  %v7142_v3 = vcombine.high %v445_v59, %v449_v60  ;;  %v7181_v60 = vcombine.low %v485_v45, %v489_v46 }
 0x202   :  { %5381 = vmatprep.subr.bf16.mxu0 %v7094_v5  ;;  %v712_v5 = vld [vmem:[#allocation2 + $0x12e8] sm:$0xff] }
 0x203   :  { %5218 = vmatpush1.bf16.msra.mxu1 %v7347_v38  ;;  %v7404_v38 = vcombine.high %v708_v4, %v712_v5  ;;  %v7403_v17 = vcombine.low %v708_v4, %v712_v5  ;;  %v501_v4 = vld [vmem:[#allocation2 + $0xc50] sm:$0xff] }
 0x204   :  { %5219 = vmatprep.subr.bf16.mxu1 %v7356_v12  ;;  %v716_v12 = vld [vmem:[#allocation2 + $0x1308] sm:$0xff]  ;;  %v505_v5 = vld [vmem:[#allocation2 + $0xc70] sm:$0xff] }
 0x205   :  { %5382 = vmatpush1.bf16.msra.mxu0 %v7093_v11  ;;  %v7150_v11 = vcombine.high %v453_v6, %v457_v7  ;;  %v7189_v7 = vcombine.low %v493_v55, %v497_v56 }
 0x206   :  { %5383 = vmatprep.subr.bf16.mxu0 %v7102_v13  ;;  %v720_v13 = vld [vmem:[#allocation2 + $0x1328] sm:$0xff] }
 0x207   :  { %5220 = vmatpush1.bf16.msra.mxu1 %v7355_v20  ;;  %v7412_v20 = vcombine.high %v716_v12, %v720_v13  ;;  %v7411_v27 = vcombine.low %v716_v12, %v720_v13  ;;  %v509_v12 = vld [vmem:[#allocation2 + $0xc90] sm:$0xff] }
 0x208   :  { %5221 = vmatprep.subr.bf16.mxu1 %v7364_v23  ;;  %v724_v23 = vld [vmem:[#allocation2 + $0x1348] sm:$0xff]  ;;  %v513_v13 = vld [vmem:[#allocation2 + $0xcb0] sm:$0xff] }
 0x209   :  { %5384 = vmatpush1.bf16.msra.mxu0 %v7101_v53  ;;  %v7158_v53 = vcombine.high %v461_v14, %v465_v15  ;;  %v7197_v15 = vcombine.low %v501_v4, %v505_v5 }
 0x20a   :  { %5385 = vmatprep.subr.bf16.mxu0 %v7110_v24  ;;  %v728_v24 = vld [vmem:[#allocation2 + $0x1368] sm:$0xff] }
 0x20b   :  { %5222 = vmatpush1.bf16.msra.mxu1 %v7363_v31  ;;  %v7420_v31 = vcombine.high %v724_v23, %v728_v24  ;;  %v7419_v37 = vcombine.low %v724_v23, %v728_v24  ;;  %v776_v23 = vld [vmem:[#allocation2 + $0x14e8] sm:$0xff]  ;;  %v517_v24 = vld [vmem:[#allocation2 + $0xcd0] sm:$0xff] }
 0x20c   :  { %5223 = vmatprep.subr.bf16.mxu1 %v7372_v33  ;;  %v732_v33 = vld [vmem:[#allocation2 + $0x1388] sm:$0xff] }
 0x20d   :  { %5386 = vmatpush1.bf16.msra.mxu0 %v7109_v32  ;;  %v7166_v32 = vcombine.high %v469_v25, %v473_v26  ;;  %v521_v25 = vld [vmem:[#allocation2 + $0xcf0] sm:$0xff] }
 0x20e   :  { %5387 = vmatprep.subr.bf16.mxu0 %v7118_v34  ;;  %v736_v34 = vld [vmem:[#allocation2 + $0x13a8] sm:$0xff] }
 0x20f   :  { %5224 = vmatpush1.bf16.msra.mxu1 %v7371_v42  ;;  %v7428_v42 = vcombine.high %v732_v33, %v736_v34  ;;  %v7427_v19 = vcombine.low %v732_v33, %v736_v34  ;;  %v780_v33 = vld [vmem:[#allocation2 + $0x1508] sm:$0xff] }
 0x210   :  { %5225 = vmatprep.subr.bf16.mxu1 %v7380_v43  ;;  %v740_v43 = vld [vmem:[#allocation2 + $0x13c8] sm:$0xff] }
 0x211   :  { %5388 = vmatpush1.bf16.msra.mxu0 %v7117_v0  ;;  %v7174_v0 = vcombine.high %v477_v35, %v481_v36  ;;  %v784_v34 = vld [vmem:[#allocation2 + $0x1528] sm:$0xff]  ;;  %v525_v35 = vld [vmem:[#allocation2 + $0xd10] sm:$0xff] }
 0x212   :  { %5389 = vmatprep.subr.bf16.mxu0 %v7126_v44  ;;  %v744_v44 = vld [vmem:[#allocation2 + $0x13e8] sm:$0xff]  ;;  %v529_v36 = vld [vmem:[#allocation2 + $0xd30] sm:$0xff] }
 0x213   :  { %5226 = vmatpush1.bf16.msra.mxu1 %v7379_v49  ;;  %v7436_v49 = vcombine.high %v740_v43, %v744_v44  ;;  %v7435_v59 = vcombine.low %v740_v43, %v744_v44  ;;  %v7222_v43 = vcombine.high %v525_v35, %v529_v36  ;;  %v788_v44 = vld [vmem:[#allocation2 + $0x1548] sm:$0xff] }
 0x214   :  { %5227 = vmatprep.subr.bf16.mxu1 %v7388_v52  ;;  %v748_v52 = vld [vmem:[#allocation2 + $0x1408] sm:$0xff] }
 0x215   :  { %5390 = vmatpush1.bf16.msra.mxu0 %v7125_v50  ;;  %v7182_v50 = vcombine.high %v485_v45, %v489_v46  ;;  %v792_v45 = vld [vmem:[#allocation2 + $0x1568] sm:$0xff]  ;;  %v875_v46 = vld [vmem:[#allocation5] sm:$0xff] }
 0x216   :  { %5391 = vmatprep.subr.bf16.mxu0 %v7134_v54  ;;  %v752_v54 = vld [vmem:[#allocation2 + $0x1428] sm:$0xff] }
 0x217   :  { %5228 = vmatpush1.bf16.msra.mxu1 %v7387_v62  ;;  %v7444_v62 = vcombine.high %v748_v52, %v752_v54  ;;  %v7443_v6 = vcombine.low %v748_v52, %v752_v54  ;;  %v7221_v52 = vcombine.low %v525_v35, %v529_v36  ;;  %v7484_v54 = vcombine.high %v788_v44, %v792_v45  ;;  %v820_v35 = vld [vmem:[#allocation2 + $0x1648] sm:$0xff] }
 0x218   :  { %5229 = vmatprep.subr.bf16.mxu1 %v7396_v1  ;;  %v756_v1 = vld [vmem:[#allocation2 + $0x1448] sm:$0xff] }
 0x219   :  { %5392 = vmatpush1.bf16.msra.mxu0 %v7133_v63  ;;  %v7190_v63 = vcombine.high %v493_v55, %v497_v56  ;;  %v824_v36 = vld [vmem:[#allocation2 + $0x1668] sm:$0xff] }
 0x21a   :  { %5393 = vmatprep.subr.bf16.mxu0 %v7142_v3  ;;  %v760_v3 = vld [vmem:[#allocation2 + $0x1468] sm:$0xff] }
 0x21b   :  { %5230 = vmatpush1.bf16.msra.mxu1 %v7395_v9  ;;  %v7452_v9 = vcombine.high %v756_v1, %v760_v3  ;;  %v7451_v14 = vcombine.low %v756_v1, %v760_v3  ;;  %v545_v1 = vld [vmem:[#allocation2 + $0xdb0] sm:$0xff]  ;;  %v7483_v3 = vcombine.low %v788_v44, %v792_v45  ;;  %v7516_v44 = vcombine.high %v820_v35, %v824_v36 }
 0x21c   :  { %5231 = vmatprep.subr.bf16.mxu1 %v7404_v38  ;;  %v764_v38 = vld [vmem:[#allocation2 + $0x1488] sm:$0xff] }
 0x21d   :  { %5394 = vmatpush1.bf16.msra.mxu0 %v7141_v10  ;;  %v7198_v10 = vcombine.high %v501_v4, %v505_v5 }
 0x21e   :  { %5395 = vmatprep.subr.bf16.mxu0 %v7150_v11  ;;  %v768_v11 = vld [vmem:[#allocation2 + $0x14a8] sm:$0xff] }
 0x21f   :  { %5232 = vmatpush1.bf16.msra.mxu1 %v7403_v17  ;;  %v7460_v17 = vcombine.high %v764_v38, %v768_v11  ;;  %v7459_v26 = vcombine.low %v764_v38, %v768_v11 }
 0x220   :  { %5233 = vmatprep.subr.bf16.mxu1 %v7412_v20  ;;  %v7206_v20 = vcombine.high %v509_v12, %v513_v13 }
 0x221   :  { %5396 = vmatpush1.bf16.msra.mxu0 %v7149_v18  ;;  %v877_v18 = vlaneseq }
 0x222   :  { %5397 = vmatprep.subr.bf16.mxu0 %v7158_v53  ;;  %v772_v53 = vld [vmem:[#allocation2 + $0x14c8] sm:$0xff] }
 0x223   :  { %5234 = vmatpush1.bf16.msra.mxu1 %v7411_v27  ;;  %v7205_v27 = vcombine.low %v509_v12, %v513_v13  ;;  %v549_v12 = vld [vmem:[#allocation2 + $0xdd0] sm:$0xff] }
 0x224   :  { %5235 = vmatprep.subr.bf16.mxu1 %v7420_v31  ;;  %v8412_v31 = vshrl.u32 %v877_v18, 7  ;;  %v553_v13 = vld [vmem:[#allocation2 + $0xdf0] sm:$0xff] }
 0x225   :  { %5398 = vmatpush1.bf16.msra.mxu0 %v7157_v28  ;;  %v7468_v28 = vcombine.high %v772_v53, %v776_v23 }
 0x226   :  { %5399 = vmatprep.subr.bf16.mxu0 %v7166_v32  ;;  %v7214_v32 = vcombine.high %v517_v24, %v521_v25 }
 0x227   :  { %5236 = vmatpush1.bf16.msra.mxu1 %v7419_v37  ;;  %v7467_v37 = vcombine.low %v772_v53, %v776_v23 }
 0x228   :  { %5237 = vmatprep.subr.bf16.mxu1 %v7428_v42  ;;  %v7476_v42 = vcombine.high %v780_v33, %v784_v34 }
 0x229   :  { %5400 = vmatpush1.bf16.msra.mxu0 %v7165_v40  ;;  %v7213_v40 = vcombine.low %v517_v24, %v521_v25  ;;  %v7246_v24 = vcombine.high %v549_v12, %v553_v13  ;;  %v812_v25 = vld [vmem:[#allocation2 + $0x1608] sm:$0xff] }
 0x22a   :  { %5401 = vmatprep.subr.bf16.mxu0 %v7174_v0  ;;  %v8415_v0 = vsub.s32 0, %v8412_v31 }
 0x22b   :  { %5238 = vmatpush1.bf16.msra.mxu1 %v7427_v19  ;;  %v8418_v19 = vsub.s32 1, %v8412_v31 }
 0x22c   :  { %5239 = vmatprep.subr.bf16.mxu1 %v7436_v49  ;;  %v537_v49 = vld [vmem:[#allocation2 + $0xd70] sm:$0xff]  ;;  %v880_v55 = vrot.slane %v875_v46, %v8415_v0 }
 0x22d   :  { %5402 = vmatpush1.bf16.msra.mxu0 %v7173_v22  ;;  %v533_v22 = vld [vmem:[#allocation2 + $0xd50] sm:$0xff] }
 0x22e   :  { %5403 = vmatprep.subr.bf16.mxu0 %v7182_v50  ;;  %v7475_v50 = vcombine.low %v780_v33, %v784_v34  ;;  %v7230_v56 = vcombine.high %v533_v22, %v537_v49  ;;  %v7229_v4 = vcombine.low %v533_v22, %v537_v49  ;;  %v832_v22 = vld [vmem:[#allocation2 + $0x16a8] sm:$0xff]  ;;  %v573_v49 = vld [vmem:[#allocation2 + $0xe90] sm:$0xff] }
 0x22f   :  { %5240 = vmatpush1.bf16.msra.mxu1 %v7435_v59  ;;  %v796_v59 = vld [vmem:[#allocation2 + $0x1588] sm:$0xff] }
 0x230   :  { %5250 = vmatprep.subr.bf16.mxu1 %v7444_v62  ;;  %v884_v62 = vrot.slane %v875_v46, %v8418_v19  ;;  %v828_v46 = vld [vmem:[#allocation2 + $0x1688] sm:$0xff] }
 0x231   :  { %5404 = vmatpush1.bf16.msra.mxu0 %v7181_v60  ;;  %v800_v60 = vld [vmem:[#allocation2 + $0x15a8] sm:$0xff] }
 0x232   :  { %5414 = vmatprep.subr.bf16.mxu0 %v7190_v63  ;;  %5242 = vmatmul.mubr.bf16.vlgmr.msra.gmra.mrb[4].mxu1 %v8378_v2  ;;  %v541_v63 = vld [vmem:[#allocation2 + $0xd90] sm:$0xff]  ;;  %v7492_v5 = vcombine.high %v796_v59, %v800_v60  ;;  %v7699_v38 = vadd.f32 %v8402_v51, %v884_v62  ;;  %v816_v51 = vld [vmem:[#allocation2 + $0x1628] sm:$0xff] }
 0x233   :  { %5251 = vmatpush1.bf16.msra.mxu1 %v7443_v6  ;;  %5282 = vmatprep.mubr.bf16.mxu1 %v8382_v8  ;;  %v7697_v6 = vadd.f32 %v8400_v48, %v880_v55  ;;  %v7237_v48 = vcombine.low %v541_v63, %v545_v1  ;;  %v7508_v33 = vcombine.high %v812_v25, %v816_v51  ;;  %v581_v62 = vld [vmem:[#allocation2 + $0xed0] sm:$0xff] }
 0x234   :  { %5406 = vmatmul.mubr.bf16.vlgmr.msra.gmra.mrb[4].mxu0 %v8331_v21  ;;  %5252 = vmatprep.subr.bf16.mxu1 %v7452_v9  ;;  %v804_v9 = vld [vmem:[#allocation2 + $0x15c8] sm:$0xff]  ;;  %v7524_v55 = vcombine.high %v828_v46, %v832_v22 }
 0x235   :  { %5415 = vmatpush1.bf16.msra.mxu0 %v7189_v7  ;;  %5446 = vmatprep.mubr.bf16.mxu0 %v8345_v58  ;;  %v7238_v7 = vcombine.high %v541_v63, %v545_v1  ;;  %v585_v63 = vld [vmem:[#allocation2 + $0xef0] sm:$0xff]  ;;  %v7523_v1 = vcombine.low %v828_v46, %v832_v22  ;;  %v110_v22 = vld [vmem:[#allocation2 + $0x18] sm:$0xff] }
 0x236   :  { %5416 = vmatprep.subr.bf16.mxu0 %v7198_v10  ;;  %v808_v10 = vld [vmem:[#allocation2 + $0x15e8] sm:$0xff] }
 0x237   :  { %5253 = vmatpush1.bf16.msra.mxu1 %v7451_v14  ;;  %v7500_v53 = vcombine.high %v804_v9, %v808_v10 }
 0x238   :  { %5254 = vmatprep.subr.bf16.mxu1 %v7460_v17  ;;  %v7491_v17 = vcombine.low %v796_v59, %v800_v60  ;;  %v836_v59 = vld [vmem:[#allocation2 + $0x16c8] sm:$0xff] }
 0x239   :  { %5417 = vmatpush1.bf16.msra.mxu0 %v7197_v15  ;;  %v840_v60 = vld [vmem:[#allocation2 + $0x16e8] sm:$0xff] }
 0x23a   :  { %5418 = vmatprep.subr.bf16.mxu0 %v7206_v20 }
 0x23b   :  { %5255 = vmatpush1.bf16.msra.mxu1 %v7459_v26  ;;  %v557_v26 = vld [vmem:[#allocation2 + $0xe10] sm:$0xff] }
 0x23c   :  { %5256 = vmatprep.subr.bf16.mxu1 %v7468_v28  ;;  %v7499_v28 = vcombine.low %v804_v9, %v808_v10  ;;  %v589_v9 = vld [vmem:[#allocation2 + $0xf10] sm:$0xff] }
 0x23d   :  { %5419 = vmatpush1.bf16.msra.mxu0 %v7205_v27  ;;  %v561_v27 = vld [vmem:[#allocation2 + $0xe30] sm:$0xff] }
 0x23e   :  { %5420 = vmatprep.subr.bf16.mxu0 %v7214_v32  ;;  %v7245_v32 = vcombine.low %v549_v12, %v553_v13  ;;  %v7254_v34 = vcombine.high %v557_v26, %v561_v27  ;;  %v593_v10 = vld [vmem:[#allocation2 + $0xf30] sm:$0xff] }
 0x23f   :  { %5257 = vmatpush1.bf16.msra.mxu1 %v7467_v37  ;;  %v565_v37 = vld [vmem:[#allocation2 + $0xe50] sm:$0xff]  ;;  %v7286_v13 = vcombine.high %v589_v9, %v593_v10 }
 0x240   :  { %5258 = vmatprep.subr.bf16.mxu1 %v7476_v42  ;;  %v7507_v42 = vcombine.low %v812_v25, %v816_v51  ;;  %v860_v51 = vld [vmem:[#allocation2 + $0x1788] sm:$0xff] }
 0x241   :  { %5421 = vmatpush1.bf16.msra.mxu0 %v7213_v40  ;;  %v569_v40 = vld [vmem:[#allocation2 + $0xe70] sm:$0xff] }
 0x242   :  { %5422 = vmatprep.subr.bf16.mxu0 %v7222_v43  ;;  %v7253_v43 = vcombine.low %v557_v26, %v561_v27  ;;  %v7262_v45 = vcombine.high %v565_v37, %v569_v40  ;;  %v864_v26 = vld [vmem:[#allocation2 + $0x17a8] sm:$0xff]  ;;  %v605_v27 = vld [vmem:[#allocation2 + $0xf90] sm:$0xff] }
 0x243   :  { %5259 = vmatpush1.bf16.msra.mxu1 %v7475_v50  ;;  %v577_v50 = vld [vmem:[#allocation2 + $0xeb0] sm:$0xff] }
 0x244   :  { %5260 = vmatprep.subr.bf16.mxu1 %v7484_v54  ;;  %v7261_v54 = vcombine.low %v565_v37, %v569_v40  ;;  %v872_v37 = vld [vmem:[#allocation2 + $0x17e8] sm:$0xff]  ;;  %v613_v40 = vld [vmem:[#allocation2 + $0xfd0] sm:$0xff] }
 0x245   :  { %5423 = vmatpush1.bf16.msra.mxu0 %v7221_v52  ;;  %v7515_v52 = vcombine.low %v820_v35, %v824_v36  ;;  %v868_v36 = vld [vmem:[#allocation2 + $0x17c8] sm:$0xff] }
 0x246   :  { %5424 = vmatprep.subr.bf16.mxu0 %v7230_v56  ;;  %v7270_v56 = vcombine.high %v573_v49, %v577_v50 }
 0x247   :  { %v5038_v11 = vpop.f32.mrb[0].mxu0  ;;  %5261 = vmatpush1.bf16.msra.mxu1 %v7483_v3  ;;  %v7269_v3 = vcombine.low %v573_v49, %v577_v50  ;;  %v114_v49 = vld [vmem:[#allocation2 + $0x38] sm:$0xff]  ;;  %v621_v50 = vld [vmem:[#allocation2 + $0x1010] sm:$0xff] }
 0x248   :  { %v8424_v14 = vadd.f32 %v7697_v6, %v5038_v11  ;;  %v5040_v15 = vpop.f32.mrb[1].mxu0  ;;  %5262 = vmatprep.subr.bf16.mxu1 %v7492_v5  ;;  %v7278_v5 = vcombine.high %v581_v62, %v585_v63  ;;  %v844_v6 = vld [vmem:[#allocation2 + $0x1708] sm:$0xff]  ;;  %v7277_v11 = vcombine.low %v581_v62, %v585_v63  ;;  %v122_v62 = vld [vmem:[#allocation2 + $0x78] sm:$0xff]  ;;  %v629_v63 = vld [vmem:[#allocation2 + $0x1050] sm:$0xff] }
 0x249   :  { %v8426_v18 = vadd.f32 %v7699_v38, %v5040_v15  ;;  %v5042_v20 = vpop.f32.mrb[2].mxu0  ;;  %5425 = vmatpush1.bf16.msra.mxu0 %v7229_v4  ;;  %v7532_v4 = vcombine.high %v836_v59, %v840_v60  ;;  %v7531_v38 = vcombine.low %v836_v59, %v840_v60  ;;  %v852_v15 = vld [vmem:[#allocation2 + $0x1748] sm:$0xff]  ;;  %v118_v60 = vld [vmem:[#allocation2 + $0x58] sm:$0xff] }
 0x24a   :  { %v5043_v23 = vpop.f32.mrb[3].mxu0  ;;  %5426 = vmatprep.subr.bf16.mxu0 %v7238_v7  ;;  %v848_v7 = vld [vmem:[#allocation2 + $0x1728] sm:$0xff]  ;;  %v597_v20 = vld [vmem:[#allocation2 + $0xf50] sm:$0xff] }
 0x24b   :  { %5263 = vmatpush1.bf16.msra.mxu1 %v7491_v17  ;;  %v7540_v12 = vcombine.high %v844_v6, %v848_v7  ;;  %v856_v17 = vld [vmem:[#allocation2 + $0x1768] sm:$0xff]  ;;  %v7285_v23 = vcombine.low %v589_v9, %v593_v10  ;;  %v130_v9 = vld [vmem:[#allocation2 + $0xb8] sm:$0xff]  ;;  %v637_v10 = vld [vmem:[#allocation2 + $0x1090] sm:$0xff] }
 0x24c   :  { %5264 = vmatprep.subr.bf16.mxu1 %v7500_v53  ;;  %v7539_v53 = vcombine.low %v844_v6, %v848_v7  ;;  %v126_v7 = vld [vmem:[#allocation2 + $0x98] sm:$0xff] }
 0x24d   :  { %5427 = vmatpush1.bf16.msra.mxu0 %v7237_v48  ;;  %v601_v48 = vld [vmem:[#allocation2 + $0xf70] sm:$0xff] }
 0x24e   :  { %5428 = vmatprep.subr.bf16.mxu0 %v7246_v24  ;;  %v7548_v24 = vcombine.high %v852_v15, %v856_v17  ;;  %v7294_v25 = vcombine.high %v597_v20, %v601_v48 }
 0x24f   :  { %5265 = vmatpush1.bf16.msra.mxu1 %v7499_v28  ;;  %v609_v28 = vld [vmem:[#allocation2 + $0xfb0] sm:$0xff] }
 0x250   :  { %5266 = vmatprep.subr.bf16.mxu1 %v7508_v33  ;;  %v7293_v33 = vcombine.low %v597_v20, %v601_v48  ;;  %v7302_v35 = vcombine.high %v605_v27, %v609_v28  ;;  %v138_v20 = vld [vmem:[#allocation2 + $0xf8] sm:$0xff]  ;;  %v645_v48 = vld [vmem:[#allocation2 + $0x10d0] sm:$0xff] }
 0x251   :  { %5429 = vmatpush1.bf16.msra.mxu0 %v7245_v32  ;;  %v7547_v32 = vcombine.low %v852_v15, %v856_v17  ;;  %v134_v17 = vld [vmem:[#allocation2 + $0xd8] sm:$0xff] }
 0x252   :  { %5430 = vmatprep.subr.bf16.mxu0 %v7254_v34  ;;  %v7556_v34 = vcombine.high %v860_v51, %v864_v26 }
 0x253   :  { %5267 = vmatpush1.bf16.msra.mxu1 %v7507_v42  ;;  %v617_v42 = vld [vmem:[#allocation2 + $0xff0] sm:$0xff] }
 0x254   :  { %5268 = vmatprep.subr.bf16.mxu1 %v7516_v44  ;;  %v7301_v44 = vcombine.low %v605_v27, %v609_v28  ;;  %v7310_v46 = vcombine.high %v613_v40, %v617_v42  ;;  %v146_v27 = vld [vmem:[#allocation2 + $0x138] sm:$0xff]  ;;  %v653_v28 = vld [vmem:[#allocation2 + $0x1110] sm:$0xff] }
 0x255   :  { %5431 = vmatpush1.bf16.msra.mxu0 %v7253_v43  ;;  %v7555_v43 = vcombine.low %v860_v51, %v864_v26  ;;  %v142_v26 = vld [vmem:[#allocation2 + $0x118] sm:$0xff] }
 0x256   :  { %5432 = vmatprep.subr.bf16.mxu0 %v7262_v45  ;;  %v7564_v45 = vcombine.high %v868_v36, %v872_v37 }
 0x257   :  { %5269 = vmatpush1.bf16.msra.mxu1 %v7515_v52  ;;  %v625_v52 = vld [vmem:[#allocation2 + $0x1030] sm:$0xff] }
 0x258   :  { %5270 = vmatprep.subr.bf16.mxu1 %v7524_v55  ;;  %v7309_v55 = vcombine.low %v613_v40, %v617_v42  ;;  %v7318_v59 = vcombine.high %v621_v50, %v625_v52  ;;  %v661_v40 = vld [vmem:[#allocation2 + $0x1150] sm:$0xff] }
 0x259   :  { %5433 = vmatpush1.bf16.msra.mxu0 %v7261_v54  ;;  %v7563_v54 = vcombine.low %v868_v36, %v872_v37  ;;  %v150_v36 = vld [vmem:[#allocation2 + $0x158] sm:$0xff]  ;;  %v665_v42 = vld [vmem:[#allocation2 + $0x1170] sm:$0xff] }
 0x25a   :  { %5434 = vmatprep.subr.bf16.mxu0 %v7270_v56  ;;  %v6808_v56 = vcombine.high %v110_v22, %v114_v49  ;;  %v154_v37 = vld [vmem:[#allocation2 + $0x178] sm:$0xff] }
 0x25b   :  { %5271 = vmatpush1.bf16.msra.mxu1 %v7523_v1  ;;  %v633_v1 = vld [vmem:[#allocation2 + $0x1070] sm:$0xff] }
 0x25c   :  { %5272 = vmatprep.subr.bf16.mxu1 %v7532_v4  ;;  %v7317_v4 = vcombine.low %v621_v50, %v625_v52  ;;  %v7326_v6 = vcombine.high %v629_v63, %v633_v1  ;;  %v669_v50 = vld [vmem:[#allocation2 + $0x1190] sm:$0xff] }
 0x25d   :  { %5435 = vmatpush1.bf16.msra.mxu0 %v7269_v3  ;;  %v6807_v3 = vcombine.low %v110_v22, %v114_v49  ;;  %v158_v22 = vld [vmem:[#allocation2 + $0x198] sm:$0xff]  ;;  %v673_v52 = vld [vmem:[#allocation2 + $0x11b0] sm:$0xff] }
 0x25e   :  { %5436 = vmatprep.subr.bf16.mxu0 %v7278_v5  ;;  %v6816_v5 = vcombine.high %v118_v60, %v122_v62  ;;  %v162_v49 = vld [vmem:[#allocation2 + $0x1b8] sm:$0xff] }
 0x25f   :  { %5273 = vmatpush1.bf16.msra.mxu1 %v7531_v38  ;;  %v641_v38 = vld [vmem:[#allocation2 + $0x10b0] sm:$0xff] }
 0x260   :  { %5274 = vmatprep.subr.bf16.mxu1 %v7540_v12  ;;  %v7325_v12 = vcombine.low %v629_v63, %v633_v1  ;;  %v7334_v15 = vcombine.high %v637_v10, %v641_v38  ;;  %v677_v63 = vld [vmem:[#allocation2 + $0x11d0] sm:$0xff] }
 0x261   :  { %5437 = vmatpush1.bf16.msra.mxu0 %v7277_v11  ;;  %v6815_v11 = vcombine.low %v118_v60, %v122_v62  ;;  %v166_v60 = vld [vmem:[#allocation2 + $0x1d8] sm:$0xff]  ;;  %v681_v1 = vld [vmem:[#allocation2 + $0x11f0] sm:$0xff] }
 0x262   :  { %5438 = vmatprep.subr.bf16.mxu0 %v7286_v13  ;;  %v6824_v13 = vcombine.high %v126_v7, %v130_v9  ;;  %v170_v62 = vld [vmem:[#allocation2 + $0x1f8] sm:$0xff] }
 0x263   :  { %5275 = vmatpush1.bf16.msra.mxu1 %v7539_v53  ;;  %v649_v53 = vld [vmem:[#allocation2 + $0x10f0] sm:$0xff] }
 0x264   :  { %5276 = vmatprep.subr.bf16.mxu1 %v7548_v24  ;;  %v7333_v24 = vcombine.low %v637_v10, %v641_v38  ;;  %v7342_v51 = vcombine.high %v645_v48, %v649_v53  ;;  %v685_v10 = vld [vmem:[#allocation2 + $0x1210] sm:$0xff] }
 0x265   :  { %5439 = vmatpush1.bf16.msra.mxu0 %v7285_v23  ;;  %v6823_v23 = vcombine.low %v126_v7, %v130_v9  ;;  %v174_v7 = vld [vmem:[#allocation2 + $0x218] sm:$0xff]  ;;  %v689_v38 = vld [vmem:[#allocation2 + $0x1230] sm:$0xff] }
 0x266   :  { %5440 = vmatprep.subr.bf16.mxu0 %v7294_v25  ;;  %v6832_v25 = vcombine.high %v134_v17, %v138_v20  ;;  %v178_v9 = vld [vmem:[#allocation2 + $0x238] sm:$0xff] }
 0x267   :  { %5277 = vmatpush1.bf16.msra.mxu1 %v7547_v32  ;;  %v657_v32 = vld [vmem:[#allocation2 + $0x1130] sm:$0xff] }
 0x268   :  { %5278 = vmatprep.subr.bf16.mxu1 %v7556_v34  ;;  %v7341_v34 = vcombine.low %v645_v48, %v649_v53  ;;  %v693_v48 = vld [vmem:[#allocation2 + $0x1250] sm:$0xff] }
 0x269   :  { %5441 = vmatpush1.bf16.msra.mxu0 %v7293_v33  ;;  %v6831_v33 = vcombine.low %v134_v17, %v138_v20  ;;  %v182_v17 = vld [vmem:[#allocation2 + $0x258] sm:$0xff]  ;;  %v697_v53 = vld [vmem:[#allocation2 + $0x1270] sm:$0xff] }
 0x26a   :  { %5442 = vmatprep.subr.bf16.mxu0 %v7302_v35  ;;  %v6840_v35 = vcombine.high %v142_v26, %v146_v27  ;;  %v186_v20 = vld [vmem:[#allocation2 + $0x278] sm:$0xff] }
 0x26b   :  { %5279 = vmatpush1.bf16.msra.mxu1 %v7555_v43  ;;  %v6839_v43 = vcombine.low %v142_v26, %v146_v27  ;;  %v190_v26 = vld [vmem:[#allocation2 + $0x298] sm:$0xff] }
 0x26c   :  { %5280 = vmatprep.subr.bf16.mxu1 %v7564_v45  ;;  %v6848_v45 = vcombine.high %v150_v36, %v154_v37  ;;  %v194_v27 = vld [vmem:[#allocation2 + $0x2b8] sm:$0xff] }
 0x26d   :  { %5443 = vmatpush1.bf16.msra.mxu0 %v7301_v44  ;;  %v7349_v44 = vcombine.low %v653_v28, %v657_v32 }
 0x26e   :  { %5444 = vmatprep.subr.bf16.mxu0 %v7310_v46  ;;  %v7358_v46 = vcombine.high %v661_v40, %v665_v42 }
 0x26f   :  { %5281 = vmatpush1.bf16.msra.mxu1 %v7563_v54  ;;  %v6847_v54 = vcombine.low %v150_v36, %v154_v37  ;;  %v198_v36 = vld [vmem:[#allocation2 + $0x2d8] sm:$0xff] }
 0x270   :  { %5537 = vmatprep.subr.bf16.mxu1 %v6808_v56  ;;  %v6856_v56 = vcombine.high %v158_v22, %v162_v49  ;;  %v202_v37 = vld [vmem:[#allocation2 + $0x2f8] sm:$0xff] }
 0x271   :  { %5445 = vmatpush1.bf16.msra.mxu0 %v7309_v55  ;;  %v7357_v55 = vcombine.low %v661_v40, %v665_v42  ;;  %v709_v40 = vld [vmem:[#allocation2 + $0x12d0] sm:$0xff] }
 0x272   :  { %5455 = vmatprep.subr.bf16.mxu0 %v7318_v59  ;;  %5283 = vmatmul.mubr.bf16.vlgmr.msra.gmra.mrb[4].mxu1 %v8390_v30  ;;  %v7366_v59 = vcombine.high %v669_v50, %v673_v52  ;;  %v713_v42 = vld [vmem:[#allocation2 + $0x12f0] sm:$0xff] }
 0x273   :  { %5538 = vmatpush1.bf16.msra.mxu1 %v6807_v3  ;;  %5569 = vmatprep.mubr.bf16.mxu1 %v8307_v57  ;;  %v7350_v57 = vcombine.high %v653_v28, %v657_v32  ;;  %v6855_v3 = vcombine.low %v158_v22, %v162_v49  ;;  %v701_v28 = vld [vmem:[#allocation2 + $0x1290] sm:$0xff]  ;;  %v206_v22 = vld [vmem:[#allocation2 + $0x318] sm:$0xff] }
 0x274   :  { %5447 = vmatmul.mubr.bf16.vlgmr.msra.gmra.mrb[4].mxu0 %v8361_v41  ;;  %5539 = vmatprep.subr.bf16.mxu1 %v6816_v5  ;;  %v6864_v5 = vcombine.high %v166_v60, %v170_v62  ;;  %v705_v32 = vld [vmem:[#allocation2 + $0x12b0] sm:$0xff]  ;;  %v210_v49 = vld [vmem:[#allocation2 + $0x338] sm:$0xff] }
 0x275   :  { %5456 = vmatpush1.bf16.msra.mxu0 %v7317_v4  ;;  %5487 = vmatprep.mubr.bf16.mxu0 %v8365_v47  ;;  %v7365_v4 = vcombine.low %v669_v50, %v673_v52  ;;  %v717_v50 = vld [vmem:[#allocation2 + $0x1310] sm:$0xff] }
 0x276   :  { %5457 = vmatprep.subr.bf16.mxu0 %v7326_v6  ;;  %v7374_v6 = vcombine.high %v677_v63, %v681_v1  ;;  %v721_v52 = vld [vmem:[#allocation2 + $0x1330] sm:$0xff] }
 0x277   :  { %5540 = vmatpush1.bf16.msra.mxu1 %v6815_v11  ;;  %v6863_v11 = vcombine.low %v166_v60, %v170_v62  ;;  %v214_v60 = vld [vmem:[#allocation2 + $0x358] sm:$0xff] }
 0x278   :  { %5541 = vmatprep.subr.bf16.mxu1 %v6824_v13  ;;  %v6872_v13 = vcombine.high %v174_v7, %v178_v9  ;;  %v218_v62 = vld [vmem:[#allocation2 + $0x378] sm:$0xff] }
 0x279   :  { %5458 = vmatpush1.bf16.msra.mxu0 %v7325_v12  ;;  %v7373_v12 = vcombine.low %v677_v63, %v681_v1  ;;  %v725_v63 = vld [vmem:[#allocation2 + $0x1350] sm:$0xff] }
 0x27a   :  { %5459 = vmatprep.subr.bf16.mxu0 %v7334_v15  ;;  %v7382_v15 = vcombine.high %v685_v10, %v689_v38  ;;  %v729_v1 = vld [vmem:[#allocation2 + $0x1370] sm:$0xff] }
 0x27b   :  { %5542 = vmatpush1.bf16.msra.mxu1 %v6823_v23  ;;  %v6871_v23 = vcombine.low %v174_v7, %v178_v9  ;;  %v222_v7 = vld [vmem:[#allocation2 + $0x398] sm:$0xff] }
 0x27c   :  { %5543 = vmatprep.subr.bf16.mxu1 %v6832_v25  ;;  %v6880_v25 = vcombine.high %v182_v17, %v186_v20  ;;  %v226_v9 = vld [vmem:[#allocation2 + $0x3b8] sm:$0xff] }
 0x27d   :  { %5460 = vmatpush1.bf16.msra.mxu0 %v7333_v24  ;;  %v7381_v24 = vcombine.low %v685_v10, %v689_v38  ;;  %v733_v10 = vld [vmem:[#allocation2 + $0x1390] sm:$0xff] }
 0x27e   :  { %5461 = vmatprep.subr.bf16.mxu0 %v7342_v51  ;;  %v7390_v51 = vcombine.high %v693_v48, %v697_v53  ;;  %v737_v38 = vld [vmem:[#allocation2 + $0x13b0] sm:$0xff] }
 0x27f   :  { %5544 = vmatpush1.bf16.msra.mxu1 %v6831_v33  ;;  %v6879_v33 = vcombine.low %v182_v17, %v186_v20  ;;  %v230_v17 = vld [vmem:[#allocation2 + $0x3d8] sm:$0xff] }
 0x280   :  { %5545 = vmatprep.subr.bf16.mxu1 %v6840_v35  ;;  %v6888_v35 = vcombine.high %v190_v26, %v194_v27  ;;  %v234_v20 = vld [vmem:[#allocation2 + $0x3f8] sm:$0xff] }
 0x281   :  { %5462 = vmatpush1.bf16.msra.mxu0 %v7341_v34  ;;  %v7389_v34 = vcombine.low %v693_v48, %v697_v53  ;;  %v741_v48 = vld [vmem:[#allocation2 + $0x13d0] sm:$0xff] }
 0x282   :  { %5463 = vmatprep.subr.bf16.mxu0 %v7350_v57  ;;  %v7398_v57 = vcombine.high %v701_v28, %v705_v32  ;;  %v745_v53 = vld [vmem:[#allocation2 + $0x13f0] sm:$0xff] }
 0x283   :  { %5546 = vmatpush1.bf16.msra.mxu1 %v6839_v43  ;;  %v6887_v43 = vcombine.low %v190_v26, %v194_v27  ;;  %v238_v26 = vld [vmem:[#allocation2 + $0x418] sm:$0xff] }
 0x284   :  { %5547 = vmatprep.subr.bf16.mxu1 %v6848_v45  ;;  %v6896_v45 = vcombine.high %v198_v36, %v202_v37  ;;  %v242_v27 = vld [vmem:[#allocation2 + $0x438] sm:$0xff] }
 0x285   :  { %5464 = vmatpush1.bf16.msra.mxu0 %v7349_v44  ;;  %v7397_v44 = vcombine.low %v701_v28, %v705_v32  ;;  %v749_v28 = vld [vmem:[#allocation2 + $0x1410] sm:$0xff] }
 0x286   :  { %5465 = vmatprep.subr.bf16.mxu0 %v7358_v46  ;;  %v7406_v46 = vcombine.high %v709_v40, %v713_v42  ;;  %v753_v32 = vld [vmem:[#allocation2 + $0x1430] sm:$0xff] }
 0x287   :  { %5548 = vmatpush1.bf16.msra.mxu1 %v6847_v54  ;;  %v6895_v54 = vcombine.low %v198_v36, %v202_v37  ;;  %v246_v36 = vld [vmem:[#allocation2 + $0x458] sm:$0xff] }
 0x288   :  { %5549 = vmatprep.subr.bf16.mxu1 %v6856_v56  ;;  %v6904_v56 = vcombine.high %v206_v22, %v210_v49  ;;  %v250_v37 = vld [vmem:[#allocation2 + $0x478] sm:$0xff] }
 0x289   :  { %5466 = vmatpush1.bf16.msra.mxu0 %v7357_v55  ;;  %v7405_v55 = vcombine.low %v709_v40, %v713_v42  ;;  %v757_v40 = vld [vmem:[#allocation2 + $0x1450] sm:$0xff] }
 0x28a   :  { %5467 = vmatprep.subr.bf16.mxu0 %v7366_v59  ;;  %v7414_v59 = vcombine.high %v717_v50, %v721_v52  ;;  %v761_v42 = vld [vmem:[#allocation2 + $0x1470] sm:$0xff] }
 0x28b   :  { %5550 = vmatpush1.bf16.msra.mxu1 %v6855_v3  ;;  %v6903_v3 = vcombine.low %v206_v22, %v210_v49  ;;  %v254_v22 = vld [vmem:[#allocation2 + $0x498] sm:$0xff] }
 0x28c   :  { %5551 = vmatprep.subr.bf16.mxu1 %v6864_v5  ;;  %v6912_v5 = vcombine.high %v214_v60, %v218_v62  ;;  %v258_v49 = vld [vmem:[#allocation2 + $0x4b8] sm:$0xff] }
 0x28d   :  { %5468 = vmatpush1.bf16.msra.mxu0 %v7365_v4  ;;  %v7413_v4 = vcombine.low %v717_v50, %v721_v52  ;;  %v765_v50 = vld [vmem:[#allocation2 + $0x1490] sm:$0xff] }
 0x28e   :  { %5469 = vmatprep.subr.bf16.mxu0 %v7374_v6  ;;  %v7422_v6 = vcombine.high %v725_v63, %v729_v1  ;;  %v769_v52 = vld [vmem:[#allocation2 + $0x14b0] sm:$0xff] }
 0x28f   :  { %5552 = vmatpush1.bf16.msra.mxu1 %v6863_v11  ;;  %v6911_v11 = vcombine.low %v214_v60, %v218_v62  ;;  %v262_v60 = vld [vmem:[#allocation2 + $0x4d8] sm:$0xff] }
 0x290   :  { %5553 = vmatprep.subr.bf16.mxu1 %v6872_v13  ;;  %v6920_v13 = vcombine.high %v222_v7, %v226_v9  ;;  %v266_v62 = vld [vmem:[#allocation2 + $0x4f8] sm:$0xff] }
 0x291   :  { %5470 = vmatpush1.bf16.msra.mxu0 %v7373_v12  ;;  %v7421_v12 = vcombine.low %v725_v63, %v729_v1  ;;  %v773_v63 = vld [vmem:[#allocation2 + $0x14d0] sm:$0xff] }
 0x292   :  { %5471 = vmatprep.subr.bf16.mxu0 %v7382_v15  ;;  %v7430_v15 = vcombine.high %v733_v10, %v737_v38  ;;  %v777_v1 = vld [vmem:[#allocation2 + $0x14f0] sm:$0xff] }
 0x293   :  { %5554 = vmatpush1.bf16.msra.mxu1 %v6871_v23  ;;  %v6919_v23 = vcombine.low %v222_v7, %v226_v9  ;;  %v274_v7 = vld [vmem:[#allocation2 + $0x538] sm:$0xff]  ;;  %v781_v9 = vld [vmem:[#allocation2 + $0x1510] sm:$0xff] }
 0x294   :  { %5555 = vmatprep.subr.bf16.mxu1 %v6880_v25  ;;  %v6928_v25 = vcombine.high %v230_v17, %v234_v20 }
 0x295   :  { %5472 = vmatpush1.bf16.msra.mxu0 %v7381_v24  ;;  %v7429_v24 = vcombine.low %v733_v10, %v737_v38  ;;  %v785_v10 = vld [vmem:[#allocation2 + $0x1530] sm:$0xff]  ;;  %v6959_v38 = vcombine.low %v262_v60, %v266_v62 }
 0x296   :  { %5473 = vmatprep.subr.bf16.mxu0 %v7390_v51  ;;  %v7438_v51 = vcombine.high %v741_v48, %v745_v53 }
 0x297   :  { %5556 = vmatpush1.bf16.msra.mxu1 %v6879_v33  ;;  %v6927_v33 = vcombine.low %v230_v17, %v234_v20  ;;  %v789_v17 = vld [vmem:[#allocation2 + $0x1550] sm:$0xff] }
 0x298   :  { %5557 = vmatprep.subr.bf16.mxu1 %v6888_v35  ;;  %v6936_v35 = vcombine.high %v238_v26, %v242_v27  ;;  %v793_v20 = vld [vmem:[#allocation2 + $0x1570] sm:$0xff] }
 0x299   :  { %5474 = vmatpush1.bf16.msra.mxu0 %v7389_v34  ;;  %v7437_v34 = vcombine.low %v741_v48, %v745_v53  ;;  %v7477_v53 = vcombine.low %v781_v9, %v785_v10 }
 0x29a   :  { %5475 = vmatprep.subr.bf16.mxu0 %v7398_v57  ;;  %v7446_v57 = vcombine.high %v749_v28, %v753_v32 }
 0x29b   :  { %5558 = vmatpush1.bf16.msra.mxu1 %v6887_v43  ;;  %v6935_v43 = vcombine.low %v238_v26, %v242_v27  ;;  %v797_v26 = vld [vmem:[#allocation2 + $0x1590] sm:$0xff] }
 0x29c   :  { %5559 = vmatprep.subr.bf16.mxu1 %v6896_v45  ;;  %v6944_v45 = vcombine.high %v246_v36, %v250_v37  ;;  %v801_v27 = vld [vmem:[#allocation2 + $0x15b0] sm:$0xff] }
 0x29d   :  { %5476 = vmatpush1.bf16.msra.mxu0 %v7397_v44  ;;  %v7445_v44 = vcombine.low %v749_v28, %v753_v32  ;;  %v7485_v32 = vcombine.low %v789_v17, %v793_v20 }
 0x29e   :  { %5477 = vmatprep.subr.bf16.mxu0 %v7406_v46  ;;  %v7454_v46 = vcombine.high %v757_v40, %v761_v42 }
 0x29f   :  { %5560 = vmatpush1.bf16.msra.mxu1 %v6895_v54  ;;  %v6943_v54 = vcombine.low %v246_v36, %v250_v37  ;;  %v805_v36 = vld [vmem:[#allocation2 + $0x15d0] sm:$0xff] }
 0x2a0   :  { %5561 = vmatprep.subr.bf16.mxu1 %v6904_v56  ;;  %v6952_v56 = vcombine.high %v254_v22, %v258_v49  ;;  %v809_v37 = vld [vmem:[#allocation2 + $0x15f0] sm:$0xff] }
 0x2a1   :  { %5478 = vmatpush1.bf16.msra.mxu0 %v7405_v55  ;;  %v7453_v55 = vcombine.low %v757_v40, %v761_v42  ;;  %v7493_v42 = vcombine.low %v797_v26, %v801_v27 }
 0x2a2   :  { %5479 = vmatprep.subr.bf16.mxu0 %v7414_v59  ;;  %v7462_v59 = vcombine.high %v765_v50, %v769_v52 }
 0x2a3   :  { %5562 = vmatpush1.bf16.msra.mxu1 %v6903_v3  ;;  %v7461_v3 = vcombine.low %v765_v50, %v769_v52  ;;  %v7501_v52 = vcombine.low %v805_v36, %v809_v37 }
 0x2a4   :  { %5563 = vmatprep.subr.bf16.mxu1 %v6912_v5  ;;  %v7470_v5 = vcombine.high %v773_v63, %v777_v1 }
 0x2a5   :  { %5480 = vmatpush1.bf16.msra.mxu0 %v7413_v4  ;;  %v6960_v4 = vcombine.high %v262_v60, %v266_v62  ;;  %v821_v60 = vld [vmem:[#allocation2 + $0x1650] sm:$0xff] }
 0x2a6   :  { %5481 = vmatprep.subr.bf16.mxu0 %v7422_v6  ;;  %v270_v6 = vld [vmem:[#allocation2 + $0x518] sm:$0xff]  ;;  %v825_v62 = vld [vmem:[#allocation2 + $0x1670] sm:$0xff] }
 0x2a7   :  { %5564 = vmatpush1.bf16.msra.mxu1 %v6911_v11  ;;  %v7469_v11 = vcombine.low %v773_v63, %v777_v1  ;;  %v6967_v48 = vcombine.low %v270_v6, %v274_v7 }
 0x2a8   :  { %5565 = vmatprep.subr.bf16.mxu1 %v6920_v13  ;;  %v278_v13 = vld [vmem:[#allocation2 + $0x558] sm:$0xff] }
 0x2a9   :  { %5482 = vmatpush1.bf16.msra.mxu0 %v7421_v12  ;;  %v6968_v12 = vcombine.high %v270_v6, %v274_v7  ;;  %v829_v6 = vld [vmem:[#allocation2 + $0x1690] sm:$0xff] }
 0x2aa   :  { %5483 = vmatprep.subr.bf16.mxu0 %v7430_v15  ;;  %v282_v15 = vld [vmem:[#allocation2 + $0x578] sm:$0xff]  ;;  %v833_v7 = vld [vmem:[#allocation2 + $0x16b0] sm:$0xff] }
 0x2ab   :  { %5566 = vmatpush1.bf16.msra.mxu1 %v6919_v23  ;;  %v6976_v23 = vcombine.high %v278_v13, %v282_v15  ;;  %v6975_v28 = vcombine.low %v278_v13, %v282_v15  ;;  %v837_v13 = vld [vmem:[#allocation2 + $0x16d0] sm:$0xff] }
 0x2ac   :  { %5567 = vmatprep.subr.bf16.mxu1 %v6928_v25  ;;  %v286_v25 = vld [vmem:[#allocation2 + $0x598] sm:$0xff]  ;;  %v841_v15 = vld [vmem:[#allocation2 + $0x16f0] sm:$0xff] }
 0x2ad   :  { %5484 = vmatpush1.bf16.msra.mxu0 %v7429_v24  ;;  %v7486_v24 = vcombine.high %v789_v17, %v793_v20  ;;  %v7525_v20 = vcombine.low %v829_v6, %v833_v7 }
 0x2ae   :  { %5485 = vmatprep.subr.bf16.mxu0 %v7438_v51  ;;  %v290_v51 = vld [vmem:[#allocation2 + $0x5b8] sm:$0xff] }
 0x2af   :  { %5568 = vmatpush1.bf16.msra.mxu1 %v6927_v33  ;;  %v6984_v33 = vcombine.high %v286_v25, %v290_v51  ;;  %v6983_v40 = vcombine.low %v286_v25, %v290_v51  ;;  %v845_v25 = vld [vmem:[#allocation2 + $0x1710] sm:$0xff] }
 0x2b0   :  { %5578 = vmatprep.subr.bf16.mxu1 %v6936_v35  ;;  %v294_v35 = vld [vmem:[#allocation2 + $0x5d8] sm:$0xff]  ;;  %v849_v51 = vld [vmem:[#allocation2 + $0x1730] sm:$0xff] }
 0x2b1   :  { %5486 = vmatpush1.bf16.msra.mxu0 %v7437_v34  ;;  %v7494_v34 = vcombine.high %v797_v26, %v801_v27  ;;  %v7533_v27 = vcombine.low %v837_v13, %v841_v15 }
 0x2b2   :  { %5496 = vmatprep.subr.bf16.mxu0 %v7446_v57  ;;  %5570 = vmatmul.mubr.bf16.vlgmr.msra.gmra.mrb[8].mxu1 %v8322_v16  ;;  %v6951_v16 = vcombine.low %v254_v22, %v258_v49  ;;  %v298_v57 = vld [vmem:[#allocation2 + $0x5f8] sm:$0xff]  ;;  %v813_v22 = vld [vmem:[#allocation2 + $0x1610] sm:$0xff] }
 0x2b3   :  { %5579 = vmatpush1.bf16.msra.mxu1 %v6935_v43  ;;  %5610 = vmatprep.mubr.bf16.mxu1 %v8340_v29  ;;  %v7478_v29 = vcombine.high %v781_v9, %v785_v10  ;;  %v6992_v43 = vcombine.high %v294_v35, %v298_v57  ;;  %v817_v49 = vld [vmem:[#allocation2 + $0x1630] sm:$0xff]  ;;  %v6991_v50 = vcombine.low %v294_v35, %v298_v57 }
 0x2b4   :  { %5488 = vmatmul.mubr.bf16.vlgmr.msra.gmra.mrb[4].mxu0 %v8378_v2  ;;  %5580 = vmatprep.subr.bf16.mxu1 %v6944_v45  ;;  %v302_v45 = vld [vmem:[#allocation2 + $0x618] sm:$0xff]  ;;  %v7509_v1 = vcombine.low %v813_v22, %v817_v49  ;;  %v7517_v10 = vcombine.low %v821_v60, %v825_v62  ;;  %v853_v35 = vld [vmem:[#allocation2 + $0x1750] sm:$0xff] }
 0x2b5   :  { %5497 = vmatpush1.bf16.msra.mxu0 %v7445_v44  ;;  %5528 = vmatprep.mubr.bf16.mxu0 %v8382_v8  ;;  %v7502_v44 = vcombine.high %v805_v36, %v809_v37  ;;  %v857_v57 = vld [vmem:[#allocation2 + $0x1770] sm:$0xff]  ;;  %v7541_v37 = vcombine.low %v845_v25, %v849_v51 }
 0x2b6   :  { %5498 = vmatprep.subr.bf16.mxu0 %v7454_v46  ;;  %v306_v46 = vld [vmem:[#allocation2 + $0x638] sm:$0xff] }
 0x2b7   :  { %5581 = vmatpush1.bf16.msra.mxu1 %v6943_v54  ;;  %v7000_v54 = vcombine.high %v302_v45, %v306_v46  ;;  %v6999_v63 = vcombine.low %v302_v45, %v306_v46  ;;  %v861_v45 = vld [vmem:[#allocation2 + $0x1790] sm:$0xff] }
 0x2b8   :  { %5582 = vmatprep.subr.bf16.mxu1 %v6952_v56  ;;  %v310_v56 = vld [vmem:[#allocation2 + $0x658] sm:$0xff]  ;;  %v865_v46 = vld [vmem:[#allocation2 + $0x17b0] sm:$0xff] }
 0x2b9   :  { %5499 = vmatpush1.bf16.msra.mxu0 %v7453_v55  ;;  %v7510_v55 = vcombine.high %v813_v22, %v817_v49  ;;  %v7549_v49 = vcombine.low %v853_v35, %v857_v57 }
 0x2ba   :  { %5500 = vmatprep.subr.bf16.mxu0 %v7462_v59  ;;  %v314_v59 = vld [vmem:[#allocation2 + $0x678] sm:$0xff] }
 0x2bb   :  { %5583 = vmatpush1.bf16.msra.mxu1 %v6951_v16  ;;  %v7008_v16 = vcombine.high %v310_v56, %v314_v59  ;;  %v7007_v9 = vcombine.low %v310_v56, %v314_v59  ;;  %v869_v56 = vld [vmem:[#allocation2 + $0x17d0] sm:$0xff] }
 0x2bc   :  { %5584 = vmatprep.subr.bf16.mxu1 %v6960_v4  ;;  %v318_v4 = vld [vmem:[#allocation2 + $0x698] sm:$0xff]  ;;  %v873_v59 = vld [vmem:[#allocation2 + $0x17f0] sm:$0xff] }
 0x2bd   :  { %5501 = vmatpush1.bf16.msra.mxu0 %v7461_v3  ;;  %v7518_v3 = vcombine.high %v821_v60, %v825_v62  ;;  %v7557_v62 = vcombine.low %v861_v45, %v865_v46 }
 0x2be   :  { %5502 = vmatprep.subr.bf16.mxu0 %v7470_v5  ;;  %v322_v5 = vld [vmem:[#allocation2 + $0x6b8] sm:$0xff] }
 0x2bf   :  { %5585 = vmatpush1.bf16.msra.mxu1 %v6959_v38  ;;  %v7016_v38 = vcombine.high %v318_v4, %v322_v5  ;;  %v7015_v17 = vcombine.low %v318_v4, %v322_v5  ;;  %v7565_v5 = vcombine.low %v869_v56, %v873_v59 }
 0x2c0   :  { %5586 = vmatprep.subr.bf16.mxu1 %v6968_v12  ;;  %v326_v12 = vld [vmem:[#allocation2 + $0x6d8] sm:$0xff] }
 0x2c1   :  { %5503 = vmatpush1.bf16.msra.mxu0 %v7469_v11  ;;  %v7526_v11 = vcombine.high %v829_v6, %v833_v7  ;;  %v7822_v7 = vld [vmem:[#allocation7 + $0x4] ss:$8 sps:$4 sm:$0xff]  }
 0x2c2   :  { %5504 = vmatprep.subr.bf16.mxu0 %v7478_v29  ;;  %v330_v29 = vld [vmem:[#allocation2 + $0x6f8] sm:$0xff] }
 0x2c3   :  { %5587 = vmatpush1.bf16.msra.mxu1 %v6967_v48  ;;  %v7024_v48 = vcombine.high %v326_v12, %v330_v29  ;;  %v7023_v26 = vcombine.low %v326_v12, %v330_v29  ;;  %v7825_v29 = vld [vmem:[#allocation7 + $0x14] ss:$8 sps:$4 sm:$0xff]  }
 0x2c4   :  { %5588 = vmatprep.subr.bf16.mxu1 %v6976_v23  ;;  %v334_v23 = vld [vmem:[#allocation2 + $0x718] sm:$0xff] }
 0x2c5   :  { %5505 = vmatpush1.bf16.msra.mxu0 %v7477_v53  ;;  %v7534_v53 = vcombine.high %v837_v13, %v841_v15  ;;  %v382_v13 = vld [vmem:[#allocation2 + $0x898] sm:$0xff] }
 0x2c6   :  { %5506 = vmatprep.subr.bf16.mxu0 %v7486_v24  ;;  %v338_v24 = vld [vmem:[#allocation2 + $0x738] sm:$0xff] }
 0x2c7   :  { %5589 = vmatpush1.bf16.msra.mxu1 %v6975_v28  ;;  %v7032_v28 = vcombine.high %v334_v23, %v338_v24  ;;  %v7031_v36 = vcombine.low %v334_v23, %v338_v24  ;;  %v386_v15 = vld [vmem:[#allocation2 + $0x8b8] sm:$0xff]  ;;  %v7828_v23 = vld [vmem:[#allocation7 + $0x24] ss:$8 sps:$4 sm:$0xff]  }
 0x2c8   :  { %5590 = vmatprep.subr.bf16.mxu1 %v6984_v33  ;;  %v342_v33 = vld [vmem:[#allocation2 + $0x758] sm:$0xff] }
 0x2c9   :  { %5507 = vmatpush1.bf16.msra.mxu0 %v7485_v32  ;;  %v7542_v32 = vcombine.high %v845_v25, %v849_v51  ;;  %v390_v24 = vld [vmem:[#allocation2 + $0x8d8] sm:$0xff]  ;;  %v7079_v51 = vcombine.low %v382_v13, %v386_v15 }
 0x2ca   :  { %5508 = vmatprep.subr.bf16.mxu0 %v7494_v34  ;;  %v346_v34 = vld [vmem:[#allocation2 + $0x778] sm:$0xff] }
 0x2cb   :  { %5591 = vmatpush1.bf16.msra.mxu1 %v6983_v40  ;;  %v7040_v40 = vcombine.high %v342_v33, %v346_v34  ;;  %v7039_v22 = vcombine.low %v342_v33, %v346_v34  ;;  %v394_v25 = vld [vmem:[#allocation2 + $0x8f8] sm:$0xff] }
 0x2cc   :  { %5592 = vmatprep.subr.bf16.mxu1 %v6992_v43  ;;  %v350_v43 = vld [vmem:[#allocation2 + $0x798] sm:$0xff] }
 0x2cd   :  { %5509 = vmatpush1.bf16.msra.mxu0 %v7493_v42  ;;  %v7550_v42 = vcombine.high %v853_v35, %v857_v57  ;;  %v7829_v33 = vld [vmem:[#allocation7 + $0x30] ss:$8 sps:$4 sm:$0xff]   ;;  %v7834_v35 = vld [vmem:[#allocation7 + $0x44] ss:$8 sps:$4 sm:$0xff]  }
 0x2ce   :  { %5510 = vmatprep.subr.bf16.mxu0 %v7502_v44  ;;  %v354_v44 = vld [vmem:[#allocation2 + $0x7b8] sm:$0xff] }
 0x2cf   :  { %5593 = vmatpush1.bf16.msra.mxu1 %v6991_v50  ;;  %v7048_v50 = vcombine.high %v350_v43, %v354_v44  ;;  %v7047_v60 = vcombine.low %v350_v43, %v354_v44  ;;  %v406_v57 = vld [vmem:[#allocation2 + $0x958] sm:$0xff] }
 0x2d0   :  { %5594 = vmatprep.subr.bf16.mxu1 %v7000_v54  ;;  %v358_v54 = vld [vmem:[#allocation2 + $0x7d8] sm:$0xff] }
 0x2d1   :  { %5511 = vmatpush1.bf16.msra.mxu0 %v7501_v52  ;;  %v7558_v52 = vcombine.high %v861_v45, %v865_v46  ;;  %v414_v43 = vld [vmem:[#allocation2 + $0x998] sm:$0xff] }
 0x2d2   :  { %5512 = vmatprep.subr.bf16.mxu0 %v7510_v55  ;;  %v362_v55 = vld [vmem:[#allocation2 + $0x7f8] sm:$0xff] }
 0x2d3   :  { %5595 = vmatpush1.bf16.msra.mxu1 %v6999_v63  ;;  %v7056_v63 = vcombine.high %v358_v54, %v362_v55  ;;  %v7055_v4 = vcombine.low %v358_v54, %v362_v55  ;;  %v418_v44 = vld [vmem:[#allocation2 + $0x9b8] sm:$0xff]  ;;  %v7838_v55 = vld [vmem:[#allocation7 + $0x60] ss:$8 sps:$4 sm:$0xff]  }
 0x2d4   :  { %5596 = vmatprep.subr.bf16.mxu1 %v7008_v16  ;;  %v366_v16 = vld [vmem:[#allocation2 + $0x818] sm:$0xff]  ;;  %v7111_v54 = vcombine.low %v414_v43, %v418_v44 }
 0x2d5   :  { %5513 = vmatpush1.bf16.msra.mxu0 %v7509_v1  ;;  %v7566_v1 = vcombine.high %v869_v56, %v873_v59  ;;  %v7835_v46 = vld [vmem:[#allocation7 + $0x50] ss:$8 sps:$4 sm:$0xff]   ;;  %v7843_v59 = vld [vmem:[#allocation7 + $0x74] ss:$8 sps:$4 sm:$0xff]  }
 0x2d6   :  { %5514 = vmatprep.subr.bf16.mxu0 %v7518_v3  ;;  %v370_v3 = vld [vmem:[#allocation2 + $0x838] sm:$0xff] }
 0x2d7   :  { %5597 = vmatpush1.bf16.msra.mxu1 %v7007_v9  ;;  %v7064_v6 = vcombine.high %v366_v16, %v370_v3  ;;  %v374_v9 = vld [vmem:[#allocation2 + $0x858] sm:$0xff] }
 0x2d8   :  { %5598 = vmatprep.subr.bf16.mxu1 %v7016_v38  ;;  %v7063_v38 = vcombine.low %v366_v16, %v370_v3  ;;  %v7846_v3 = vld [vmem:[#allocation7 + $0x84] ss:$8 sps:$4 sm:$0xff]  }
 0x2d9   :  { %5515 = vmatpush1.bf16.msra.mxu0 %v7517_v10  ;;  %v378_v10 = vld [vmem:[#allocation2 + $0x878] sm:$0xff] }
 0x2da   :  { %5516 = vmatprep.subr.bf16.mxu0 %v7526_v11  ;;  %v7820_v11 = vld [vmem:[#allocation7] ss:$8 sps:$4 sm:$0xff]   ;;  %v7072_v12 = vcombine.high %v374_v9, %v378_v10 }
 0x2db   :  { %5599 = vmatpush1.bf16.msra.mxu1 %v7015_v17  ;;  %v5784_v17 = vpack.c.bf16 %v8426_v18, %v8426_v18  ;;  %v7088_v18 = vcombine.high %v390_v24, %v394_v25 }
 0x2dc   :  { %5600 = vmatprep.subr.bf16.mxu1 %v7024_v48  ;;  %v7823_v48 = vld [vmem:[#allocation7 + $0x10] ss:$8 sps:$4 sm:$0xff]  }
 0x2dd   :  { %5517 = vmatpush1.bf16.msra.mxu0 %v7525_v20  ;;  %v7071_v20 = vcombine.low %v374_v9, %v378_v10  ;;  %v7849_v10 = vld [vmem:[#allocation7 + $0x94] ss:$8 sps:$4 sm:$0xff]  }
 0x2de   :  { %5518 = vmatprep.subr.bf16.mxu0 %v7534_v53  ;;  %v7080_v53 = vcombine.high %v382_v13, %v386_v15  ;;  %v7852_v15 = vld [vmem:[#allocation7 + $0xa4] ss:$8 sps:$4 sm:$0xff]  }
 0x2df   :  { %5601 = vmatpush1.bf16.msra.mxu1 %v7023_v26  ;;  %v7831_v26 = vld [vmem:[#allocation7 + $0x34] ss:$8 sps:$4 sm:$0xff]  }
 0x2e0   :  { %5602 = vmatprep.subr.bf16.mxu1 %v7032_v28  ;;  %v402_v28 = vld [vmem:[#allocation2 + $0x938] sm:$0xff] }
 0x2e1   :  { %5519 = vmatpush1.bf16.msra.mxu0 %v7533_v27  ;;  %v398_v27 = vld [vmem:[#allocation2 + $0x918] sm:$0xff] }
 0x2e2   :  { %5520 = vmatprep.subr.bf16.mxu0 %v7542_v32  ;;  %v7087_v32 = vcombine.low %v390_v24, %v394_v25  ;;  %v7096_v34 = vcombine.high %v398_v27, %v402_v28  ;;  %v7855_v24 = vld [vmem:[#allocation7 + $0xb4] ss:$8 sps:$4 sm:$0xff]  }
 0x2e3   :  { %5603 = vmatpush1.bf16.msra.mxu1 %v7031_v36  ;;  %v7095_v36 = vcombine.low %v398_v27, %v402_v28  ;;  %v462_v25 = vld [vmem:[#allocation2 + $0xb18] sm:$0xff]  ;;  %v7858_v27 = vld [vmem:[#allocation7 + $0xc4] ss:$8 sps:$4 sm:$0xff]  }
 0x2e4   :  { %5604 = vmatprep.subr.bf16.mxu1 %v7040_v40  ;;  %v470_v28 = vld [vmem:[#allocation2 + $0xb58] sm:$0xff] }
 0x2e5   :  { %5521 = vmatpush1.bf16.msra.mxu0 %v7541_v37  ;;  %v7832_v37 = vld [vmem:[#allocation7 + $0x40] ss:$8 sps:$4 sm:$0xff]  }
 0x2e6   :  { %5522 = vmatprep.subr.bf16.mxu0 %v7550_v42  ;;  %v7837_v42 = vld [vmem:[#allocation7 + $0x54] ss:$8 sps:$4 sm:$0xff]  }
 0x2e7   :  { %5605 = vmatpush1.bf16.msra.mxu1 %v7039_v22  ;;  %v7112_v22 = vcombine.high %v414_v43, %v418_v44  ;;  %v7864_v43 = vld [vmem:[#allocation7 + $0xe4] ss:$8 sps:$4 sm:$0xff]   ;;  %v486_v44 = vld [vmem:[#allocation2 + $0xbd8] sm:$0xff] }
 0x2e8   :  { %5606 = vmatprep.subr.bf16.mxu1 %v7048_v50  ;;  %v422_v50 = vld [vmem:[#allocation2 + $0x9d8] sm:$0xff] }
 0x2e9   :  { %5523 = vmatpush1.bf16.msra.mxu0 %v7549_v49  ;;  %v7840_v49 = vld [vmem:[#allocation7 + $0x64] ss:$8 sps:$4 sm:$0xff]  }
 0x2ea   :  { %5524 = vmatprep.subr.bf16.mxu0 %v7558_v52  ;;  %v426_v52 = vld [vmem:[#allocation2 + $0x9f8] sm:$0xff] }
 0x2eb   :  { %5607 = vmatpush1.bf16.msra.mxu1 %v7047_v60  ;;  %v7120_v56 = vcombine.high %v422_v50, %v426_v52  ;;  %v430_v60 = vld [vmem:[#allocation2 + $0xa18] sm:$0xff] }
 0x2ec   :  { %5608 = vmatprep.subr.bf16.mxu1 %v7056_v63  ;;  %v7119_v63 = vcombine.low %v422_v50, %v426_v52  ;;  %v7867_v50 = vld [vmem:[#allocation7 + $0xf4] ss:$8 sps:$4 sm:$0xff]  }
 0x2ed   :  { %5525 = vmatpush1.bf16.msra.mxu0 %v7557_v62  ;;  %v434_v62 = vld [vmem:[#allocation2 + $0xa38] sm:$0xff] }
 0x2ee   :  { %5526 = vmatprep.subr.bf16.mxu0 %v7566_v1  ;;  %v7841_v1 = vld [vmem:[#allocation7 + $0x70] ss:$8 sps:$4 sm:$0xff]   ;;  %v7128_v16 = vcombine.high %v430_v60, %v434_v62 }
 0x2ef   :  { %5609 = vmatpush1.bf16.msra.mxu1 %v7055_v4  ;;  %v438_v4 = vld [vmem:[#allocation2 + $0xa58] sm:$0xff] }
 0x2f0   :  { %5619 = vmatprep.subr.bf16.mxu1 %v7064_v6  ;;  %v7127_v6 = vcombine.low %v430_v60, %v434_v62  ;;  %v494_v52 = vld [vmem:[#allocation2 + $0xc18] sm:$0xff]  ;;  %v7870_v60 = vld [vmem:[#allocation7 + $0x104] ss:$8 sps:$4 sm:$0xff]  }
 0x2f1   :  { %5527 = vmatpush1.bf16.msra.mxu0 %v7565_v5  ;;  %v442_v5 = vld [vmem:[#allocation2 + $0xa78] sm:$0xff] }
 0x2f2   :  { %6571 = vmatprep.subr.bf16.mxu0 %v7822_v7  ;;  %5611 = vmatmul.mubr.bf16.vlgmr.msra.gmra.mrb[8].mxu1 %v8357_v39  ;;  %v7826_v39 = vld [vmem:[#allocation7 + $0x20] ss:$8 sps:$4 sm:$0xff]   ;;  %v7136_v9 = vcombine.high %v438_v4, %v442_v5  ;;  %v502_v62 = vld [vmem:[#allocation2 + $0xc58] sm:$0xff] }
 0x2f3   :  { %5620 = vmatpush1.bf16.msra.mxu1 %v7063_v38  ;;  %5651 = vmatprep.mubr.bf16.mxu1 %v8316_v61  ;;  %v410_v61 = vld [vmem:[#allocation2 + $0x978] sm:$0xff]  ;;  %v7844_v7 = vld [vmem:[#allocation7 + $0x80] ss:$8 sps:$4 sm:$0xff]  }
 0x2f4   :  { %5529 = vmatmul.mubr.bf16.vlgmr.msra.gmra.mrb[4].mxu0 %v8390_v30  ;;  %5621 = vmatprep.subr.bf16.mxu1 %v7072_v12  ;;  %v7104_v40 = vcombine.high %v406_v57, %v410_v61  ;;  %v7103_v45 = vcombine.low %v406_v57, %v410_v61  ;;  %v446_v38 = vld [vmem:[#allocation2 + $0xa98] sm:$0xff]  ;;  %v7135_v12 = vcombine.low %v438_v4, %v442_v5 }
 0x2f5   :  { %6572 = vmatpush1.bf16.msra.mxu0 %v7820_v11  ;;  %6603 = vmatprep.mubr.bf16.mxu0 %v5784_v17  ;;  %v450_v11 = vld [vmem:[#allocation2 + $0xab8] sm:$0xff]  ;;  %v5783_v4 = vpack.c.bf16 %v8424_v14, %v8424_v14 }
 0x2f6   :  { %6573 = vmatprep.subr.bf16.mxu0 %v7825_v29  ;;  %v7847_v29 = vld [vmem:[#allocation7 + $0x90] ss:$8 sps:$4 sm:$0xff]   ;;  %v7144_v13 = vcombine.high %v446_v38, %v450_v11  ;;  %v7861_v57 = vld [vmem:[#allocation7 + $0xd4] ss:$8 sps:$4 sm:$0xff]  }
 0x2f7   :  { %5622 = vmatpush1.bf16.msra.mxu1 %v7071_v20  ;;  %v454_v17 = vld [vmem:[#allocation2 + $0xad8] sm:$0xff] }
 0x2f8   :  { %5623 = vmatprep.subr.bf16.mxu1 %v7080_v53  ;;  %v458_v20 = vld [vmem:[#allocation2 + $0xaf8] sm:$0xff]  ;;  %v7850_v53 = vld [vmem:[#allocation7 + $0xa0] ss:$8 sps:$4 sm:$0xff]  }
 0x2f9   :  { %6574 = vmatpush1.bf16.msra.mxu0 %v7823_v48  ;;  %v7143_v48 = vcombine.low %v446_v38, %v450_v11  ;;  %v478_v61 = vld [vmem:[#allocation2 + $0xb98] sm:$0xff]  ;;  %v7876_v11 = vld [vmem:[#allocation7 + $0x124] ss:$8 sps:$4 sm:$0xff]  }
 0x2fa   :  { %6575 = vmatprep.subr.bf16.mxu0 %v7828_v23  ;;  %v7152_v23 = vcombine.high %v454_v17, %v458_v20  ;;  %v7873_v5 = vld [vmem:[#allocation7 + $0x114] ss:$8 sps:$4 sm:$0xff]  }
 0x2fb   :  { %5624 = vmatpush1.bf16.msra.mxu1 %v7079_v51  ;;  %v466_v51 = vld [vmem:[#allocation2 + $0xb38] sm:$0xff] }
 0x2fc   :  { %5625 = vmatprep.subr.bf16.mxu1 %v7088_v18  ;;  %v7853_v18 = vld [vmem:[#allocation7 + $0xb0] ss:$8 sps:$4 sm:$0xff]  }
 0x2fd   :  { %6576 = vmatpush1.bf16.msra.mxu0 %v7826_v39  ;;  %v7151_v39 = vcombine.low %v454_v17, %v458_v20  ;;  %v526_v17 = vld [vmem:[#allocation2 + $0xd18] sm:$0xff] }
 0x2fe   :  { %6577 = vmatprep.subr.bf16.mxu0 %v7831_v26  ;;  %v7160_v26 = vcombine.high %v462_v25, %v466_v51  ;;  %v530_v20 = vld [vmem:[#allocation2 + $0xd38] sm:$0xff] }
 0x2ff   :  { %5626 = vmatpush1.bf16.msra.mxu1 %v7087_v32  ;;  %v474_v32 = vld [vmem:[#allocation2 + $0xb78] sm:$0xff] }
 0x300   :  { %5627 = vmatprep.subr.bf16.mxu1 %v7096_v34  ;;  %v7856_v34 = vld [vmem:[#allocation7 + $0xc0] ss:$8 sps:$4 sm:$0xff]  }
 0x301   :  { %6578 = vmatpush1.bf16.msra.mxu0 %v7829_v33  ;;  %v7159_v33 = vcombine.low %v462_v25, %v466_v51  ;;  %v534_v25 = vld [vmem:[#allocation2 + $0xd58] sm:$0xff]  ;;  %v7223_v51 = vcombine.low %v526_v17, %v530_v20 }
 0x302   :  { %6579 = vmatprep.subr.bf16.mxu0 %v7834_v35  ;;  %v7168_v35 = vcombine.high %v470_v28, %v474_v32 }
 0x303   :  { %5628 = vmatpush1.bf16.msra.mxu1 %v7095_v36  ;;  %v482_v36 = vld [vmem:[#allocation2 + $0xbb8] sm:$0xff] }
 0x304   :  { %5629 = vmatprep.subr.bf16.mxu1 %v7104_v40  ;;  %v7859_v40 = vld [vmem:[#allocation7 + $0xd0] ss:$8 sps:$4 sm:$0xff]  }
 0x305   :  { %6580 = vmatpush1.bf16.msra.mxu0 %v7832_v37  ;;  %v7167_v37 = vcombine.low %v470_v28, %v474_v32  ;;  %v542_v28 = vld [vmem:[#allocation2 + $0xd98] sm:$0xff] }
 0x306   :  { %6581 = vmatprep.subr.bf16.mxu0 %v7837_v42  ;;  %v7176_v42 = vcombine.high %v478_v61, %v482_v36  ;;  %v546_v32 = vld [vmem:[#allocation2 + $0xdb8] sm:$0xff] }
 0x307   :  { %5630 = vmatpush1.bf16.msra.mxu1 %v7103_v45  ;;  %v490_v45 = vld [vmem:[#allocation2 + $0xbf8] sm:$0xff] }
 0x308   :  { %5631 = vmatprep.subr.bf16.mxu1 %v7112_v22  ;;  %v7862_v22 = vld [vmem:[#allocation7 + $0xe0] ss:$8 sps:$4 sm:$0xff]  }
 0x309   :  { %6582 = vmatpush1.bf16.msra.mxu0 %v7835_v46  ;;  %v7175_v46 = vcombine.low %v478_v61, %v482_v36  ;;  %v7240_v61 = vcombine.high %v542_v28, %v546_v32 }
 0x30a   :  { %6583 = vmatprep.subr.bf16.mxu0 %v7840_v49  ;;  %v7184_v49 = vcombine.high %v486_v44, %v490_v45 }
 0x30b   :  { %5632 = vmatpush1.bf16.msra.mxu1 %v7111_v54  ;;  %v498_v54 = vld [vmem:[#allocation2 + $0xc38] sm:$0xff] }
 0x30c   :  { %5633 = vmatprep.subr.bf16.mxu1 %v7120_v56  ;;  %v7865_v56 = vld [vmem:[#allocation7 + $0xf0] ss:$8 sps:$4 sm:$0xff]  }
 0x30d   :  { %6584 = vmatpush1.bf16.msra.mxu0 %v7838_v55  ;;  %v7183_v55 = vcombine.low %v486_v44, %v490_v45 }
 0x30e   :  { %6585 = vmatprep.subr.bf16.mxu0 %v7843_v59  ;;  %v7192_v59 = vcombine.high %v494_v52, %v498_v54 }
 0x30f   :  { %5634 = vmatpush1.bf16.msra.mxu1 %v7119_v63  ;;  %v506_v63 = vld [vmem:[#allocation2 + $0xc78] sm:$0xff] }
 0x310   :  { %5635 = vmatprep.subr.bf16.mxu1 %v7128_v16  ;;  %v7868_v16 = vld [vmem:[#allocation7 + $0x100] ss:$8 sps:$4 sm:$0xff]  }
 0x311   :  { %6586 = vmatpush1.bf16.msra.mxu0 %v7841_v1  ;;  %v7191_v1 = vcombine.low %v494_v52, %v498_v54  ;;  %v7891_v54 = vld [vmem:[#allocation7 + $0x174] ss:$8 sps:$4 sm:$0xff]  }
 0x312   :  { %6587 = vmatprep.subr.bf16.mxu0 %v7846_v3  ;;  %v7200_v3 = vcombine.high %v502_v62, %v506_v63 }
 0x313   :  { %5636 = vmatpush1.bf16.msra.mxu1 %v7127_v6  ;;  %v510_v6 = vld [vmem:[#allocation2 + $0xc98] sm:$0xff] }
 0x314   :  { %5637 = vmatprep.subr.bf16.mxu1 %v7136_v9  ;;  %v7199_v9 = vcombine.low %v502_v62, %v506_v63  ;;  %v7894_v63 = vld [vmem:[#allocation7 + $0x184] ss:$8 sps:$4 sm:$0xff]  }
 0x315   :  { %6588 = vmatpush1.bf16.msra.mxu0 %v7844_v7  ;;  %v514_v7 = vld [vmem:[#allocation2 + $0xcb8] sm:$0xff] }
 0x316   :  { %6589 = vmatprep.subr.bf16.mxu0 %v7849_v10  ;;  %v7871_v10 = vld [vmem:[#allocation7 + $0x110] ss:$8 sps:$4 sm:$0xff]   ;;  %v7208_v38 = vcombine.high %v510_v6, %v514_v7  ;;  %v7207_v14 = vcombine.low %v510_v6, %v514_v7  ;;  %v7897_v6 = vld [vmem:[#allocation7 + $0x194] ss:$8 sps:$4 sm:$0xff]  }
 0x317   :  { %5638 = vmatpush1.bf16.msra.mxu1 %v7135_v12  ;;  %v518_v12 = vld [vmem:[#allocation2 + $0xcd8] sm:$0xff] }
 0x318   :  { %5639 = vmatprep.subr.bf16.mxu1 %v7144_v13  ;;  %v7874_v13 = vld [vmem:[#allocation7 + $0x120] ss:$8 sps:$4 sm:$0xff]   ;;  %v574_v7 = vld [vmem:[#allocation2 + $0xe98] sm:$0xff] }
 0x319   :  { %6590 = vmatpush1.bf16.msra.mxu0 %v7847_v29  ;;  %v522_v29 = vld [vmem:[#allocation2 + $0xcf8] sm:$0xff] }
 0x31a   :  { %6591 = vmatprep.subr.bf16.mxu0 %v7852_v15  ;;  %v7216_v15 = vcombine.high %v518_v12, %v522_v29 }
 0x31b   :  { %5640 = vmatpush1.bf16.msra.mxu1 %v7143_v48  ;;  %v7215_v48 = vcombine.low %v518_v12, %v522_v29  ;;  %v7900_v12 = vld [vmem:[#allocation7 + $0x1a4] ss:$8 sps:$4 sm:$0xff]   ;;  %v582_v29 = vld [vmem:[#allocation2 + $0xed8] sm:$0xff] }
 0x31c   :  { %5641 = vmatprep.subr.bf16.mxu1 %v7152_v23  ;;  %v7224_v23 = vcombine.high %v526_v17, %v530_v20  ;;  %v7903_v17 = vld [vmem:[#allocation7 + $0x1b4] ss:$8 sps:$4 sm:$0xff]  }
 0x31d   :  { %6592 = vmatpush1.bf16.msra.mxu0 %v7850_v53  ;;  %v7877_v53 = vld [vmem:[#allocation7 + $0x130] ss:$8 sps:$4 sm:$0xff]  }
 0x31e   :  { %6593 = vmatprep.subr.bf16.mxu0 %v7855_v24  ;;  %v7882_v24 = vld [vmem:[#allocation7 + $0x144] ss:$8 sps:$4 sm:$0xff]   ;;  %v590_v20 = vld [vmem:[#allocation2 + $0xf18] sm:$0xff] }
 0x31f   :  { %5642 = vmatpush1.bf16.msra.mxu1 %v7151_v39  ;;  %v891_v39 = vsub.s32 3, %v8412_v31 }
 0x320   :  { %5643 = vmatprep.subr.bf16.mxu1 %v7160_v26 }
 0x321   :  { %6594 = vmatpush1.bf16.msra.mxu0 %v7853_v18  ;;  %v7880_v18 = vld [vmem:[#allocation7 + $0x140] ss:$8 sps:$4 sm:$0xff]  }
 0x322   :  { %6595 = vmatprep.subr.bf16.mxu0 %v7858_v27  ;;  %v7885_v27 = vld [vmem:[#allocation7 + $0x154] ss:$8 sps:$4 sm:$0xff]  }
 0x323   :  { %5644 = vmatpush1.bf16.msra.mxu1 %v7159_v33  ;;  %v8446_v33 = vld [vmem:[#allocation5] sm:$0xff] }
 0x324   :  { %5645 = vmatprep.subr.bf16.mxu1 %v7168_v35 }
 0x325   :  { %6596 = vmatpush1.bf16.msra.mxu0 %v7856_v34  ;;  %v892_v34 = vrot.slane %v8446_v33, %v891_v39 }
 0x326   :  { %6597 = vmatprep.subr.bf16.mxu0 %v7861_v57  ;;  %v7883_v57 = vld [vmem:[#allocation7 + $0x150] ss:$8 sps:$4 sm:$0xff]  }
 0x327   :  { %5646 = vmatpush1.bf16.msra.mxu1 %v7167_v37  ;;  %v7888_v37 = vld [vmem:[#allocation7 + $0x164] ss:$8 sps:$4 sm:$0xff]  }
 0x328   :  { %5647 = vmatprep.subr.bf16.mxu1 %v7176_v42  ;;  %v554_v42 = vld [vmem:[#allocation2 + $0xdf8] sm:$0xff] }
 0x329   :  { %6598 = vmatpush1.bf16.msra.mxu0 %v7859_v40  ;;  %v550_v40 = vld [vmem:[#allocation2 + $0xdd8] sm:$0xff] }
 0x32a   :  { %6599 = vmatprep.subr.bf16.mxu0 %v7864_v43 }
 0x32b   :  { %5648 = vmatpush1.bf16.msra.mxu1 %v7175_v46  ;;  %v7239_v46 = vcombine.low %v542_v28, %v546_v32  ;;  %v606_v28 = vld [vmem:[#allocation2 + $0xf98] sm:$0xff] }
 0x32c   :  { %5649 = vmatprep.subr.bf16.mxu1 %v7184_v49  ;;  %v7886_v49 = vld [vmem:[#allocation7 + $0x160] ss:$8 sps:$4 sm:$0xff]   ;;  %v610_v32 = vld [vmem:[#allocation2 + $0xfb8] sm:$0xff] }
 0x32d   :  { %6600 = vmatpush1.bf16.msra.mxu0 %v7862_v22 }
 0x32e   :  { %6601 = vmatprep.subr.bf16.mxu0 %v7867_v50  ;;  %v7248_v50 = vcombine.high %v550_v40, %v554_v42 }
 0x32f   :  { %5650 = vmatpush1.bf16.msra.mxu1 %v7183_v55  ;;  %v558_v55 = vld [vmem:[#allocation2 + $0xe18] sm:$0xff] }
 0x330   :  { %5660 = vmatprep.subr.bf16.mxu1 %v7192_v59  ;;  %v7247_v59 = vcombine.low %v550_v40, %v554_v42  ;;  %v614_v40 = vld [vmem:[#allocation2 + $0xfd8] sm:$0xff] }
 0x331   :  { %6602 = vmatpush1.bf16.msra.mxu0 %v7865_v56  ;;  %v562_v56 = vld [vmem:[#allocation2 + $0xe38] sm:$0xff] }
 0x332   :  { %6612 = vmatprep.subr.bf16.mxu0 %v7870_v60  ;;  %5652 = vmatmul.mubr.bf16.vlgmr.msra.gmra.mrb[8].mxu1 %v8331_v21  ;;  %v7879_v21 = vld [vmem:[#allocation7 + $0x134] ss:$8 sps:$4 sm:$0xff]   ;;  %v7889_v60 = vld [vmem:[#allocation7 + $0x170] ss:$8 sps:$4 sm:$0xff]   ;;  %v7256_v62 = vcombine.high %v558_v55, %v562_v56 }
 0x333   :  { %5661 = vmatpush1.bf16.msra.mxu1 %v7191_v1  ;;  %5692 = vmatprep.mubr.bf16.mxu1 %v8345_v58  ;;  %v538_v58 = vld [vmem:[#allocation2 + $0xd78] sm:$0xff] }
 0x334   :  { %6604 = vmatmul.mubr.bf16.vlgmr.msra.gmra.mrb[8].mxu0 %v5783_v4  ;;  %5662 = vmatprep.subr.bf16.mxu1 %v7200_v3  ;;  %v7232_v26 = vcombine.high %v534_v25, %v538_v58  ;;  %v7231_v35 = vcombine.low %v534_v25, %v538_v58  ;;  %v566_v1 = vld [vmem:[#allocation2 + $0xe58] sm:$0xff]  ;;  %v7255_v3 = vcombine.low %v558_v55, %v562_v56  ;;  %v7892_v4 = vld [vmem:[#allocation7 + $0x180] ss:$8 sps:$4 sm:$0xff]   ;;  %v7906_v25 = vld [vmem:[#allocation7 + $0x1c4] ss:$8 sps:$4 sm:$0xff]  }
 0x335   :  { %6613 = vmatpush1.bf16.msra.mxu0 %v7868_v16  ;;  %v570_v16 = vld [vmem:[#allocation2 + $0xe78] sm:$0xff] }
 0x336   :  { %6614 = vmatprep.subr.bf16.mxu0 %v7873_v5  ;;  %v7264_v5 = vcombine.high %v566_v1, %v570_v16  ;;  %v598_v58 = vld [vmem:[#allocation2 + $0xf58] sm:$0xff] }
 0x337   :  { %5663 = vmatpush1.bf16.msra.mxu1 %v7199_v9  ;;  %v578_v9 = vld [vmem:[#allocation2 + $0xeb8] sm:$0xff] }
 0x338   :  { %5664 = vmatprep.subr.bf16.mxu1 %v7208_v38  ;;  %v7895_v38 = vld [vmem:[#allocation7 + $0x190] ss:$8 sps:$4 sm:$0xff]  }
 0x339   :  { %6615 = vmatpush1.bf16.msra.mxu0 %v7871_v10  ;;  %v7263_v10 = vcombine.low %v566_v1, %v570_v16  ;;  %v618_v42 = vld [vmem:[#allocation2 + $0xff8] sm:$0xff]  ;;  %v7916_v16 = vld [vmem:[#allocation7 + $0x200] ss:$8 sps:$4 sm:$0xff]  }
 0x33a   :  { %6616 = vmatprep.subr.bf16.mxu0 %v7876_v11  ;;  %v7272_v11 = vcombine.high %v574_v7, %v578_v9 }
 0x33b   :  { %5665 = vmatpush1.bf16.msra.mxu1 %v7207_v14  ;;  %v586_v14 = vld [vmem:[#allocation2 + $0xef8] sm:$0xff] }
 0x33c   :  { %5666 = vmatprep.subr.bf16.mxu1 %v7216_v15  ;;  %v7898_v15 = vld [vmem:[#allocation7 + $0x1a0] ss:$8 sps:$4 sm:$0xff]  }
 0x33d   :  { %6617 = vmatpush1.bf16.msra.mxu0 %v7874_v13  ;;  %v7271_v13 = vcombine.low %v574_v7, %v578_v9  ;;  %v7919_v9 = vld [vmem:[#allocation7 + $0x210] ss:$8 sps:$4 sm:$0xff]  }
 0x33e   :  { %6618 = vmatprep.subr.bf16.mxu0 %v7879_v21  ;;  %v7280_v21 = vcombine.high %v582_v29, %v586_v14 }
 0x33f   :  { %5667 = vmatpush1.bf16.msra.mxu1 %v7215_v48  ;;  %v594_v48 = vld [vmem:[#allocation2 + $0xf38] sm:$0xff] }
 0x340   :  { %5668 = vmatprep.subr.bf16.mxu1 %v7224_v23  ;;  %v7901_v23 = vld [vmem:[#allocation7 + $0x1b0] ss:$8 sps:$4 sm:$0xff]   ;;  %v7287_v39 = vcombine.low %v590_v20, %v594_v48 }
 0x341   :  { %6619 = vmatpush1.bf16.msra.mxu0 %v7877_v53  ;;  %v7279_v53 = vcombine.low %v582_v29, %v586_v14  ;;  %v7922_v14 = vld [vmem:[#allocation7 + $0x220] ss:$8 sps:$4 sm:$0xff]  }
 0x342   :  { %6620 = vmatprep.subr.bf16.mxu0 %v7882_v24  ;;  %v7288_v24 = vcombine.high %v590_v20, %v594_v48  ;;  %v7925_v20 = vld [vmem:[#allocation7 + $0x230] ss:$8 sps:$4 sm:$0xff]  }
 0x343   :  { %5669 = vmatpush1.bf16.msra.mxu1 %v7223_v51  ;;  %v602_v51 = vld [vmem:[#allocation2 + $0xf78] sm:$0xff] }
 0x344   :  { %5670 = vmatprep.subr.bf16.mxu1 %v7232_v26  ;;  %v7296_v26 = vcombine.high %v598_v58, %v602_v51  ;;  %v662_v48 = vld [vmem:[#allocation2 + $0x1158] sm:$0xff] }
 0x345   :  { %6621 = vmatpush1.bf16.msra.mxu0 %v7880_v18  ;;  %v8449_v36 = vpop.f32.mrb[4].mxu1  ;;  %v7904_v18 = vld [vmem:[#allocation7 + $0x1c0] ss:$8 sps:$4 sm:$0xff]  }
 0x346   :  { %6622 = vmatprep.subr.bf16.mxu0 %v7885_v27  ;;  %v5286_v43 = vpop.f32.mrb[5].mxu1  ;;  %v7909_v27 = vld [vmem:[#allocation7 + $0x1d4] ss:$8 sps:$4 sm:$0xff]  }
 0x347   :  { %v7702_v44 = vadd.f32 %v5286_v43, %v892_v34  ;;  %v5288_v45 = vpop.f32.mrb[6].mxu1  ;;  %5671 = vmatpush1.bf16.msra.mxu1 %v7231_v35  ;;  %v7295_v34 = vcombine.low %v598_v58, %v602_v51  ;;  %v7907_v35 = vld [vmem:[#allocation7 + $0x1d0] ss:$8 sps:$4 sm:$0xff]   ;;  %v7303_v43 = vcombine.low %v606_v28, %v610_v32 }
 0x348   :  { %v5289_v22 = vpop.f32.mrb[7].mxu1  ;;  %5672 = vmatprep.subr.bf16.mxu1 %v7240_v61  ;;  %v887_v61 = vsub.s32 2, %v8412_v31  ;;  %v7312_v45 = vcombine.high %v614_v40, %v618_v42  ;;  %v670_v58 = vld [vmem:[#allocation2 + $0x1198] sm:$0xff] }
 0x349   :  { %6623 = vmatpush1.bf16.msra.mxu0 %v7883_v57  ;;  %v5786_v52 = vpack.c.bf16 %v7702_v44, %v7702_v44  ;;  %v7304_v57 = vcombine.high %v606_v28, %v610_v32  ;;  %v7910_v44 = vld [vmem:[#allocation7 + $0x1e0] ss:$8 sps:$4 sm:$0xff]   ;;  %v7915_v22 = vld [vmem:[#allocation7 + $0x1f4] ss:$8 sps:$4 sm:$0xff]  }
 0x34a   :  { %6624 = vmatprep.subr.bf16.mxu0 %v7888_v37  ;;  %v7912_v37 = vld [vmem:[#allocation7 + $0x1e4] ss:$8 sps:$4 sm:$0xff]   ;;  %v674_v51 = vld [vmem:[#allocation2 + $0x11b8] sm:$0xff] }
 0x34b   :  { %5673 = vmatpush1.bf16.msra.mxu1 %v7239_v46  ;;  %6644 = vmatprep.mubr.bf16.mxu0 %v5786_v52  ;;  %v888_v46 = vrot.slane %v8446_v33, %v887_v61  ;;  %v7311_v52 = vcombine.low %v614_v40, %v618_v42  ;;  %v678_v28 = vld [vmem:[#allocation2 + $0x11d8] sm:$0xff]  ;;  %v7934_v61 = vld [vmem:[#allocation7 + $0x260] ss:$8 sps:$4 sm:$0xff]  }
 0x34c   :  { %5674 = vmatprep.subr.bf16.mxu1 %v7248_v50  ;;  %v626_v50 = vld [vmem:[#allocation2 + $0x1038] sm:$0xff] }
 0x34d   :  { %6625 = vmatpush1.bf16.msra.mxu0 %v7886_v49  ;;  %v622_v49 = vld [vmem:[#allocation2 + $0x1018] sm:$0xff]  ;;  %v7701_v56 = vadd.f32 %v8449_v36, %v888_v46 }
 0x34e   :  { %6626 = vmatprep.subr.bf16.mxu0 %v7891_v54  ;;  %v7913_v54 = vld [vmem:[#allocation7 + $0x1f0] ss:$8 sps:$4 sm:$0xff]   ;;  %v7320_v55 = vcombine.high %v622_v49, %v626_v50  ;;  %v7939_v42 = vld [vmem:[#allocation7 + $0x274] ss:$8 sps:$4 sm:$0xff]  }
 0x34f   :  { %5675 = vmatpush1.bf16.msra.mxu1 %v7247_v59  ;;  %v630_v59 = vld [vmem:[#allocation2 + $0x1058] sm:$0xff] }
 0x350   :  { %5676 = vmatprep.subr.bf16.mxu1 %v7256_v62  ;;  %v7918_v62 = vld [vmem:[#allocation7 + $0x204] ss:$8 sps:$4 sm:$0xff]   ;;  %v682_v32 = vld [vmem:[#allocation2 + $0x11f8] sm:$0xff] }
 0x351   :  { %6627 = vmatpush1.bf16.msra.mxu0 %v7889_v60  ;;  %v634_v60 = vld [vmem:[#allocation2 + $0x1078] sm:$0xff] }
 0x352   :  { %6628 = vmatprep.subr.bf16.mxu0 %v7894_v63  ;;  %v7319_v63 = vcombine.low %v622_v49, %v626_v50  ;;  %v7328_v1 = vcombine.high %v630_v59, %v634_v60  ;;  %v7327_v36 = vcombine.low %v630_v59, %v634_v60  ;;  %v690_v40 = vld [vmem:[#allocation2 + $0x1238] sm:$0xff]  ;;  %v7942_v49 = vld [vmem:[#allocation7 + $0x284] ss:$8 sps:$4 sm:$0xff]  }
 0x353   :  { %5677 = vmatpush1.bf16.msra.mxu1 %v7255_v3  ;;  %v5785_v3 = vpack.c.bf16 %v7701_v56, %v7701_v56  ;;  %v694_v46 = vld [vmem:[#allocation2 + $0x1258] sm:$0xff] }
 0x354   :  { %5678 = vmatprep.subr.bf16.mxu1 %v7264_v5  ;;  %v642_v5 = vld [vmem:[#allocation2 + $0x10b8] sm:$0xff] }
 0x355   :  { %6629 = vmatpush1.bf16.msra.mxu0 %v7892_v4  ;;  %v638_v4 = vld [vmem:[#allocation2 + $0x1098] sm:$0xff] }
 0x356   :  { %6630 = vmatprep.subr.bf16.mxu0 %v7897_v6  ;;  %v7921_v6 = vld [vmem:[#allocation7 + $0x214] ss:$8 sps:$4 sm:$0xff]   ;;  %v7336_v7 = vcombine.high %v638_v4, %v642_v5 }
 0x357   :  { %5679 = vmatpush1.bf16.msra.mxu1 %v7263_v10  ;;  %v646_v10 = vld [vmem:[#allocation2 + $0x10d8] sm:$0xff] }
 0x358   :  { %5680 = vmatprep.subr.bf16.mxu1 %v7272_v11  ;;  %v7924_v11 = vld [vmem:[#allocation7 + $0x224] ss:$8 sps:$4 sm:$0xff]   ;;  %v706_v56 = vld [vmem:[#allocation2 + $0x12b8] sm:$0xff] }
 0x359   :  { %6631 = vmatpush1.bf16.msra.mxu0 %v7895_v38  ;;  %v650_v38 = vld [vmem:[#allocation2 + $0x10f8] sm:$0xff] }
 0x35a   :  { %6632 = vmatprep.subr.bf16.mxu0 %v7900_v12  ;;  %v7335_v12 = vcombine.low %v638_v4, %v642_v5  ;;  %v7344_v29 = vcombine.high %v646_v10, %v650_v38  ;;  %v7945_v59 = vld [vmem:[#allocation7 + $0x294] ss:$8 sps:$4 sm:$0xff]  }
 0x35b   :  { %5681 = vmatpush1.bf16.msra.mxu1 %v7271_v13  ;;  %v658_v13 = vld [vmem:[#allocation2 + $0x1138] sm:$0xff] }
 0x35c   :  { %5682 = vmatprep.subr.bf16.mxu1 %v7280_v21  ;;  %v7343_v21 = vcombine.low %v646_v10, %v650_v38 }
 0x35d   :  { %6633 = vmatpush1.bf16.msra.mxu0 %v7898_v15  ;;  %v7927_v15 = vld [vmem:[#allocation7 + $0x234] ss:$8 sps:$4 sm:$0xff]  }
 0x35e   :  { %6634 = vmatprep.subr.bf16.mxu0 %v7903_v17 }
 0x35f   :  { %5683 = vmatpush1.bf16.msra.mxu1 %v7279_v53  ;;  %v666_v53 = vld [vmem:[#allocation2 + $0x1178] sm:$0xff] }
 0x360   :  { %5684 = vmatprep.subr.bf16.mxu1 %v7288_v24  ;;  %v7360_v24 = vcombine.high %v662_v48, %v666_v53 }
 0x361   :  { %6635 = vmatpush1.bf16.msra.mxu0 %v7901_v23 }
 0x362   :  { %6636 = vmatprep.subr.bf16.mxu0 %v7906_v25  ;;  %v7928_v25 = vld [vmem:[#allocation7 + $0x240] ss:$8 sps:$4 sm:$0xff]  }
 0x363   :  { %5685 = vmatpush1.bf16.msra.mxu1 %v7287_v39  ;;  %v7933_v39 = vld [vmem:[#allocation7 + $0x254] ss:$8 sps:$4 sm:$0xff]  }
 0x364   :  { %5686 = vmatprep.subr.bf16.mxu1 %v7296_v26  ;;  %v7368_v26 = vcombine.high %v670_v58, %v674_v51 }
 0x365   :  { %6637 = vmatpush1.bf16.msra.mxu0 %v7904_v18  ;;  %v7359_v18 = vcombine.low %v662_v48, %v666_v53 }
 0x366   :  { %6638 = vmatprep.subr.bf16.mxu0 %v7909_v27  ;;  %v7931_v27 = vld [vmem:[#allocation7 + $0x250] ss:$8 sps:$4 sm:$0xff]  }
 0x367   :  { %5687 = vmatpush1.bf16.msra.mxu1 %v7295_v34  ;;  %v7936_v34 = vld [vmem:[#allocation7 + $0x264] ss:$8 sps:$4 sm:$0xff]  }
 0x368   :  { %5688 = vmatprep.subr.bf16.mxu1 %v7304_v57  ;;  %v7376_v57 = vcombine.high %v678_v28, %v682_v32 }
 0x369   :  { %6639 = vmatpush1.bf16.msra.mxu0 %v7907_v35  ;;  %v7367_v35 = vcombine.low %v670_v58, %v674_v51 }
 0x36a   :  { %6640 = vmatprep.subr.bf16.mxu0 %v7912_v37  ;;  %v686_v37 = vld [vmem:[#allocation2 + $0x1218] sm:$0xff] }
 0x36b   :  { %5689 = vmatpush1.bf16.msra.mxu1 %v7303_v43  ;;  %v7375_v43 = vcombine.low %v678_v28, %v682_v32  ;;  %v7383_v50 = vcombine.low %v686_v37, %v690_v40 }
 0x36c   :  { %5690 = vmatprep.subr.bf16.mxu1 %v7312_v45  ;;  %v7937_v45 = vld [vmem:[#allocation7 + $0x270] ss:$8 sps:$4 sm:$0xff]  }
 0x36d   :  { %6641 = vmatpush1.bf16.msra.mxu0 %v7910_v44  ;;  %v7384_v44 = vcombine.high %v686_v37, %v690_v40 }
 0x36e   :  { %6642 = vmatprep.subr.bf16.mxu0 %v7915_v22  ;;  %v698_v22 = vld [vmem:[#allocation2 + $0x1278] sm:$0xff] }
 0x36f   :  { %5691 = vmatpush1.bf16.msra.mxu1 %v7311_v52  ;;  %v7392_v52 = vcombine.high %v694_v46, %v698_v22  ;;  %v7391_v60 = vcombine.low %v694_v46, %v698_v22  ;;  %v774_v46 = vld [vmem:[#allocation2 + $0x14d8] sm:$0xff] }
 0x370   :  { %5701 = vmatprep.subr.bf16.mxu1 %v7320_v55  ;;  %v702_v55 = vld [vmem:[#allocation2 + $0x1298] sm:$0xff] }
 0x371   :  { %6643 = vmatpush1.bf16.msra.mxu0 %v7913_v54  ;;  %v7940_v54 = vld [vmem:[#allocation7 + $0x280] ss:$8 sps:$4 sm:$0xff]   ;;  %v7399_v4 = vcombine.low %v702_v55, %v706_v56  ;;  %v778_v22 = vld [vmem:[#allocation2 + $0x14f8] sm:$0xff] }
 0x372   :  { %6653 = vmatprep.subr.bf16.mxu0 %v7918_v62  ;;  %5693 = vmatmul.mubr.bf16.vlgmr.msra.gmra.mrb[8].mxu1 %v8361_v41  ;;  %v654_v41 = vld [vmem:[#allocation2 + $0x1118] sm:$0xff]  ;;  %v7400_v62 = vcombine.high %v702_v55, %v706_v56  ;;  %v7471_v55 = vcombine.low %v774_v46, %v778_v22 }
 0x373   :  { %5702 = vmatpush1.bf16.msra.mxu1 %v7319_v63  ;;  %5733 = vmatprep.mubr.bf16.mxu1 %v8365_v47  ;;  %v7352_v17 = vcombine.high %v654_v41, %v658_v13  ;;  %v7930_v47 = vld [vmem:[#allocation7 + $0x244] ss:$8 sps:$4 sm:$0xff]   ;;  %v7351_v23 = vcombine.low %v654_v41, %v658_v13  ;;  %v7943_v63 = vld [vmem:[#allocation7 + $0x290] ss:$8 sps:$4 sm:$0xff]  }
 0x374   :  { %6645 = vmatmul.mubr.bf16.vlgmr.msra.gmra.mrb[8].mxu0 %v5785_v3  ;;  %5703 = vmatprep.subr.bf16.mxu1 %v7328_v1  ;;  %v710_v1 = vld [vmem:[#allocation2 + $0x12d8] sm:$0xff]  ;;  %v7948_v3 = vld [vmem:[#allocation7 + $0x2a4] ss:$8 sps:$4 sm:$0xff]  }
 0x375   :  { %6654 = vmatpush1.bf16.msra.mxu0 %v7916_v16  ;;  %v714_v16 = vld [vmem:[#allocation2 + $0x12f8] sm:$0xff] }
 0x376   :  { %6655 = vmatprep.subr.bf16.mxu0 %v7921_v6  ;;  %v7408_v5 = vcombine.high %v710_v1, %v714_v16  ;;  %v7946_v6 = vld [vmem:[#allocation7 + $0x2a0] ss:$8 sps:$4 sm:$0xff]   ;;  %v7407_v10 = vcombine.low %v710_v1, %v714_v16  ;;  %v798_v1 = vld [vmem:[#allocation2 + $0x1598] sm:$0xff] }
 0x377   :  { %5704 = vmatpush1.bf16.msra.mxu1 %v7327_v36  ;;  %v718_v36 = vld [vmem:[#allocation2 + $0x1318] sm:$0xff] }
 0x378   :  { %5705 = vmatprep.subr.bf16.mxu1 %v7336_v7  ;;  %v722_v7 = vld [vmem:[#allocation2 + $0x1338] sm:$0xff] }
 0x379   :  { %6656 = vmatpush1.bf16.msra.mxu0 %v7919_v9  ;;  %v7951_v9 = vld [vmem:[#allocation7 + $0x2b4] ss:$8 sps:$4 sm:$0xff]   ;;  %v7416_v38 = vcombine.high %v718_v36, %v722_v7  ;;  %v7415_v41 = vcombine.low %v718_v36, %v722_v7 }
 0x37a   :  { %6657 = vmatprep.subr.bf16.mxu0 %v7924_v11  ;;  %v7949_v11 = vld [vmem:[#allocation7 + $0x2b0] ss:$8 sps:$4 sm:$0xff]  }
 0x37b   :  { %5706 = vmatpush1.bf16.msra.mxu1 %v7335_v12  ;;  %v726_v12 = vld [vmem:[#allocation2 + $0x1358] sm:$0xff] }
 0x37c   :  { %5707 = vmatprep.subr.bf16.mxu1 %v7344_v29  ;;  %v730_v29 = vld [vmem:[#allocation2 + $0x1378] sm:$0xff] }
 0x37d   :  { %6658 = vmatpush1.bf16.msra.mxu0 %v7922_v14  ;;  %v7954_v14 = vld [vmem:[#allocation7 + $0x2c4] ss:$8 sps:$4 sm:$0xff]   ;;  %v7424_v13 = vcombine.high %v726_v12, %v730_v29  ;;  %v7423_v48 = vcombine.low %v726_v12, %v730_v29  ;;  %v802_v16 = vld [vmem:[#allocation2 + $0x15b8] sm:$0xff] }
 0x37e   :  { %6659 = vmatprep.subr.bf16.mxu0 %v7927_v15  ;;  %v7952_v15 = vld [vmem:[#allocation7 + $0x2c0] ss:$8 sps:$4 sm:$0xff]   ;;  %v806_v36 = vld [vmem:[#allocation2 + $0x15d8] sm:$0xff] }
 0x37f   :  { %5708 = vmatpush1.bf16.msra.mxu1 %v7343_v21  ;;  %v734_v21 = vld [vmem:[#allocation2 + $0x1398] sm:$0xff] }
 0x380   :  { %5709 = vmatprep.subr.bf16.mxu1 %v7352_v17  ;;  %v738_v17 = vld [vmem:[#allocation2 + $0x13b8] sm:$0xff] }
 0x381   :  { %6660 = vmatpush1.bf16.msra.mxu0 %v7925_v20  ;;  %v7957_v20 = vld [vmem:[#allocation7 + $0x2d4] ss:$8 sps:$4 sm:$0xff]   ;;  %v7432_v53 = vcombine.high %v734_v21, %v738_v17  ;;  %v7431_v58 = vcombine.low %v734_v21, %v738_v17  ;;  %v7964_v17 = vld [vmem:[#allocation7 + $0x300] ss:$8 sps:$4 sm:$0xff]  }
 0x382   :  { %6661 = vmatprep.subr.bf16.mxu0 %v7930_v47  ;;  %v7955_v47 = vld [vmem:[#allocation7 + $0x2d0] ss:$8 sps:$4 sm:$0xff]  }
 0x383   :  { %5710 = vmatpush1.bf16.msra.mxu1 %v7351_v23  ;;  %v742_v23 = vld [vmem:[#allocation2 + $0x13d8] sm:$0xff] }
 0x384   :  { %5711 = vmatprep.subr.bf16.mxu1 %v7360_v24  ;;  %v746_v24 = vld [vmem:[#allocation2 + $0x13f8] sm:$0xff] }
 0x385   :  { %6662 = vmatpush1.bf16.msra.mxu0 %v7928_v25  ;;  %v7960_v25 = vld [vmem:[#allocation7 + $0x2e4] ss:$8 sps:$4 sm:$0xff]   ;;  %v7440_v51 = vcombine.high %v742_v23, %v746_v24  ;;  %v7439_v28 = vcombine.low %v742_v23, %v746_v24  ;;  %v810_v7 = vld [vmem:[#allocation2 + $0x15f8] sm:$0xff] }
 0x386   :  { %6663 = vmatprep.subr.bf16.mxu0 %v7933_v39  ;;  %v7958_v39 = vld [vmem:[#allocation7 + $0x2e0] ss:$8 sps:$4 sm:$0xff]   ;;  %v822_v23 = vld [vmem:[#allocation2 + $0x1658] sm:$0xff] }
 0x387   :  { %5712 = vmatpush1.bf16.msra.mxu1 %v7359_v18  ;;  %v750_v18 = vld [vmem:[#allocation2 + $0x1418] sm:$0xff] }
 0x388   :  { %5713 = vmatprep.subr.bf16.mxu1 %v7368_v26  ;;  %v754_v26 = vld [vmem:[#allocation2 + $0x1438] sm:$0xff] }
 0x389   :  { %6664 = vmatpush1.bf16.msra.mxu0 %v7931_v27  ;;  %v7963_v27 = vld [vmem:[#allocation7 + $0x2f4] ss:$8 sps:$4 sm:$0xff]   ;;  %v7448_v32 = vcombine.high %v750_v18, %v754_v26  ;;  %v7447_v37 = vcombine.low %v750_v18, %v754_v26 }
 0x38a   :  { %6665 = vmatprep.subr.bf16.mxu0 %v7936_v34  ;;  %v7961_v34 = vld [vmem:[#allocation7 + $0x2f0] ss:$8 sps:$4 sm:$0xff]  }
 0x38b   :  { %5714 = vmatpush1.bf16.msra.mxu1 %v7367_v35  ;;  %v758_v35 = vld [vmem:[#allocation2 + $0x1458] sm:$0xff] }
 0x38c   :  { %5715 = vmatprep.subr.bf16.mxu1 %v7376_v57  ;;  %v762_v57 = vld [vmem:[#allocation2 + $0x1478] sm:$0xff] }
 0x38d   :  { %6666 = vmatpush1.bf16.msra.mxu0 %v7934_v61  ;;  %v7966_v61 = vld [vmem:[#allocation7 + $0x304] ss:$8 sps:$4 sm:$0xff]   ;;  %v7456_v40 = vcombine.high %v758_v35, %v762_v57  ;;  %v826_v24 = vld [vmem:[#allocation2 + $0x1678] sm:$0xff] }
 0x38e   :  { %6667 = vmatprep.subr.bf16.mxu0 %v7939_v42  ;;  %v766_v42 = vld [vmem:[#allocation2 + $0x1498] sm:$0xff] }
 0x38f   :  { %5716 = vmatpush1.bf16.msra.mxu1 %v7375_v43  ;;  %v770_v43 = vld [vmem:[#allocation2 + $0x14b8] sm:$0xff] }
 0x390   :  { %5717 = vmatprep.subr.bf16.mxu1 %v7384_v44  ;;  %v7455_v44 = vcombine.low %v758_v35, %v762_v57  ;;  %v830_v18 = vld [vmem:[#allocation2 + $0x1698] sm:$0xff] }
 0x391   :  { %6668 = vmatpush1.bf16.msra.mxu0 %v7937_v45  ;;  %v7464_v45 = vcombine.high %v766_v42, %v770_v43  ;;  %v834_v26 = vld [vmem:[#allocation2 + $0x16b8] sm:$0xff] }
 0x392   :  { %6669 = vmatprep.subr.bf16.mxu0 %v7942_v49  ;;  %v7463_v49 = vcombine.low %v766_v42, %v770_v43  ;;  %v838_v35 = vld [vmem:[#allocation2 + $0x16d8] sm:$0xff] }
 0x393   :  { %5718 = vmatpush1.bf16.msra.mxu1 %v7383_v50  ;;  %v7472_v50 = vcombine.high %v774_v46, %v778_v22  ;;  %v842_v57 = vld [vmem:[#allocation2 + $0x16f8] sm:$0xff] }
 0x394   :  { %5719 = vmatprep.subr.bf16.mxu1 %v7392_v52  ;;  %v782_v52 = vld [vmem:[#allocation2 + $0x1518] sm:$0xff]  ;;  %v7536_v42 = vcombine.high %v838_v35, %v842_v57  ;;  %v7535_v46 = vcombine.low %v838_v35, %v842_v57  ;;  %v6749_v57 = vld [vmem:[#allocation11] sm:$0x3] }
 0x395   :  { %6670 = vmatpush1.bf16.msra.mxu0 %v7940_v54  ;;  %v786_v54 = vld [vmem:[#allocation2 + $0x1538] sm:$0xff] }
 0x396   :  { %6671 = vmatprep.subr.bf16.mxu0 %v7945_v59  ;;  %v7480_v56 = vcombine.high %v782_v52, %v786_v54  ;;  %v790_v59 = vld [vmem:[#allocation2 + $0x1558] sm:$0xff] }
 0x397   :  { %5720 = vmatpush1.bf16.msra.mxu1 %v7391_v60  ;;  %v7479_v60 = vcombine.low %v782_v52, %v786_v54  ;;  %v846_v43 = vld [vmem:[#allocation2 + $0x1718] sm:$0xff] }
 0x398   :  { %5721 = vmatprep.subr.bf16.mxu1 %v7400_v62  ;;  %v899_v62 = vsub.s32 5, %v8412_v31  ;;  %v7981_v22 = vld [vmem:[#allocation7 + $0x354] ss:$8 sps:$4 sm:$0xff]   ;;  %v7979_v54 = vld [vmem:[#allocation7 + $0x350] ss:$8 sps:$4 sm:$0xff]  }
 0x399   :  { %6672 = vmatpush1.bf16.msra.mxu0 %v7943_v63  ;;  %v858_v52 = vld [vmem:[#allocation2 + $0x1778] sm:$0xff] }
 0x39a   :  { %6673 = vmatprep.subr.bf16.mxu0 %v7948_v3 }
 0x39b   :  { %5722 = vmatpush1.bf16.msra.mxu1 %v7399_v4 }
 0x39c   :  { %5723 = vmatprep.subr.bf16.mxu1 %v7408_v5  ;;  %v900_v5 = vrot.slane %v8446_v33, %v899_v62 }
 0x39d   :  { %6674 = vmatpush1.bf16.msra.mxu0 %v7946_v6  ;;  %v7496_v6 = vcombine.high %v798_v1, %v802_v16 }
 0x39e   :  { %6675 = vmatprep.subr.bf16.mxu0 %v7951_v9 }
 0x39f   :  { %5724 = vmatpush1.bf16.msra.mxu1 %v7407_v10 }
 0x3a0   :  { %5725 = vmatprep.subr.bf16.mxu1 %v7416_v38 }
 0x3a1   :  { %6676 = vmatpush1.bf16.msra.mxu0 %v7949_v11  ;;  %v7495_v11 = vcombine.low %v798_v1, %v802_v16  ;;  %v870_v16 = vld [vmem:[#allocation2 + $0x17d8] sm:$0xff] }
 0x3a2   :  { %6677 = vmatprep.subr.bf16.mxu0 %v7954_v14  ;;  %v7504_v14 = vcombine.high %v806_v36, %v810_v7 }
 0x3a3   :  { %5726 = vmatpush1.bf16.msra.mxu1 %v7415_v41 }
 0x3a4   :  { %5727 = vmatprep.subr.bf16.mxu1 %v7424_v13  ;;  %v814_v13 = vld [vmem:[#allocation2 + $0x1618] sm:$0xff] }
 0x3a5   :  { %6678 = vmatpush1.bf16.msra.mxu0 %v7952_v15  ;;  %v818_v15 = vld [vmem:[#allocation2 + $0x1638] sm:$0xff] }
 0x3a6   :  { %6679 = vmatprep.subr.bf16.mxu0 %v7957_v20 }
 0x3a7   :  { %5728 = vmatpush1.bf16.msra.mxu1 %v7423_v48  ;;  %v7503_v48 = vcombine.low %v806_v36, %v810_v7  ;;  %v7988_v7 = vld [vmem:[#allocation7 + $0x380] ss:$8 sps:$4 sm:$0xff]  }
 0x3a8   :  { %5729 = vmatprep.subr.bf16.mxu1 %v7432_v53  ;;  %v7969_v53 = vld [vmem:[#allocation7 + $0x314] ss:$8 sps:$4 sm:$0xff]  }
 0x3a9   :  { %6680 = vmatpush1.bf16.msra.mxu0 %v7955_v47  ;;  %v7512_v47 = vcombine.high %v814_v13, %v818_v15 }
 0x3aa   :  { %6681 = vmatprep.subr.bf16.mxu0 %v7960_v25  ;;  %v7967_v25 = vld [vmem:[#allocation7 + $0x310] ss:$8 sps:$4 sm:$0xff]  }
 0x3ab   :  { %5730 = vmatpush1.bf16.msra.mxu1 %v7431_v58  ;;  %v7511_v58 = vcombine.low %v814_v13, %v818_v15  ;;  %v8000_v13 = vld [vmem:[#allocation7 + $0x3c0] ss:$8 sps:$4 sm:$0xff]   ;;  %v8005_v15 = vld [vmem:[#allocation7 + $0x3d4] ss:$8 sps:$4 sm:$0xff]  }
 0x3ac   :  { %5731 = vmatprep.subr.bf16.mxu1 %v7440_v51  ;;  %v7972_v51 = vld [vmem:[#allocation7 + $0x324] ss:$8 sps:$4 sm:$0xff]  }
 0x3ad   :  { %6682 = vmatpush1.bf16.msra.mxu0 %v7958_v39  ;;  %v7520_v39 = vcombine.high %v822_v23, %v826_v24 }
 0x3ae   :  { %6683 = vmatprep.subr.bf16.mxu0 %v7963_v27  ;;  %v7970_v27 = vld [vmem:[#allocation7 + $0x320] ss:$8 sps:$4 sm:$0xff]  }
 0x3af   :  { %5732 = vmatpush1.bf16.msra.mxu1 %v7439_v28  ;;  %v7519_v28 = vcombine.low %v822_v23, %v826_v24 }
 0x3b0   :  { %5742 = vmatprep.subr.bf16.mxu1 %v7448_v32  ;;  %v7975_v32 = vld [vmem:[#allocation7 + $0x334] ss:$8 sps:$4 sm:$0xff]  }
 0x3b1   :  { %6684 = vmatpush1.bf16.msra.mxu0 %v7961_v34  ;;  %v7528_v34 = vcombine.high %v830_v18, %v834_v26 }
 0x3b2   :  { %6694 = vmatprep.subr.bf16.mxu0 %v7966_v61  ;;  %5734 = vmatmul.mubr.bf16.vlgmr.msra.gmra.mrb[8].mxu1 %v8378_v2  ;;  %v794_v2 = vld [vmem:[#allocation2 + $0x1578] sm:$0xff] }
 0x3b3   :  { %5743 = vmatpush1.bf16.msra.mxu1 %v7447_v37  ;;  %5774 = vmatprep.mubr.bf16.mxu1 %v8382_v8  ;;  %v895_v8 = vsub.s32 4, %v8412_v31  ;;  %v7488_v63 = vcombine.high %v790_v59, %v794_v2  ;;  %v7487_v4 = vcombine.low %v790_v59, %v794_v2  ;;  %v7973_v61 = vld [vmem:[#allocation7 + $0x330] ss:$8 sps:$4 sm:$0xff]   ;;  %v7527_v37 = vcombine.low %v830_v18, %v834_v26 }
 0x3b4   :  { %5744 = vmatprep.subr.bf16.mxu1 %v7456_v40  ;;  %v7978_v40 = vld [vmem:[#allocation7 + $0x344] ss:$8 sps:$4 sm:$0xff]   ;;  %v862_v2 = vld [vmem:[#allocation2 + $0x1798] sm:$0xff] }
 0x3b5   :  { %v896_v3 = vrot.slane %v8446_v33, %v895_v8  ;;  %v7982_v8 = vld [vmem:[#allocation7 + $0x360] ss:$8 sps:$4 sm:$0xff]  }
 0x3b7   :  { %5745 = vmatpush1.bf16.msra.mxu1 %v7455_v44  ;;  %v850_v44 = vld [vmem:[#allocation2 + $0x1738] sm:$0xff] }
 0x3b8   :  { %5746 = vmatprep.subr.bf16.mxu1 %v7464_v45  ;;  %v7976_v45 = vld [vmem:[#allocation7 + $0x340] ss:$8 sps:$4 sm:$0xff]  }
 0x3bb   :  { %5747 = vmatpush1.bf16.msra.mxu1 %v7463_v49  ;;  %v7544_v49 = vcombine.high %v846_v43, %v850_v44 }
 0x3bc   :  { %5748 = vmatprep.subr.bf16.mxu1 %v7472_v50  ;;  %v854_v50 = vld [vmem:[#allocation2 + $0x1758] sm:$0xff] }
 0x3bd   :  { %v7552_v59 = vcombine.high %v854_v50, %v858_v52  ;;  %v7551_v62 = vcombine.low %v854_v50, %v858_v52 }
 0x3bf   :  { %5749 = vmatpush1.bf16.msra.mxu1 %v7471_v55  ;;  %v7543_v55 = vcombine.low %v846_v43, %v850_v44 }
 0x3c0   :  { %5750 = vmatprep.subr.bf16.mxu1 %v7480_v56  ;;  %v7984_v56 = vld [vmem:[#allocation7 + $0x364] ss:$8 sps:$4 sm:$0xff]  }
 0x3c3   :  { %5751 = vmatpush1.bf16.msra.mxu1 %v7479_v60  ;;  %v866_v60 = vld [vmem:[#allocation2 + $0x17b8] sm:$0xff] }
 0x3c4   :  { %5752 = vmatprep.subr.bf16.mxu1 %v7488_v63  ;;  %v7987_v63 = vld [vmem:[#allocation7 + $0x374] ss:$8 sps:$4 sm:$0xff]   ;;  %v7560_v1 = vcombine.high %v862_v2, %v866_v60 }
 0x3c7   :  { %v5530_v9 = vpop.f32.mrb[4].mxu0  ;;  %5753 = vmatpush1.bf16.msra.mxu1 %v7487_v4  ;;  %v7985_v4 = vld [vmem:[#allocation7 + $0x370] ss:$8 sps:$4 sm:$0xff]  }
 0x3c8   :  { %v7703_v10 = vadd.f32 %v5530_v9, %v896_v3  ;;  %v5532_v38 = vpop.f32.mrb[5].mxu0  ;;  %5754 = vmatprep.subr.bf16.mxu1 %v7496_v6  ;;  %v874_v3 = vld [vmem:[#allocation2 + $0x17f8] sm:$0xff]  ;;  %v7990_v6 = vld [vmem:[#allocation7 + $0x384] ss:$8 sps:$4 sm:$0xff]  }
 0x3c9   :  { %v7704_v12 = vadd.f32 %v5532_v38, %v900_v5  ;;  %v5534_v29 = vpop.f32.mrb[6].mxu0  ;;  %v7559_v5 = vcombine.low %v862_v2, %v866_v60  ;;  %v7568_v36 = vcombine.high %v870_v16, %v874_v3  ;;  %v7567_v9 = vcombine.low %v870_v16, %v874_v3  ;;  %v7991_v38 = vld [vmem:[#allocation7 + $0x390] ss:$8 sps:$4 sm:$0xff]  }
 0x3ca   :  { %v5535_v41 = vpop.f32.mrb[7].mxu0  ;;  %v5787_v20 = vpack.c.bf16 %v7703_v10, %v7703_v10  ;;  %v7993_v10 = vld [vmem:[#allocation7 + $0x394] ss:$8 sps:$4 sm:$0xff]  }
 0x3cb   :  { %v5788_v21 = vpack.c.bf16 %v7704_v12, %v7704_v12  ;;  %5755 = vmatpush1.bf16.msra.mxu1 %v7495_v11  ;;  %v7996_v11 = vld [vmem:[#allocation7 + $0x3a4] ss:$8 sps:$4 sm:$0xff]   ;;  %v7994_v12 = vld [vmem:[#allocation7 + $0x3a0] ss:$8 sps:$4 sm:$0xff]   ;;  %v7999_v29 = vld [vmem:[#allocation7 + $0x3b4] ss:$8 sps:$4 sm:$0xff]  }
 0x3cc   :  { %5756 = vmatprep.subr.bf16.mxu1 %v7504_v14  ;;  %v7997_v14 = vld [vmem:[#allocation7 + $0x3b0] ss:$8 sps:$4 sm:$0xff]   ;;  %v8002_v41 = vld [vmem:[#allocation7 + $0x3c4] ss:$8 sps:$4 sm:$0xff]  }
 0x3cd   :  { %6685 = vmatprep.mubr.bf16.mxu0 %v5788_v21  ;;  %v8003_v21 = vld [vmem:[#allocation7 + $0x3d0] ss:$8 sps:$4 sm:$0xff]  }
 0x3ce   :  { %6686 = vmatmul.mubr.bf16.vlgmr.msra.gmra.mrb[8].mxu0 %v5787_v20  ;;  %v8006_v20 = vld [vmem:[#allocation7 + $0x3e0] ss:$8 sps:$4 sm:$0xff]  }
 0x3cf   :  { %6695 = vmatpush1.bf16.msra.mxu0 %v7964_v17  ;;  %5757 = vmatpush1.bf16.msra.mxu1 %v7503_v48  ;;  %v8008_v17 = vld [vmem:[#allocation7 + $0x3e4] ss:$8 sps:$4 sm:$0xff]   ;;  %v8009_v48 = vld [vmem:[#allocation7 + $0x3f0] ss:$8 sps:$4 sm:$0xff]  }
 0x3d0   :  { %6696 = vmatprep.subr.bf16.mxu0 %v7969_v53  ;;  %5758 = vmatprep.subr.bf16.mxu1 %v7512_v47  ;;  %v903_v53 = vsub.s32 6, %v8412_v31  ;;  %v907_v47 = vsub.s32 7, %v8412_v31 }
 0x3d2   :  { %v904_v23 = vrot.slane %v8446_v33, %v903_v53  ;;  %v908_v24 = vrot.slane %v8446_v33, %v907_v47 }
 0x3d3   :  { %6697 = vmatpush1.bf16.msra.mxu0 %v7967_v25  ;;  %5759 = vmatpush1.bf16.msra.mxu1 %v7511_v58 }
 0x3d4   :  { %6698 = vmatprep.subr.bf16.mxu0 %v7972_v51  ;;  %5760 = vmatprep.subr.bf16.mxu1 %v7520_v39 }
 0x3d7   :  { %6699 = vmatpush1.bf16.msra.mxu0 %v7970_v27  ;;  %5761 = vmatpush1.bf16.msra.mxu1 %v7519_v28 }
 0x3d8   :  { %6700 = vmatprep.subr.bf16.mxu0 %v7975_v32  ;;  %5762 = vmatprep.subr.bf16.mxu1 %v7528_v34  ;;  %v5919_v32 = vld [vmem:[#allocation8] sm:$0x3]  ;;  %v6735_v34 = vld [vmem:[#allocation10] sm:$0x3] }
 0x3d9   :  { %v5924_v35 = vrot.slane %v5919_v32, %v8415_v0  ;;  %v5928_v31 = vrot.slane %v5919_v32, %v8418_v19 }
 0x3db   :  { %6701 = vmatpush1.bf16.msra.mxu0 %v7973_v61  ;;  %5763 = vmatpush1.bf16.msra.mxu1 %v7527_v37  ;;  %v6740_v61 = vrot.slane %v6735_v34, %v8415_v0  ;;  %v6744_v37 = vrot.slane %v6735_v34, %v8418_v19 }
 0x3dc   :  { %6702 = vmatprep.subr.bf16.mxu0 %v7978_v40  ;;  %5764 = vmatprep.subr.bf16.mxu1 %v7536_v42  ;;  %v6754_v42 = vrot.slane %v6749_v57, %v8415_v0 }
 0x3df   :  { %6703 = vmatpush1.bf16.msra.mxu0 %v7976_v45  ;;  %5765 = vmatpush1.bf16.msra.mxu1 %v7535_v46  ;;  %v6758_v45 = vrot.slane %v6749_v57, %v8418_v19 }
 0x3e0   :  { %6704 = vmatprep.subr.bf16.mxu0 %v7981_v22  ;;  %5766 = vmatprep.subr.bf16.mxu1 %v7544_v49 }
 0x3e3   :  { %6705 = vmatpush1.bf16.msra.mxu0 %v7979_v54  ;;  %5767 = vmatpush1.bf16.msra.mxu1 %v7543_v55 }
 0x3e4   :  { %6706 = vmatprep.subr.bf16.mxu0 %v7984_v56  ;;  %5768 = vmatprep.subr.bf16.mxu1 %v7552_v59 }
 0x3e7   :  { %6707 = vmatpush1.bf16.msra.mxu0 %v7982_v8  ;;  %5769 = vmatpush1.bf16.msra.mxu1 %v7551_v62 }
 0x3e8   :  { %6708 = vmatprep.subr.bf16.mxu0 %v7987_v63  ;;  %5770 = vmatprep.subr.bf16.mxu1 %v7560_v1 }
 0x3eb   :  { %6709 = vmatpush1.bf16.msra.mxu0 %v7985_v4  ;;  %5771 = vmatpush1.bf16.msra.mxu1 %v7559_v5 }
 0x3ec   :  { %6710 = vmatprep.subr.bf16.mxu0 %v7990_v6  ;;  %5772 = vmatprep.subr.bf16.mxu1 %v7568_v36 }
 0x3ef   :  { %6711 = vmatpush1.bf16.msra.mxu0 %v7988_v7  ;;  %5773 = vmatpush1.bf16.msra.mxu1 %v7567_v9 }
 0x3f0   :  { %6712 = vmatprep.subr.bf16.mxu0 %v7993_v10 }
 0x3f2   :  { %5775 = vmatmul.mubr.bf16.vlgmr.msra.gmra.mrb[8].mxu1 %v8390_v30  ;;  %v8011_v30 = vld [vmem:[#allocation7 + $0x3f4] ss:$8 sps:$4 sm:$0xff]  }
 0x3f3   :  { %6713 = vmatpush1.bf16.msra.mxu0 %v7991_v38 }
 0x3f4   :  { %6714 = vmatprep.subr.bf16.mxu0 %v7996_v11 }
 0x3f7   :  { %6715 = vmatpush1.bf16.msra.mxu0 %v7994_v12 }
 0x3f8   :  { %6716 = vmatprep.subr.bf16.mxu0 %v7999_v29 }
 0x3fb   :  { %6717 = vmatpush1.bf16.msra.mxu0 %v7997_v14 }
 0x3fc   :  { %6718 = vmatprep.subr.bf16.mxu0 %v8002_v41 }
 0x3ff   :  { %6719 = vmatpush1.bf16.msra.mxu0 %v8000_v13 }
 0x400   :  { %6720 = vmatprep.subr.bf16.mxu0 %v8005_v15 }
 0x403   :  { %6721 = vmatpush1.bf16.msra.mxu0 %v8003_v21 }
 0x404   :  { %6722 = vmatprep.subr.bf16.mxu0 %v8008_v17 }
 0x407   :  { %6723 = vmatpush1.bf16.msra.mxu0 %v8006_v20 }
 0x408   :  { %6724 = vmatprep.subr.bf16.mxu0 %v8011_v30 }
 0x40b   :  { %6725 = vmatpush1.bf16.msra.mxu0 %v8009_v48 }
 0x4c5   :  { %v5776_v25 = vpop.f32.mrb[8].mxu1 }
 0x4c6   :  { %v7705_v58 = vadd.f32 %v5776_v25, %v904_v23  ;;  %v5778_v51 = vpop.f32.mrb[9].mxu1 }
 0x4c7   :  { %v7706_v39 = vadd.f32 %v5778_v51, %v908_v24  ;;  %v5780_v18 = vpop.f32.mrb[10].mxu1 }
 0x4c8   :  { %v5781_v26 = vpop.f32.mrb[11].mxu1  ;;  %v5789_v28 = vpack.c.bf16 %v7705_v58, %v7705_v58 }
 0x4c9   :  { %v5790_v27 = vpack.c.bf16 %v7706_v39, %v7706_v39 }
 0x4cb   :  { %6726 = vmatprep.mubr.bf16.mxu0 %v5790_v27 }
 0x4cc   :  { %6727 = vmatmul.mubr.bf16.vlgmr.msra.gmra.mrb[8].mxu0 %v5789_v28 }
 0x59f   :  { %v6728_v33 = vpop.f32.mrb[8].mxu0 }
 0x5a0   :  { %v7707_v40 = vadd.f32 %v6728_v33, %v5924_v35  ;;  %v6730_v43 = vpop.f32.mrb[9].mxu0 }
 0x5a1   :  { %v7708_v44 = vadd.f32 %v6730_v43, %v5928_v31  ;;  %v6732_v46 = vpop.f32.mrb[10].mxu0 }
 0x5a2   :  { %v6747_v22 = vmul.f32 %v7707_v40, %v6740_v61  ;;  %v6733_v49 = vpop.f32.mrb[11].mxu0 }
 0x5a3   :  { %v6748_v50 = vmul.f32 %v7708_v44, %v6744_v37 }
 0x5a4   :  { %v6761_v52 = vadd.f32 %v6754_v42, %v6747_v22 }
 0x5a5   :  { %v6762_v54 = vadd.f32 %v6758_v45, %v6748_v50 }
 0x5a6   :  { %vm6763_vm0 = vcmp.ge.f32.partialorder %v6761_v52, 0.0  ;;  %v6765_v55 = vmul.f32 0.01, %v6761_v52 }
 0x5a7   :  { %vm6764_vm1 = vcmp.ge.f32.partialorder %v6762_v54, 0.0  ;;  %v6766_v56 = vmul.f32 0.01, %v6762_v54 }
 0x5a8   :  { %v6767_v59 = vsel %vm6763_vm0, %v6761_v52, %v6765_v55 }
 0x5a9   :  { %v6768_v2 = vsel %vm6764_vm1, %v6762_v54, %v6766_v56  ;;  %6769 = vst [vmem:[#allocation13] sm:$0xff] %v6767_v59 }
 0x5aa   :  { %6770 = vst [vmem:[#allocation13 + $0x8] sm:$0xff] %v6768_v2 }
 0x5ab   :  { %8156 = shalt.err (!%p8153_p10)
}
 0x5ac   :  { %s8157_s3 = scalar_lea.hbm %s8492_s7, 256 }
 0x5ad   :  { %p8158_p11 = scmp.ne.s32.totalorder %s8492_s7, %s8157_s3  ;;  %p8161_p12 = scmp.lt.u32.totalorder %s8157_s3, %s8492_s7 }
 0x5af   :  { %p8163_p13 = pnand %p8161_p12, %p8158_p11 }
 0x5b1   :  { %8166 = shalt.err (!%p8163_p13)
}
 0x5b2   :  { %6780 = dma.vmem_to_hbm [thread:$0]  %s6778_s11, 256, %s8492_s7, [#allocation4]  }
 0x5b3   :  { %8175 = dma.done.wait [#allocation4], 256  }
 0x5b4   :  { %8176 = vsyncadd [#allocation4], 4294967040 }
 0x5b5   :  { %6784 = vsyncpa [#allocation3], 1 }
 0x5b6   :  { %6785 = vsyncpa [#allocation6], 1 }
 0x5b7   :  { %6786 = vsyncpa [#allocation9], 1 }
 0x5b8   :  { %6787 = vsyncpa [#allocation12], 1 }
 0x5b9   :  { %6788 = vsyncpa [#allocation4], 1 }

</bundles_post_ra>
